<compile_context>
chip_gen: v7x
topology: tpu7x:2x2x1
jax: 0.10.0
libtpu: 0.0.40
codegen_flags: <defaults>
</compile_context>

<pallas_src>
import functools

import jax
import jax.numpy as jnp
from jax import lax
from jax.experimental import pallas as pl
from jax.experimental.pallas import tpu as pltpu


def _propagation_kernel(ds_ref, src_ref, gx_ref, gy_ref, oe_ref, oo_ref,
                        e_scr, o_scr):
    """One batch element per grid step.

    ds_ref  : [1, num_depth, H*W]     flattened depth samples
    src_ref : [1, H, W]               middle depth plane (grid_sample source)
    gx_ref  : [1, neighbors, H*W]     grid x coords, one row per neighbor
    gy_ref  : [1, neighbors, H*W]     grid y coords
    oe_ref  : [1, half, H*W]          sorted channels 0,2,4,...  (s[2k])
    oo_ref  : [1, half, H*W]          sorted channels 1,3,5,...  (s[2k+1])
    e_scr/o_scr : VMEM [P, H*W] f32   assembly slabs (P = half rounded up to 8)
    """
    f32 = jnp.float32
    nd, HW = ds_ref.shape[1], ds_ref.shape[2]
    H, W = src_ref.shape[1], src_ref.shape[2]
    nbr = gx_ref.shape[1]
    D = nd + nbr
    half = D // 2
    P = e_scr.shape[0]

    # Sentinel: valid as long as no real depth value equals float32 max.
    BIG = float(jnp.finfo(jnp.float32).max)

    src = src_ref[0].astype(f32)                       # [H, W]

    # Float row/col index grids, hoisted out of the neighbor loop.
    iota_h = lax.broadcasted_iota(jnp.int32, (H, HW), 0).astype(f32)   # [H, HW]
    iota_w = iota_h if W == H else \
        lax.broadcasted_iota(jnp.int32, (W, HW), 0).astype(f32)        # [W, HW]

    # ---- assembly slabs: init only the sentinel rows -------------------
    if P > half:
        e_scr[pl.ds(half, P - half), :] = jnp.full((P - half, HW), BIG, f32)
        o_scr[pl.ds(half, P - half), :] = jnp.full((P - half, HW), BIG, f32)

    # depth-sample channels -> slab rows (channel ch -> E[ch] / O[ch-half];
    # the assignment is an arbitrary permutation, the sort makes it irrelevant)
    ds = ds_ref[0].astype(f32)                         # [nd, HW]
    n_e = min(nd, half)
    e_scr[pl.ds(0, n_e), :] = ds[0:n_e]
    if nd > half:
        o_scr[pl.ds(0, nd - half), :] = ds[half:nd]

    # ---- per-neighbor bilinear gather (grid_sample, border, align=False) ----
    for c in range(nbr):
        gxc = gx_ref[0, pl.ds(c, 1), :].astype(f32)    # [1, HW]
        gyc = gy_ref[0, pl.ds(c, 1), :].astype(f32)    # [1, HW]
        # un-normalize + border clamp (same affine expression as the reference)
        ix = jnp.clip(((gxc + 1.0) * W - 1.0) * 0.5, 0.0, W - 1.0)
        iy = jnp.clip(((gyc + 1.0) * H - 1.0) * 0.5, 0.0, H - 1.0)
        # bilinear "hat" weights: non-zero only at floor/ceil, sums to 1,
        # reproduces the reference weights to within 1 ulp.
        wx = jnp.maximum(1.0 - jnp.abs(iota_w - ix), 0.0)   # [W, HW]
        wy = jnp.maximum(1.0 - jnp.abs(iota_h - iy), 0.0)   # [H, HW]
        # one small MXU matmul (contract over W) + VPU multiply + sublane reduce
        t = jnp.dot(src, wx, preferred_element_type=jnp.float32)   # [H, HW]
        v = jnp.sum(t * wy, axis=0, keepdims=True)                  # [1, HW]
        ch = nd + c
        if ch < half:
            e_scr[pl.ds(ch, 1), :] = v
        else:
            o_scr[pl.ds(ch - half, 1), :] = v

    # ---- register-resident odd-even transposition sort -----------------
    # Virtual sequence s[2k] = E[k], s[2k+1] = O[k]; rows >= half are +FLT_MAX
    # sentinels that never move.  D passes sort the D real values.
    E = e_scr[...]                                    # [P, HW]  (4 vregs)
    O = o_scr[...]                                    # [P, HW]  (4 vregs)
    big_row = jnp.full((1, HW), BIG, f32)

    for t_pass in range(D):
        if t_pass % 2 == 0:
            # compare (s[2k], s[2k+1]) = (E[k], O[k])   -- aligned
            lo = jnp.minimum(E, O)
            hi = jnp.maximum(E, O)
            E, O = lo, hi
        else:
            # compare (s[2k+1], s[2k+2]) = (O[k], E[k+1]) -- shift E up by one;
            # boundary row is a +FLT_MAX sentinel so no extra masks are needed.
            e_up = jnp.concatenate([E[1:, :], big_row], axis=0)     # E[k+1]
            lo = jnp.minimum(O, e_up)
            hi = jnp.maximum(O, e_up)
            O = lo
            E = jnp.concatenate([E[0:1, :], hi[:-1, :]], axis=0)    # E[k+1]=hi[k]

    # ---- epilogue: two aligned, lane-dense block stores -----------------
    oe_ref[...] = E[0:half][None].astype(oe_ref.dtype)
    oo_ref[...] = O[0:half][None].astype(oo_ref.dtype)


@functools.partial(jax.jit, static_argnums=(0, 1, 2, 7, 8))
def propagation_forward(batch, height, width, depth_sample, grid,
                        depth_min, depth_max, depth_interval_scale,
                        neighbors=16):
    """Pallas equivalent of Propagation.forward.

    depth_sample: [B, num_depth, H, W] float32
    grid:         [B, neighbors*H, W, 2] float32 (grid_sample coords)
    depth_min / depth_max / depth_interval_scale are unused (as in the
    reference PyTorch forward) but kept for signature parity.
    """
    del depth_min, depth_max, depth_interval_scale  # unused in torch forward
    B, nd, H, W = depth_sample.shape
    assert (B, H, W) == (batch, height, width)
    HW = H * W
    D = nd + neighbors
    assert D % 2 == 0, "num_depth + neighbors must be even for the slab sort"
    half = D // 2
    P = ((half + 7) // 8) * 8

    # --- glue (plain JAX): flatten to pixel-minor layout, split grid coords ---
    ds_flat = depth_sample.reshape(B, nd, HW)
    src_mid = depth_sample[:, nd // 2]                    # [B, H, W]
    gx = grid[..., 0].reshape(B, neighbors, HW)
    gy = grid[..., 1].reshape(B, neighbors, HW)

    out_e, out_o = pl.pallas_call(
        _propagation_kernel,
        out_shape=(jax.ShapeDtypeStruct((B, half, HW), depth_sample.dtype),
                   jax.ShapeDtypeStruct((B, half, HW), depth_sample.dtype)),
        grid_spec=pltpu.PrefetchScalarGridSpec(
            num_scalar_prefetch=0,
            grid=(B,),
            in_specs=[
                pl.BlockSpec((1, nd, HW), lambda b: (b, 0, 0)),
                pl.BlockSpec((1, H, W), lambda b: (b, 0, 0)),
                pl.BlockSpec((1, neighbors, HW), lambda b: (b, 0, 0)),
                pl.BlockSpec((1, neighbors, HW), lambda b: (b, 0, 0)),
            ],
            out_specs=[
                pl.BlockSpec((1, half, HW), lambda b: (b, 0, 0)),
                pl.BlockSpec((1, half, HW), lambda b: (b, 0, 0)),
            ],
            scratch_shapes=[
                pltpu.VMEM((P, HW), jnp.float32),
                pltpu.VMEM((P, HW), jnp.float32),
            ],
        ),
        compiler_params=pltpu.CompilerParams(
            dimension_semantics=("parallel",),
        ),
    )(ds_flat, src_mid, gx, gy)

    # Wrapper-side layout plumbing: interleave even/odd sorted channels.
    out = jnp.stack([out_e, out_o], axis=2).reshape(B, D, H, W)
    return out


def propagation_ref(depth_sample, grid, neighbors):
    """Pure-JAX reference (matches F.grid_sample bilinear/border/align_corners=False)."""
    B, nd, H, W = depth_sample.shape
    gx = grid[..., 0]
    gy = grid[..., 1]
    src = depth_sample[:, nd // 2]                         # [B, H, W]
    ix = jnp.clip(((gx + 1.0) * W - 1.0) * 0.5, 0.0, W - 1.0)
    iy = jnp.clip(((gy + 1.0) * H - 1.0) * 0.5, 0.0, H - 1.0)
    x0 = jnp.floor(ix)
    y0 = jnp.floor(iy)
    wx1 = ix - x0
    wx0 = 1.0 - wx1
    wy1 = iy - y0
    wy0 = 1.0 - wy1
    x0i = x0.astype(jnp.int32)
    y0i = y0.astype(jnp.int32)
    x1i = jnp.minimum(x0i + 1, W - 1)
    y1i = jnp.minimum(y0i + 1, H - 1)

    def gather(yy, xx):
        return jax.vmap(lambda s, y, x: s[y, x])(src, yy, xx)

    v = (wy0 * wx0 * gather(y0i, x0i) + wy0 * wx1 * gather(y0i, x1i)
         + wy1 * wx0 * gather(y1i, x0i) + wy1 * wx1 * gather(y1i, x1i))
    v = v.reshape(B, neighbors, H, W)
    allp = jnp.concatenate([depth_sample, v], axis=1)
    return jnp.sort(allp, axis=1)


if __name__ == "__main__":
    B, nd, H, W = 2, 8, 16, 16
    neighbors = 16

    key = jax.random.PRNGKey(0)
    k1, k2 = jax.random.split(key)
    depth_sample = jax.random.uniform(k1, (B, nd, H, W), jnp.float32, 1.0, 10.0)
    # grid slightly beyond [-1, 1] to exercise border padding.
    grid = jax.random.uniform(k2, (B, neighbors * H, W, 2), jnp.float32, -1.1, 1.1)
    depth_min = jnp.full((B,), 0.5, jnp.float32)   # unused (parity with torch API)
    depth_max = jnp.full((B,), 20.0, jnp.float32)  # unused

    out = propagation_forward(B, H, W, depth_sample, grid,
                              depth_min, depth_max, 0.025, neighbors)
    out = jax.block_until_ready(out)

    ref = propagation_ref(depth_sample, grid, neighbors)
    assert out.shape == (B, nd + neighbors, H, W)
    assert jnp.allclose(out, ref, rtol=1e-5, atol=1e-5), \
        f"max abs err {jnp.max(jnp.abs(out - ref))}"
    print("KERNEL_OK")
</pallas_src>

<mosaic_0001>
module attributes {stable_mosaic.version = 11 : i64} {
  func.func @_propagation_kernel(%arg0: i32, %arg1: memref<1x8x256xf32, #tpu.memory_space<vmem>>, %arg2: memref<1x16x16xf32, #tpu.memory_space<vmem>>, %arg3: memref<1x16x256xf32, #tpu.memory_space<vmem>>, %arg4: memref<1x16x256xf32, #tpu.memory_space<vmem>>, %arg5: memref<1x12x256xf32, #tpu.memory_space<vmem>>, %arg6: memref<1x12x256xf32, #tpu.memory_space<vmem>>, %arg7: memref<16x256xf32, #tpu.memory_space<vmem>>, %arg8: memref<16x256xf32, #tpu.memory_space<vmem>>) attributes {dimension_semantics = [#tpu.dimension_semantics<parallel>], iteration_bounds = array<i64: 2>, scalar_prefetch = 0 : i64, scratch_operands = 2 : i64, tpu.core_type = #tpu.core_type<tc>, window_params = [{transform_indices = @transform_0, window_bounds = array<i64: 1, 8, 256>}, {transform_indices = @transform_1, window_bounds = array<i64: 1, 16, 16>}, {transform_indices = @transform_2, window_bounds = array<i64: 1, 16, 256>}, {transform_indices = @transform_3, window_bounds = array<i64: 1, 16, 256>}, {transform_indices = @transform_4, window_bounds = array<i64: 1, 12, 256>}, {transform_indices = @transform_5, window_bounds = array<i64: 1, 12, 256>}]} {
    %c0 = arith.constant 0 : index
    %c0_0 = arith.constant 0 : index
    %c0_1 = arith.constant 0 : index
    %0 = vector.load %arg2[%c0, %c0_0, %c0_1] : memref<1x16x16xf32, #tpu.memory_space<vmem>>, vector<1x16x16xf32>
    %1 = vector.shape_cast %0 : vector<1x16x16xf32> to vector<16x16xf32>
    %2 = tpu.iota {dimensions = array<i32: 0>} : vector<16x256xi32>
    %3 = arith.sitofp %2 : vector<16x256xi32> to vector<16x256xf32>
    %cst = arith.constant 3.40282347E+38 : f32
    %4 = vector.broadcast %cst : f32 to vector<4x256xf32>
    %c12 = arith.constant 12 : index
    %c0_2 = arith.constant 0 : index
    %5 = vector.load %arg7[%c12, %c0_2] : memref<16x256xf32, #tpu.memory_space<vmem>>, vector<4x256xf32>
    tpu.vector_store %arg7[%c12, %c0_2], %4 {strides = array<i32>} : memref<16x256xf32, #tpu.memory_space<vmem>>, vector<4x256xf32>,
    %cst_3 = arith.constant 3.40282347E+38 : f32
    %6 = vector.broadcast %cst_3 : f32 to vector<4x256xf32>
    %c12_4 = arith.constant 12 : index
    %c0_5 = arith.constant 0 : index
    %7 = vector.load %arg8[%c12_4, %c0_5] : memref<16x256xf32, #tpu.memory_space<vmem>>, vector<4x256xf32>
    tpu.vector_store %arg8[%c12_4, %c0_5], %6 {strides = array<i32>} : memref<16x256xf32, #tpu.memory_space<vmem>>, vector<4x256xf32>,
    %c0_6 = arith.constant 0 : index
    %c0_7 = arith.constant 0 : index
    %c0_8 = arith.constant 0 : index
    %8 = vector.load %arg1[%c0_6, %c0_7, %c0_8] : memref<1x8x256xf32, #tpu.memory_space<vmem>>, vector<1x8x256xf32>
    %9 = vector.shape_cast %8 : vector<1x8x256xf32> to vector<8x256xf32>
    %c0_9 = arith.constant 0 : index
    %c0_10 = arith.constant 0 : index
    %10 = vector.load %arg7[%c0_9, %c0_10] : memref<16x256xf32, #tpu.memory_space<vmem>>, vector<8x256xf32>
    tpu.vector_store %arg7[%c0_9, %c0_10], %9 {strides = array<i32>} : memref<16x256xf32, #tpu.memory_space<vmem>>, vector<8x256xf32>,
    %c0_11 = arith.constant 0 : index
    %c0_12 = arith.constant 0 : index
    %c0_13 = arith.constant 0 : index
    %11 = vector.load %arg3[%c0_11, %c0_12, %c0_13] : memref<1x16x256xf32, #tpu.memory_space<vmem>>, vector<1x1x256xf32>
    %12 = vector.shape_cast %11 : vector<1x1x256xf32> to vector<1x256xf32>
    %c0_14 = arith.constant 0 : index
    %c0_15 = arith.constant 0 : index
    %c0_16 = arith.constant 0 : index
    %13 = vector.load %arg4[%c0_14, %c0_15, %c0_16] : memref<1x16x256xf32, #tpu.memory_space<vmem>>, vector<1x1x256xf32>
    %14 = vector.shape_cast %13 : vector<1x1x256xf32> to vector<1x256xf32>
    %cst_17 = arith.constant 1.000000e+00 : f32
    %15 = vector.broadcast %cst_17 : f32 to vector<1x256xf32>
    %16 = arith.addf %12, %15 : vector<1x256xf32>
    %cst_18 = arith.constant 1.600000e+01 : f32
    %17 = vector.broadcast %cst_18 : f32 to vector<1x256xf32>
    %18 = arith.mulf %16, %17 : vector<1x256xf32>
    %cst_19 = arith.constant 1.000000e+00 : f32
    %19 = vector.broadcast %cst_19 : f32 to vector<1x256xf32>
    %20 = arith.subf %18, %19 : vector<1x256xf32>
    %cst_20 = arith.constant 5.000000e-01 : f32
    %21 = vector.broadcast %cst_20 : f32 to vector<1x256xf32>
    %22 = arith.mulf %20, %21 : vector<1x256xf32>
    %cst_21 = arith.constant 0.000000e+00 : f32
    %cst_22 = arith.constant 1.500000e+01 : f32
    %23 = vector.broadcast %cst_21 : f32 to vector<1x256xf32>
    %24 = arith.maximumf %23, %22 : vector<1x256xf32>
    %25 = vector.broadcast %cst_22 : f32 to vector<1x256xf32>
    %26 = arith.minimumf %25, %24 : vector<1x256xf32>
    %cst_23 = arith.constant 1.000000e+00 : f32
    %27 = vector.broadcast %cst_23 : f32 to vector<1x256xf32>
    %28 = arith.addf %14, %27 : vector<1x256xf32>
    %cst_24 = arith.constant 1.600000e+01 : f32
    %29 = vector.broadcast %cst_24 : f32 to vector<1x256xf32>
    %30 = arith.mulf %28, %29 : vector<1x256xf32>
    %cst_25 = arith.constant 1.000000e+00 : f32
    %31 = vector.broadcast %cst_25 : f32 to vector<1x256xf32>
    %32 = arith.subf %30, %31 : vector<1x256xf32>
    %cst_26 = arith.constant 5.000000e-01 : f32
    %33 = vector.broadcast %cst_26 : f32 to vector<1x256xf32>
    %34 = arith.mulf %32, %33 : vector<1x256xf32>
    %cst_27 = arith.constant 0.000000e+00 : f32
    %cst_28 = arith.constant 1.500000e+01 : f32
    %35 = vector.broadcast %cst_27 : f32 to vector<1x256xf32>
    %36 = arith.maximumf %35, %34 : vector<1x256xf32>
    %37 = vector.broadcast %cst_28 : f32 to vector<1x256xf32>
    %38 = arith.minimumf %37, %36 : vector<1x256xf32>
    %39 = vector.broadcast %26 : vector<1x256xf32> to vector<16x256xf32>
    %40 = arith.subf %3, %39 : vector<16x256xf32>
    %41 = math.absf %40 : vector<16x256xf32>
    %cst_29 = arith.constant 1.000000e+00 : f32
    %42 = vector.broadcast %cst_29 : f32 to vector<16x256xf32>
    %43 = arith.subf %42, %41 : vector<16x256xf32>
    %cst_30 = arith.constant 0.000000e+00 : f32
    %44 = vector.broadcast %cst_30 : f32 to vector<16x256xf32>
    %45 = arith.maximumf %43, %44 : vector<16x256xf32>
    %46 = vector.broadcast %38 : vector<1x256xf32> to vector<16x256xf32>
    %47 = arith.subf %3, %46 : vector<16x256xf32>
    %48 = math.absf %47 : vector<16x256xf32>
    %cst_31 = arith.constant 1.000000e+00 : f32
    %49 = vector.broadcast %cst_31 : f32 to vector<16x256xf32>
    %50 = arith.subf %49, %48 : vector<16x256xf32>
    %cst_32 = arith.constant 0.000000e+00 : f32
    %51 = vector.broadcast %cst_32 : f32 to vector<16x256xf32>
    %52 = arith.maximumf %50, %51 : vector<16x256xf32>
    %cst_33 = arith.constant dense<0.000000e+00> : vector<16x256xf32>
    %53 = tpu.matmul %1, %45, %cst_33 {dimension_numbers = #tpu.dot_dimension_numbers<[1], [0], [0], [1], [0, 0, 1, 1], [], []>} : vector<16x16xf32>, vector<16x256xf32>, vector<16x256xf32> -> vector<16x256xf32>
    %54 = arith.mulf %53, %52 : vector<16x256xf32>
    %cst_34 = arith.constant dense<0.000000e+00> : vector<256xf32>
    %55 = vector.multi_reduction <add>, %54, %cst_34 [0] : vector<16x256xf32> to vector<256xf32>
    %56 = vector.shape_cast %55 : vector<256xf32> to vector<1x256xf32>
    %c8 = arith.constant 8 : index
    %c0_35 = arith.constant 0 : index
    %57 = vector.load %arg7[%c8, %c0_35] : memref<16x256xf32, #tpu.memory_space<vmem>>, vector<1x256xf32>
    tpu.vector_store %arg7[%c8, %c0_35], %56 {strides = array<i32>} : memref<16x256xf32, #tpu.memory_space<vmem>>, vector<1x256xf32>,
    %c0_36 = arith.constant 0 : index
    %c1 = arith.constant 1 : index
    %c0_37 = arith.constant 0 : index
    %58 = vector.load %arg3[%c0_36, %c1, %c0_37] : memref<1x16x256xf32, #tpu.memory_space<vmem>>, vector<1x1x256xf32>
    %59 = vector.shape_cast %58 : vector<1x1x256xf32> to vector<1x256xf32>
    %c0_38 = arith.constant 0 : index
    %c1_39 = arith.constant 1 : index
    %c0_40 = arith.constant 0 : index
    %60 = vector.load %arg4[%c0_38, %c1_39, %c0_40] : memref<1x16x256xf32, #tpu.memory_space<vmem>>, vector<1x1x256xf32>
    %61 = vector.shape_cast %60 : vector<1x1x256xf32> to vector<1x256xf32>
    %cst_41 = arith.constant 1.000000e+00 : f32
    %62 = vector.broadcast %cst_41 : f32 to vector<1x256xf32>
    %63 = arith.addf %59, %62 : vector<1x256xf32>
    %cst_42 = arith.constant 1.600000e+01 : f32
    %64 = vector.broadcast %cst_42 : f32 to vector<1x256xf32>
    %65 = arith.mulf %63, %64 : vector<1x256xf32>
    %cst_43 = arith.constant 1.000000e+00 : f32
    %66 = vector.broadcast %cst_43 : f32 to vector<1x256xf32>
    %67 = arith.subf %65, %66 : vector<1x256xf32>
    %cst_44 = arith.constant 5.000000e-01 : f32
    %68 = vector.broadcast %cst_44 : f32 to vector<1x256xf32>
    %69 = arith.mulf %67, %68 : vector<1x256xf32>
    %cst_45 = arith.constant 0.000000e+00 : f32
    %cst_46 = arith.constant 1.500000e+01 : f32
    %70 = vector.broadcast %cst_45 : f32 to vector<1x256xf32>
    %71 = arith.maximumf %70, %69 : vector<1x256xf32>
    %72 = vector.broadcast %cst_46 : f32 to vector<1x256xf32>
    %73 = arith.minimumf %72, %71 : vector<1x256xf32>
    %cst_47 = arith.constant 1.000000e+00 : f32
    %74 = vector.broadcast %cst_47 : f32 to vector<1x256xf32>
    %75 = arith.addf %61, %74 : vector<1x256xf32>
    %cst_48 = arith.constant 1.600000e+01 : f32
    %76 = vector.broadcast %cst_48 : f32 to vector<1x256xf32>
    %77 = arith.mulf %75, %76 : vector<1x256xf32>
    %cst_49 = arith.constant 1.000000e+00 : f32
    %78 = vector.broadcast %cst_49 : f32 to vector<1x256xf32>
    %79 = arith.subf %77, %78 : vector<1x256xf32>
    %cst_50 = arith.constant 5.000000e-01 : f32
    %80 = vector.broadcast %cst_50 : f32 to vector<1x256xf32>
    %81 = arith.mulf %79, %80 : vector<1x256xf32>
    %cst_51 = arith.constant 0.000000e+00 : f32
    %cst_52 = arith.constant 1.500000e+01 : f32
    %82 = vector.broadcast %cst_51 : f32 to vector<1x256xf32>
    %83 = arith.maximumf %82, %81 : vector<1x256xf32>
    %84 = vector.broadcast %cst_52 : f32 to vector<1x256xf32>
    %85 = arith.minimumf %84, %83 : vector<1x256xf32>
    %86 = vector.broadcast %73 : vector<1x256xf32> to vector<16x256xf32>
    %87 = arith.subf %3, %86 : vector<16x256xf32>
    %88 = math.absf %87 : vector<16x256xf32>
    %cst_53 = arith.constant 1.000000e+00 : f32
    %89 = vector.broadcast %cst_53 : f32 to vector<16x256xf32>
    %90 = arith.subf %89, %88 : vector<16x256xf32>
    %cst_54 = arith.constant 0.000000e+00 : f32
    %91 = vector.broadcast %cst_54 : f32 to vector<16x256xf32>
    %92 = arith.maximumf %90, %91 : vector<16x256xf32>
    %93 = vector.broadcast %85 : vector<1x256xf32> to vector<16x256xf32>
    %94 = arith.subf %3, %93 : vector<16x256xf32>
    %95 = math.absf %94 : vector<16x256xf32>
    %cst_55 = arith.constant 1.000000e+00 : f32
    %96 = vector.broadcast %cst_55 : f32 to vector<16x256xf32>
    %97 = arith.subf %96, %95 : vector<16x256xf32>
    %cst_56 = arith.constant 0.000000e+00 : f32
    %98 = vector.broadcast %cst_56 : f32 to vector<16x256xf32>
    %99 = arith.maximumf %97, %98 : vector<16x256xf32>
    %cst_57 = arith.constant dense<0.000000e+00> : vector<16x256xf32>
    %100 = tpu.matmul %1, %92, %cst_57 {dimension_numbers = #tpu.dot_dimension_numbers<[1], [0], [0], [1], [0, 0, 1, 1], [], []>} : vector<16x16xf32>, vector<16x256xf32>, vector<16x256xf32> -> vector<16x256xf32>
    %101 = arith.mulf %100, %99 : vector<16x256xf32>
    %cst_58 = arith.constant dense<0.000000e+00> : vector<256xf32>
    %102 = vector.multi_reduction <add>, %101, %cst_58 [0] : vector<16x256xf32> to vector<256xf32>
    %103 = vector.shape_cast %102 : vector<256xf32> to vector<1x256xf32>
    %c9 = arith.constant 9 : index
    %c0_59 = arith.constant 0 : index
    %104 = vector.load %arg7[%c9, %c0_59] : memref<16x256xf32, #tpu.memory_space<vmem>>, vector<1x256xf32>
    tpu.vector_store %arg7[%c9, %c0_59], %103 {strides = array<i32>} : memref<16x256xf32, #tpu.memory_space<vmem>>, vector<1x256xf32>,
    %c0_60 = arith.constant 0 : index
    %c2 = arith.constant 2 : index
    %c0_61 = arith.constant 0 : index
    %105 = vector.load %arg3[%c0_60, %c2, %c0_61] : memref<1x16x256xf32, #tpu.memory_space<vmem>>, vector<1x1x256xf32>
    %106 = vector.shape_cast %105 : vector<1x1x256xf32> to vector<1x256xf32>
    %c0_62 = arith.constant 0 : index
    %c2_63 = arith.constant 2 : index
    %c0_64 = arith.constant 0 : index
    %107 = vector.load %arg4[%c0_62, %c2_63, %c0_64] : memref<1x16x256xf32, #tpu.memory_space<vmem>>, vector<1x1x256xf32>
    %108 = vector.shape_cast %107 : vector<1x1x256xf32> to vector<1x256xf32>
    %cst_65 = arith.constant 1.000000e+00 : f32
    %109 = vector.broadcast %cst_65 : f32 to vector<1x256xf32>
    %110 = arith.addf %106, %109 : vector<1x256xf32>
    %cst_66 = arith.constant 1.600000e+01 : f32
    %111 = vector.broadcast %cst_66 : f32 to vector<1x256xf32>
    %112 = arith.mulf %110, %111 : vector<1x256xf32>
    %cst_67 = arith.constant 1.000000e+00 : f32
    %113 = vector.broadcast %cst_67 : f32 to vector<1x256xf32>
    %114 = arith.subf %112, %113 : vector<1x256xf32>
    %cst_68 = arith.constant 5.000000e-01 : f32
    %115 = vector.broadcast %cst_68 : f32 to vector<1x256xf32>
    %116 = arith.mulf %114, %115 : vector<1x256xf32>
    %cst_69 = arith.constant 0.000000e+00 : f32
    %cst_70 = arith.constant 1.500000e+01 : f32
    %117 = vector.broadcast %cst_69 : f32 to vector<1x256xf32>
    %118 = arith.maximumf %117, %116 : vector<1x256xf32>
    %119 = vector.broadcast %cst_70 : f32 to vector<1x256xf32>
    %120 = arith.minimumf %119, %118 : vector<1x256xf32>
    %cst_71 = arith.constant 1.000000e+00 : f32
    %121 = vector.broadcast %cst_71 : f32 to vector<1x256xf32>
    %122 = arith.addf %108, %121 : vector<1x256xf32>
    %cst_72 = arith.constant 1.600000e+01 : f32
    %123 = vector.broadcast %cst_72 : f32 to vector<1x256xf32>
    %124 = arith.mulf %122, %123 : vector<1x256xf32>
    %cst_73 = arith.constant 1.000000e+00 : f32
    %125 = vector.broadcast %cst_73 : f32 to vector<1x256xf32>
    %126 = arith.subf %124, %125 : vector<1x256xf32>
    %cst_74 = arith.constant 5.000000e-01 : f32
    %127 = vector.broadcast %cst_74 : f32 to vector<1x256xf32>
    %128 = arith.mulf %126, %127 : vector<1x256xf32>
    %cst_75 = arith.constant 0.000000e+00 : f32
    %cst_76 = arith.constant 1.500000e+01 : f32
    %129 = vector.broadcast %cst_75 : f32 to vector<1x256xf32>
    %130 = arith.maximumf %129, %128 : vector<1x256xf32>
    %131 = vector.broadcast %cst_76 : f32 to vector<1x256xf32>
    %132 = arith.minimumf %131, %130 : vector<1x256xf32>
    %133 = vector.broadcast %120 : vector<1x256xf32> to vector<16x256xf32>
    %134 = arith.subf %3, %133 : vector<16x256xf32>
    %135 = math.absf %134 : vector<16x256xf32>
    %cst_77 = arith.constant 1.000000e+00 : f32
    %136 = vector.broadcast %cst_77 : f32 to vector<16x256xf32>
    %137 = arith.subf %136, %135 : vector<16x256xf32>
    %cst_78 = arith.constant 0.000000e+00 : f32
    %138 = vector.broadcast %cst_78 : f32 to vector<16x256xf32>
    %139 = arith.maximumf %137, %138 : vector<16x256xf32>
    %140 = vector.broadcast %132 : vector<1x256xf32> to vector<16x256xf32>
    %141 = arith.subf %3, %140 : vector<16x256xf32>
    %142 = math.absf %141 : vector<16x256xf32>
    %cst_79 = arith.constant 1.000000e+00 : f32
    %143 = vector.broadcast %cst_79 : f32 to vector<16x256xf32>
    %144 = arith.subf %143, %142 : vector<16x256xf32>
    %cst_80 = arith.constant 0.000000e+00 : f32
    %145 = vector.broadcast %cst_80 : f32 to vector<16x256xf32>
    %146 = arith.maximumf %144, %145 : vector<16x256xf32>
    %cst_81 = arith.constant dense<0.000000e+00> : vector<16x256xf32>
    %147 = tpu.matmul %1, %139, %cst_81 {dimension_numbers = #tpu.dot_dimension_numbers<[1], [0], [0], [1], [0, 0, 1, 1], [], []>} : vector<16x16xf32>, vector<16x256xf32>, vector<16x256xf32> -> vector<16x256xf32>
    %148 = arith.mulf %147, %146 : vector<16x256xf32>
    %cst_82 = arith.constant dense<0.000000e+00> : vector<256xf32>
    %149 = vector.multi_reduction <add>, %148, %cst_82 [0] : vector<16x256xf32> to vector<256xf32>
    %150 = vector.shape_cast %149 : vector<256xf32> to vector<1x256xf32>
    %c10 = arith.constant 10 : index
    %c0_83 = arith.constant 0 : index
    %151 = vector.load %arg7[%c10, %c0_83] : memref<16x256xf32, #tpu.memory_space<vmem>>, vector<1x256xf32>
    tpu.vector_store %arg7[%c10, %c0_83], %150 {strides = array<i32>} : memref<16x256xf32, #tpu.memory_space<vmem>>, vector<1x256xf32>,
    %c0_84 = arith.constant 0 : index
    %c3 = arith.constant 3 : index
    %c0_85 = arith.constant 0 : index
    %152 = vector.load %arg3[%c0_84, %c3, %c0_85] : memref<1x16x256xf32, #tpu.memory_space<vmem>>, vector<1x1x256xf32>
    %153 = vector.shape_cast %152 : vector<1x1x256xf32> to vector<1x256xf32>
    %c0_86 = arith.constant 0 : index
    %c3_87 = arith.constant 3 : index
    %c0_88 = arith.constant 0 : index
    %154 = vector.load %arg4[%c0_86, %c3_87, %c0_88] : memref<1x16x256xf32, #tpu.memory_space<vmem>>, vector<1x1x256xf32>
    %155 = vector.shape_cast %154 : vector<1x1x256xf32> to vector<1x256xf32>
    %cst_89 = arith.constant 1.000000e+00 : f32
    %156 = vector.broadcast %cst_89 : f32 to vector<1x256xf32>
    %157 = arith.addf %153, %156 : vector<1x256xf32>
    %cst_90 = arith.constant 1.600000e+01 : f32
    %158 = vector.broadcast %cst_90 : f32 to vector<1x256xf32>
    %159 = arith.mulf %157, %158 : vector<1x256xf32>
    %cst_91 = arith.constant 1.000000e+00 : f32
    %160 = vector.broadcast %cst_91 : f32 to vector<1x256xf32>
    %161 = arith.subf %159, %160 : vector<1x256xf32>
    %cst_92 = arith.constant 5.000000e-01 : f32
    %162 = vector.broadcast %cst_92 : f32 to vector<1x256xf32>
    %163 = arith.mulf %161, %162 : vector<1x256xf32>
    %cst_93 = arith.constant 0.000000e+00 : f32
    %cst_94 = arith.constant 1.500000e+01 : f32
    %164 = vector.broadcast %cst_93 : f32 to vector<1x256xf32>
    %165 = arith.maximumf %164, %163 : vector<1x256xf32>
    %166 = vector.broadcast %cst_94 : f32 to vector<1x256xf32>
    %167 = arith.minimumf %166, %165 : vector<1x256xf32>
    %cst_95 = arith.constant 1.000000e+00 : f32
    %168 = vector.broadcast %cst_95 : f32 to vector<1x256xf32>
    %169 = arith.addf %155, %168 : vector<1x256xf32>
    %cst_96 = arith.constant 1.600000e+01 : f32
    %170 = vector.broadcast %cst_96 : f32 to vector<1x256xf32>
    %171 = arith.mulf %169, %170 : vector<1x256xf32>
    %cst_97 = arith.constant 1.000000e+00 : f32
    %172 = vector.broadcast %cst_97 : f32 to vector<1x256xf32>
    %173 = arith.subf %171, %172 : vector<1x256xf32>
    %cst_98 = arith.constant 5.000000e-01 : f32
    %174 = vector.broadcast %cst_98 : f32 to vector<1x256xf32>
    %175 = arith.mulf %173, %174 : vector<1x256xf32>
    %cst_99 = arith.constant 0.000000e+00 : f32
    %cst_100 = arith.constant 1.500000e+01 : f32
    %176 = vector.broadcast %cst_99 : f32 to vector<1x256xf32>
    %177 = arith.maximumf %176, %175 : vector<1x256xf32>
    %178 = vector.broadcast %cst_100 : f32 to vector<1x256xf32>
    %179 = arith.minimumf %178, %177 : vector<1x256xf32>
    %180 = vector.broadcast %167 : vector<1x256xf32> to vector<16x256xf32>
    %181 = arith.subf %3, %180 : vector<16x256xf32>
    %182 = math.absf %181 : vector<16x256xf32>
    %cst_101 = arith.constant 1.000000e+00 : f32
    %183 = vector.broadcast %cst_101 : f32 to vector<16x256xf32>
    %184 = arith.subf %183, %182 : vector<16x256xf32>
    %cst_102 = arith.constant 0.000000e+00 : f32
    %185 = vector.broadcast %cst_102 : f32 to vector<16x256xf32>
    %186 = arith.maximumf %184, %185 : vector<16x256xf32>
    %187 = vector.broadcast %179 : vector<1x256xf32> to vector<16x256xf32>
    %188 = arith.subf %3, %187 : vector<16x256xf32>
    %189 = math.absf %188 : vector<16x256xf32>
    %cst_103 = arith.constant 1.000000e+00 : f32
    %190 = vector.broadcast %cst_103 : f32 to vector<16x256xf32>
    %191 = arith.subf %190, %189 : vector<16x256xf32>
    %cst_104 = arith.constant 0.000000e+00 : f32
    %192 = vector.broadcast %cst_104 : f32 to vector<16x256xf32>
    %193 = arith.maximumf %191, %192 : vector<16x256xf32>
    %cst_105 = arith.constant dense<0.000000e+00> : vector<16x256xf32>
    %194 = tpu.matmul %1, %186, %cst_105 {dimension_numbers = #tpu.dot_dimension_numbers<[1], [0], [0], [1], [0, 0, 1, 1], [], []>} : vector<16x16xf32>, vector<16x256xf32>, vector<16x256xf32> -> vector<16x256xf32>
    %195 = arith.mulf %194, %193 : vector<16x256xf32>
    %cst_106 = arith.constant dense<0.000000e+00> : vector<256xf32>
    %196 = vector.multi_reduction <add>, %195, %cst_106 [0] : vector<16x256xf32> to vector<256xf32>
    %197 = vector.shape_cast %196 : vector<256xf32> to vector<1x256xf32>
    %c11 = arith.constant 11 : index
    %c0_107 = arith.constant 0 : index
    %198 = vector.load %arg7[%c11, %c0_107] : memref<16x256xf32, #tpu.memory_space<vmem>>, vector<1x256xf32>
    tpu.vector_store %arg7[%c11, %c0_107], %197 {strides = array<i32>} : memref<16x256xf32, #tpu.memory_space<vmem>>, vector<1x256xf32>,
    %c0_108 = arith.constant 0 : index
    %c4 = arith.constant 4 : index
    %c0_109 = arith.constant 0 : index
    %199 = vector.load %arg3[%c0_108, %c4, %c0_109] : memref<1x16x256xf32, #tpu.memory_space<vmem>>, vector<1x1x256xf32>
    %200 = vector.shape_cast %199 : vector<1x1x256xf32> to vector<1x256xf32>
    %c0_110 = arith.constant 0 : index
    %c4_111 = arith.constant 4 : index
    %c0_112 = arith.constant 0 : index
    %201 = vector.load %arg4[%c0_110, %c4_111, %c0_112] : memref<1x16x256xf32, #tpu.memory_space<vmem>>, vector<1x1x256xf32>
    %202 = vector.shape_cast %201 : vector<1x1x256xf32> to vector<1x256xf32>
    %cst_113 = arith.constant 1.000000e+00 : f32
    %203 = vector.broadcast %cst_113 : f32 to vector<1x256xf32>
    %204 = arith.addf %200, %203 : vector<1x256xf32>
    %cst_114 = arith.constant 1.600000e+01 : f32
    %205 = vector.broadcast %cst_114 : f32 to vector<1x256xf32>
    %206 = arith.mulf %204, %205 : vector<1x256xf32>
    %cst_115 = arith.constant 1.000000e+00 : f32
    %207 = vector.broadcast %cst_115 : f32 to vector<1x256xf32>
    %208 = arith.subf %206, %207 : vector<1x256xf32>
    %cst_116 = arith.constant 5.000000e-01 : f32
    %209 = vector.broadcast %cst_116 : f32 to vector<1x256xf32>
    %210 = arith.mulf %208, %209 : vector<1x256xf32>
    %cst_117 = arith.constant 0.000000e+00 : f32
    %cst_118 = arith.constant 1.500000e+01 : f32
    %211 = vector.broadcast %cst_117 : f32 to vector<1x256xf32>
    %212 = arith.maximumf %211, %210 : vector<1x256xf32>
    %213 = vector.broadcast %cst_118 : f32 to vector<1x256xf32>
    %214 = arith.minimumf %213, %212 : vector<1x256xf32>
    %cst_119 = arith.constant 1.000000e+00 : f32
    %215 = vector.broadcast %cst_119 : f32 to vector<1x256xf32>
    %216 = arith.addf %202, %215 : vector<1x256xf32>
    %cst_120 = arith.constant 1.600000e+01 : f32
    %217 = vector.broadcast %cst_120 : f32 to vector<1x256xf32>
    %218 = arith.mulf %216, %217 : vector<1x256xf32>
    %cst_121 = arith.constant 1.000000e+00 : f32
    %219 = vector.broadcast %cst_121 : f32 to vector<1x256xf32>
    %220 = arith.subf %218, %219 : vector<1x256xf32>
    %cst_122 = arith.constant 5.000000e-01 : f32
    %221 = vector.broadcast %cst_122 : f32 to vector<1x256xf32>
    %222 = arith.mulf %220, %221 : vector<1x256xf32>
    %cst_123 = arith.constant 0.000000e+00 : f32
    %cst_124 = arith.constant 1.500000e+01 : f32
    %223 = vector.broadcast %cst_123 : f32 to vector<1x256xf32>
    %224 = arith.maximumf %223, %222 : vector<1x256xf32>
    %225 = vector.broadcast %cst_124 : f32 to vector<1x256xf32>
    %226 = arith.minimumf %225, %224 : vector<1x256xf32>
    %227 = vector.broadcast %214 : vector<1x256xf32> to vector<16x256xf32>
    %228 = arith.subf %3, %227 : vector<16x256xf32>
    %229 = math.absf %228 : vector<16x256xf32>
    %cst_125 = arith.constant 1.000000e+00 : f32
    %230 = vector.broadcast %cst_125 : f32 to vector<16x256xf32>
    %231 = arith.subf %230, %229 : vector<16x256xf32>
    %cst_126 = arith.constant 0.000000e+00 : f32
    %232 = vector.broadcast %cst_126 : f32 to vector<16x256xf32>
    %233 = arith.maximumf %231, %232 : vector<16x256xf32>
    %234 = vector.broadcast %226 : vector<1x256xf32> to vector<16x256xf32>
    %235 = arith.subf %3, %234 : vector<16x256xf32>
    %236 = math.absf %235 : vector<16x256xf32>
    %cst_127 = arith.constant 1.000000e+00 : f32
    %237 = vector.broadcast %cst_127 : f32 to vector<16x256xf32>
    %238 = arith.subf %237, %236 : vector<16x256xf32>
    %cst_128 = arith.constant 0.000000e+00 : f32
    %239 = vector.broadcast %cst_128 : f32 to vector<16x256xf32>
    %240 = arith.maximumf %238, %239 : vector<16x256xf32>
    %cst_129 = arith.constant dense<0.000000e+00> : vector<16x256xf32>
    %241 = tpu.matmul %1, %233, %cst_129 {dimension_numbers = #tpu.dot_dimension_numbers<[1], [0], [0], [1], [0, 0, 1, 1], [], []>} : vector<16x16xf32>, vector<16x256xf32>, vector<16x256xf32> -> vector<16x256xf32>
    %242 = arith.mulf %241, %240 : vector<16x256xf32>
    %cst_130 = arith.constant dense<0.000000e+00> : vector<256xf32>
    %243 = vector.multi_reduction <add>, %242, %cst_130 [0] : vector<16x256xf32> to vector<256xf32>
    %244 = vector.shape_cast %243 : vector<256xf32> to vector<1x256xf32>
    %c0_131 = arith.constant 0 : index
    %c0_132 = arith.constant 0 : index
    %245 = vector.load %arg8[%c0_131, %c0_132] : memref<16x256xf32, #tpu.memory_space<vmem>>, vector<1x256xf32>
    tpu.vector_store %arg8[%c0_131, %c0_132], %244 {strides = array<i32>} : memref<16x256xf32, #tpu.memory_space<vmem>>, vector<1x256xf32>,
    %c0_133 = arith.constant 0 : index
    %c5 = arith.constant 5 : index
    %c0_134 = arith.constant 0 : index
    %246 = vector.load %arg3[%c0_133, %c5, %c0_134] : memref<1x16x256xf32, #tpu.memory_space<vmem>>, vector<1x1x256xf32>
    %247 = vector.shape_cast %246 : vector<1x1x256xf32> to vector<1x256xf32>
    %c0_135 = arith.constant 0 : index
    %c5_136 = arith.constant 5 : index
    %c0_137 = arith.constant 0 : index
    %248 = vector.load %arg4[%c0_135, %c5_136, %c0_137] : memref<1x16x256xf32, #tpu.memory_space<vmem>>, vector<1x1x256xf32>
    %249 = vector.shape_cast %248 : vector<1x1x256xf32> to vector<1x256xf32>
    %cst_138 = arith.constant 1.000000e+00 : f32
    %250 = vector.broadcast %cst_138 : f32 to vector<1x256xf32>
    %251 = arith.addf %247, %250 : vector<1x256xf32>
    %cst_139 = arith.constant 1.600000e+01 : f32
    %252 = vector.broadcast %cst_139 : f32 to vector<1x256xf32>
    %253 = arith.mulf %251, %252 : vector<1x256xf32>
    %cst_140 = arith.constant 1.000000e+00 : f32
    %254 = vector.broadcast %cst_140 : f32 to vector<1x256xf32>
    %255 = arith.subf %253, %254 : vector<1x256xf32>
    %cst_141 = arith.constant 5.000000e-01 : f32
    %256 = vector.broadcast %cst_141 : f32 to vector<1x256xf32>
    %257 = arith.mulf %255, %256 : vector<1x256xf32>
    %cst_142 = arith.constant 0.000000e+00 : f32
    %cst_143 = arith.constant 1.500000e+01 : f32
    %258 = vector.broadcast %cst_142 : f32 to vector<1x256xf32>
    %259 = arith.maximumf %258, %257 : vector<1x256xf32>
    %260 = vector.broadcast %cst_143 : f32 to vector<1x256xf32>
    %261 = arith.minimumf %260, %259 : vector<1x256xf32>
    %cst_144 = arith.constant 1.000000e+00 : f32
    %262 = vector.broadcast %cst_144 : f32 to vector<1x256xf32>
    %263 = arith.addf %249, %262 : vector<1x256xf32>
    %cst_145 = arith.constant 1.600000e+01 : f32
    %264 = vector.broadcast %cst_145 : f32 to vector<1x256xf32>
    %265 = arith.mulf %263, %264 : vector<1x256xf32>
    %cst_146 = arith.constant 1.000000e+00 : f32
    %266 = vector.broadcast %cst_146 : f32 to vector<1x256xf32>
    %267 = arith.subf %265, %266 : vector<1x256xf32>
    %cst_147 = arith.constant 5.000000e-01 : f32
    %268 = vector.broadcast %cst_147 : f32 to vector<1x256xf32>
    %269 = arith.mulf %267, %268 : vector<1x256xf32>
    %cst_148 = arith.constant 0.000000e+00 : f32
    %cst_149 = arith.constant 1.500000e+01 : f32
    %270 = vector.broadcast %cst_148 : f32 to vector<1x256xf32>
    %271 = arith.maximumf %270, %269 : vector<1x256xf32>
    %272 = vector.broadcast %cst_149 : f32 to vector<1x256xf32>
    %273 = arith.minimumf %272, %271 : vector<1x256xf32>
    %274 = vector.broadcast %261 : vector<1x256xf32> to vector<16x256xf32>
    %275 = arith.subf %3, %274 : vector<16x256xf32>
    %276 = math.absf %275 : vector<16x256xf32>
    %cst_150 = arith.constant 1.000000e+00 : f32
    %277 = vector.broadcast %cst_150 : f32 to vector<16x256xf32>
    %278 = arith.subf %277, %276 : vector<16x256xf32>
    %cst_151 = arith.constant 0.000000e+00 : f32
    %279 = vector.broadcast %cst_151 : f32 to vector<16x256xf32>
    %280 = arith.maximumf %278, %279 : vector<16x256xf32>
    %281 = vector.broadcast %273 : vector<1x256xf32> to vector<16x256xf32>
    %282 = arith.subf %3, %281 : vector<16x256xf32>
    %283 = math.absf %282 : vector<16x256xf32>
    %cst_152 = arith.constant 1.000000e+00 : f32
    %284 = vector.broadcast %cst_152 : f32 to vector<16x256xf32>
    %285 = arith.subf %284, %283 : vector<16x256xf32>
    %cst_153 = arith.constant 0.000000e+00 : f32
    %286 = vector.broadcast %cst_153 : f32 to vector<16x256xf32>
    %287 = arith.maximumf %285, %286 : vector<16x256xf32>
    %cst_154 = arith.constant dense<0.000000e+00> : vector<16x256xf32>
    %288 = tpu.matmul %1, %280, %cst_154 {dimension_numbers = #tpu.dot_dimension_numbers<[1], [0], [0], [1], [0, 0, 1, 1], [], []>} : vector<16x16xf32>, vector<16x256xf32>, vector<16x256xf32> -> vector<16x256xf32>
    %289 = arith.mulf %288, %287 : vector<16x256xf32>
    %cst_155 = arith.constant dense<0.000000e+00> : vector<256xf32>
    %290 = vector.multi_reduction <add>, %289, %cst_155 [0] : vector<16x256xf32> to vector<256xf32>
    %291 = vector.shape_cast %290 : vector<256xf32> to vector<1x256xf32>
    %c1_156 = arith.constant 1 : index
    %c0_157 = arith.constant 0 : index
    %292 = vector.load %arg8[%c1_156, %c0_157] : memref<16x256xf32, #tpu.memory_space<vmem>>, vector<1x256xf32>
    tpu.vector_store %arg8[%c1_156, %c0_157], %291 {strides = array<i32>} : memref<16x256xf32, #tpu.memory_space<vmem>>, vector<1x256xf32>,
    %c0_158 = arith.constant 0 : index
    %c6 = arith.constant 6 : index
    %c0_159 = arith.constant 0 : index
    %293 = vector.load %arg3[%c0_158, %c6, %c0_159] : memref<1x16x256xf32, #tpu.memory_space<vmem>>, vector<1x1x256xf32>
    %294 = vector.shape_cast %293 : vector<1x1x256xf32> to vector<1x256xf32>
    %c0_160 = arith.constant 0 : index
    %c6_161 = arith.constant 6 : index
    %c0_162 = arith.constant 0 : index
    %295 = vector.load %arg4[%c0_160, %c6_161, %c0_162] : memref<1x16x256xf32, #tpu.memory_space<vmem>>, vector<1x1x256xf32>
    %296 = vector.shape_cast %295 : vector<1x1x256xf32> to vector<1x256xf32>
    %cst_163 = arith.constant 1.000000e+00 : f32
    %297 = vector.broadcast %cst_163 : f32 to vector<1x256xf32>
    %298 = arith.addf %294, %297 : vector<1x256xf32>
    %cst_164 = arith.constant 1.600000e+01 : f32
    %299 = vector.broadcast %cst_164 : f32 to vector<1x256xf32>
    %300 = arith.mulf %298, %299 : vector<1x256xf32>
    %cst_165 = arith.constant 1.000000e+00 : f32
    %301 = vector.broadcast %cst_165 : f32 to vector<1x256xf32>
    %302 = arith.subf %300, %301 : vector<1x256xf32>
    %cst_166 = arith.constant 5.000000e-01 : f32
    %303 = vector.broadcast %cst_166 : f32 to vector<1x256xf32>
    %304 = arith.mulf %302, %303 : vector<1x256xf32>
    %cst_167 = arith.constant 0.000000e+00 : f32
    %cst_168 = arith.constant 1.500000e+01 : f32
    %305 = vector.broadcast %cst_167 : f32 to vector<1x256xf32>
    %306 = arith.maximumf %305, %304 : vector<1x256xf32>
    %307 = vector.broadcast %cst_168 : f32 to vector<1x256xf32>
    %308 = arith.minimumf %307, %306 : vector<1x256xf32>
    %cst_169 = arith.constant 1.000000e+00 : f32
    %309 = vector.broadcast %cst_169 : f32 to vector<1x256xf32>
    %310 = arith.addf %296, %309 : vector<1x256xf32>
    %cst_170 = arith.constant 1.600000e+01 : f32
    %311 = vector.broadcast %cst_170 : f32 to vector<1x256xf32>
    %312 = arith.mulf %310, %311 : vector<1x256xf32>
    %cst_171 = arith.constant 1.000000e+00 : f32
    %313 = vector.broadcast %cst_171 : f32 to vector<1x256xf32>
    %314 = arith.subf %312, %313 : vector<1x256xf32>
    %cst_172 = arith.constant 5.000000e-01 : f32
    %315 = vector.broadcast %cst_172 : f32 to vector<1x256xf32>
    %316 = arith.mulf %314, %315 : vector<1x256xf32>
    %cst_173 = arith.constant 0.000000e+00 : f32
    %cst_174 = arith.constant 1.500000e+01 : f32
    %317 = vector.broadcast %cst_173 : f32 to vector<1x256xf32>
    %318 = arith.maximumf %317, %316 : vector<1x256xf32>
    %319 = vector.broadcast %cst_174 : f32 to vector<1x256xf32>
    %320 = arith.minimumf %319, %318 : vector<1x256xf32>
    %321 = vector.broadcast %308 : vector<1x256xf32> to vector<16x256xf32>
    %322 = arith.subf %3, %321 : vector<16x256xf32>
    %323 = math.absf %322 : vector<16x256xf32>
    %cst_175 = arith.constant 1.000000e+00 : f32
    %324 = vector.broadcast %cst_175 : f32 to vector<16x256xf32>
    %325 = arith.subf %324, %323 : vector<16x256xf32>
    %cst_176 = arith.constant 0.000000e+00 : f32
    %326 = vector.broadcast %cst_176 : f32 to vector<16x256xf32>
    %327 = arith.maximumf %325, %326 : vector<16x256xf32>
    %328 = vector.broadcast %320 : vector<1x256xf32> to vector<16x256xf32>
    %329 = arith.subf %3, %328 : vector<16x256xf32>
    %330 = math.absf %329 : vector<16x256xf32>
    %cst_177 = arith.constant 1.000000e+00 : f32
    %331 = vector.broadcast %cst_177 : f32 to vector<16x256xf32>
    %332 = arith.subf %331, %330 : vector<16x256xf32>
    %cst_178 = arith.constant 0.000000e+00 : f32
    %333 = vector.broadcast %cst_178 : f32 to vector<16x256xf32>
    %334 = arith.maximumf %332, %333 : vector<16x256xf32>
    %cst_179 = arith.constant dense<0.000000e+00> : vector<16x256xf32>
    %335 = tpu.matmul %1, %327, %cst_179 {dimension_numbers = #tpu.dot_dimension_numbers<[1], [0], [0], [1], [0, 0, 1, 1], [], []>} : vector<16x16xf32>, vector<16x256xf32>, vector<16x256xf32> -> vector<16x256xf32>
    %336 = arith.mulf %335, %334 : vector<16x256xf32>
    %cst_180 = arith.constant dense<0.000000e+00> : vector<256xf32>
    %337 = vector.multi_reduction <add>, %336, %cst_180 [0] : vector<16x256xf32> to vector<256xf32>
    %338 = vector.shape_cast %337 : vector<256xf32> to vector<1x256xf32>
    %c2_181 = arith.constant 2 : index
    %c0_182 = arith.constant 0 : index
    %339 = vector.load %arg8[%c2_181, %c0_182] : memref<16x256xf32, #tpu.memory_space<vmem>>, vector<1x256xf32>
    tpu.vector_store %arg8[%c2_181, %c0_182], %338 {strides = array<i32>} : memref<16x256xf32, #tpu.memory_space<vmem>>, vector<1x256xf32>,
    %c0_183 = arith.constant 0 : index
    %c7 = arith.constant 7 : index
    %c0_184 = arith.constant 0 : index
    %340 = vector.load %arg3[%c0_183, %c7, %c0_184] : memref<1x16x256xf32, #tpu.memory_space<vmem>>, vector<1x1x256xf32>
    %341 = vector.shape_cast %340 : vector<1x1x256xf32> to vector<1x256xf32>
    %c0_185 = arith.constant 0 : index
    %c7_186 = arith.constant 7 : index
    %c0_187 = arith.constant 0 : index
    %342 = vector.load %arg4[%c0_185, %c7_186, %c0_187] : memref<1x16x256xf32, #tpu.memory_space<vmem>>, vector<1x1x256xf32>
    %343 = vector.shape_cast %342 : vector<1x1x256xf32> to vector<1x256xf32>
    %cst_188 = arith.constant 1.000000e+00 : f32
    %344 = vector.broadcast %cst_188 : f32 to vector<1x256xf32>
    %345 = arith.addf %341, %344 : vector<1x256xf32>
    %cst_189 = arith.constant 1.600000e+01 : f32
    %346 = vector.broadcast %cst_189 : f32 to vector<1x256xf32>
    %347 = arith.mulf %345, %346 : vector<1x256xf32>
    %cst_190 = arith.constant 1.000000e+00 : f32
    %348 = vector.broadcast %cst_190 : f32 to vector<1x256xf32>
    %349 = arith.subf %347, %348 : vector<1x256xf32>
    %cst_191 = arith.constant 5.000000e-01 : f32
    %350 = vector.broadcast %cst_191 : f32 to vector<1x256xf32>
    %351 = arith.mulf %349, %350 : vector<1x256xf32>
    %cst_192 = arith.constant 0.000000e+00 : f32
    %cst_193 = arith.constant 1.500000e+01 : f32
    %352 = vector.broadcast %cst_192 : f32 to vector<1x256xf32>
    %353 = arith.maximumf %352, %351 : vector<1x256xf32>
    %354 = vector.broadcast %cst_193 : f32 to vector<1x256xf32>
    %355 = arith.minimumf %354, %353 : vector<1x256xf32>
    %cst_194 = arith.constant 1.000000e+00 : f32
    %356 = vector.broadcast %cst_194 : f32 to vector<1x256xf32>
    %357 = arith.addf %343, %356 : vector<1x256xf32>
    %cst_195 = arith.constant 1.600000e+01 : f32
    %358 = vector.broadcast %cst_195 : f32 to vector<1x256xf32>
    %359 = arith.mulf %357, %358 : vector<1x256xf32>
    %cst_196 = arith.constant 1.000000e+00 : f32
    %360 = vector.broadcast %cst_196 : f32 to vector<1x256xf32>
    %361 = arith.subf %359, %360 : vector<1x256xf32>
    %cst_197 = arith.constant 5.000000e-01 : f32
    %362 = vector.broadcast %cst_197 : f32 to vector<1x256xf32>
    %363 = arith.mulf %361, %362 : vector<1x256xf32>
    %cst_198 = arith.constant 0.000000e+00 : f32
    %cst_199 = arith.constant 1.500000e+01 : f32
    %364 = vector.broadcast %cst_198 : f32 to vector<1x256xf32>
    %365 = arith.maximumf %364, %363 : vector<1x256xf32>
    %366 = vector.broadcast %cst_199 : f32 to vector<1x256xf32>
    %367 = arith.minimumf %366, %365 : vector<1x256xf32>
    %368 = vector.broadcast %355 : vector<1x256xf32> to vector<16x256xf32>
    %369 = arith.subf %3, %368 : vector<16x256xf32>
    %370 = math.absf %369 : vector<16x256xf32>
    %cst_200 = arith.constant 1.000000e+00 : f32
    %371 = vector.broadcast %cst_200 : f32 to vector<16x256xf32>
    %372 = arith.subf %371, %370 : vector<16x256xf32>
    %cst_201 = arith.constant 0.000000e+00 : f32
    %373 = vector.broadcast %cst_201 : f32 to vector<16x256xf32>
    %374 = arith.maximumf %372, %373 : vector<16x256xf32>
    %375 = vector.broadcast %367 : vector<1x256xf32> to vector<16x256xf32>
    %376 = arith.subf %3, %375 : vector<16x256xf32>
    %377 = math.absf %376 : vector<16x256xf32>
    %cst_202 = arith.constant 1.000000e+00 : f32
    %378 = vector.broadcast %cst_202 : f32 to vector<16x256xf32>
    %379 = arith.subf %378, %377 : vector<16x256xf32>
    %cst_203 = arith.constant 0.000000e+00 : f32
    %380 = vector.broadcast %cst_203 : f32 to vector<16x256xf32>
    %381 = arith.maximumf %379, %380 : vector<16x256xf32>
    %cst_204 = arith.constant dense<0.000000e+00> : vector<16x256xf32>
    %382 = tpu.matmul %1, %374, %cst_204 {dimension_numbers = #tpu.dot_dimension_numbers<[1], [0], [0], [1], [0, 0, 1, 1], [], []>} : vector<16x16xf32>, vector<16x256xf32>, vector<16x256xf32> -> vector<16x256xf32>
    %383 = arith.mulf %382, %381 : vector<16x256xf32>
    %cst_205 = arith.constant dense<0.000000e+00> : vector<256xf32>
    %384 = vector.multi_reduction <add>, %383, %cst_205 [0] : vector<16x256xf32> to vector<256xf32>
    %385 = vector.shape_cast %384 : vector<256xf32> to vector<1x256xf32>
    %c3_206 = arith.constant 3 : index
    %c0_207 = arith.constant 0 : index
    %386 = vector.load %arg8[%c3_206, %c0_207] : memref<16x256xf32, #tpu.memory_space<vmem>>, vector<1x256xf32>
    tpu.vector_store %arg8[%c3_206, %c0_207], %385 {strides = array<i32>} : memref<16x256xf32, #tpu.memory_space<vmem>>, vector<1x256xf32>,
    %c0_208 = arith.constant 0 : index
    %c8_209 = arith.constant 8 : index
    %c0_210 = arith.constant 0 : index
    %387 = vector.load %arg3[%c0_208, %c8_209, %c0_210] : memref<1x16x256xf32, #tpu.memory_space<vmem>>, vector<1x1x256xf32>
    %388 = vector.shape_cast %387 : vector<1x1x256xf32> to vector<1x256xf32>
    %c0_211 = arith.constant 0 : index
    %c8_212 = arith.constant 8 : index
    %c0_213 = arith.constant 0 : index
    %389 = vector.load %arg4[%c0_211, %c8_212, %c0_213] : memref<1x16x256xf32, #tpu.memory_space<vmem>>, vector<1x1x256xf32>
    %390 = vector.shape_cast %389 : vector<1x1x256xf32> to vector<1x256xf32>
    %cst_214 = arith.constant 1.000000e+00 : f32
    %391 = vector.broadcast %cst_214 : f32 to vector<1x256xf32>
    %392 = arith.addf %388, %391 : vector<1x256xf32>
    %cst_215 = arith.constant 1.600000e+01 : f32
    %393 = vector.broadcast %cst_215 : f32 to vector<1x256xf32>
    %394 = arith.mulf %392, %393 : vector<1x256xf32>
    %cst_216 = arith.constant 1.000000e+00 : f32
    %395 = vector.broadcast %cst_216 : f32 to vector<1x256xf32>
    %396 = arith.subf %394, %395 : vector<1x256xf32>
    %cst_217 = arith.constant 5.000000e-01 : f32
    %397 = vector.broadcast %cst_217 : f32 to vector<1x256xf32>
    %398 = arith.mulf %396, %397 : vector<1x256xf32>
    %cst_218 = arith.constant 0.000000e+00 : f32
    %cst_219 = arith.constant 1.500000e+01 : f32
    %399 = vector.broadcast %cst_218 : f32 to vector<1x256xf32>
    %400 = arith.maximumf %399, %398 : vector<1x256xf32>
    %401 = vector.broadcast %cst_219 : f32 to vector<1x256xf32>
    %402 = arith.minimumf %401, %400 : vector<1x256xf32>
    %cst_220 = arith.constant 1.000000e+00 : f32
    %403 = vector.broadcast %cst_220 : f32 to vector<1x256xf32>
    %404 = arith.addf %390, %403 : vector<1x256xf32>
    %cst_221 = arith.constant 1.600000e+01 : f32
    %405 = vector.broadcast %cst_221 : f32 to vector<1x256xf32>
    %406 = arith.mulf %404, %405 : vector<1x256xf32>
    %cst_222 = arith.constant 1.000000e+00 : f32
    %407 = vector.broadcast %cst_222 : f32 to vector<1x256xf32>
    %408 = arith.subf %406, %407 : vector<1x256xf32>
    %cst_223 = arith.constant 5.000000e-01 : f32
    %409 = vector.broadcast %cst_223 : f32 to vector<1x256xf32>
    %410 = arith.mulf %408, %409 : vector<1x256xf32>
    %cst_224 = arith.constant 0.000000e+00 : f32
    %cst_225 = arith.constant 1.500000e+01 : f32
    %411 = vector.broadcast %cst_224 : f32 to vector<1x256xf32>
    %412 = arith.maximumf %411, %410 : vector<1x256xf32>
    %413 = vector.broadcast %cst_225 : f32 to vector<1x256xf32>
    %414 = arith.minimumf %413, %412 : vector<1x256xf32>
    %415 = vector.broadcast %402 : vector<1x256xf32> to vector<16x256xf32>
    %416 = arith.subf %3, %415 : vector<16x256xf32>
    %417 = math.absf %416 : vector<16x256xf32>
    %cst_226 = arith.constant 1.000000e+00 : f32
    %418 = vector.broadcast %cst_226 : f32 to vector<16x256xf32>
    %419 = arith.subf %418, %417 : vector<16x256xf32>
    %cst_227 = arith.constant 0.000000e+00 : f32
    %420 = vector.broadcast %cst_227 : f32 to vector<16x256xf32>
    %421 = arith.maximumf %419, %420 : vector<16x256xf32>
    %422 = vector.broadcast %414 : vector<1x256xf32> to vector<16x256xf32>
    %423 = arith.subf %3, %422 : vector<16x256xf32>
    %424 = math.absf %423 : vector<16x256xf32>
    %cst_228 = arith.constant 1.000000e+00 : f32
    %425 = vector.broadcast %cst_228 : f32 to vector<16x256xf32>
    %426 = arith.subf %425, %424 : vector<16x256xf32>
    %cst_229 = arith.constant 0.000000e+00 : f32
    %427 = vector.broadcast %cst_229 : f32 to vector<16x256xf32>
    %428 = arith.maximumf %426, %427 : vector<16x256xf32>
    %cst_230 = arith.constant dense<0.000000e+00> : vector<16x256xf32>
    %429 = tpu.matmul %1, %421, %cst_230 {dimension_numbers = #tpu.dot_dimension_numbers<[1], [0], [0], [1], [0, 0, 1, 1], [], []>} : vector<16x16xf32>, vector<16x256xf32>, vector<16x256xf32> -> vector<16x256xf32>
    %430 = arith.mulf %429, %428 : vector<16x256xf32>
    %cst_231 = arith.constant dense<0.000000e+00> : vector<256xf32>
    %431 = vector.multi_reduction <add>, %430, %cst_231 [0] : vector<16x256xf32> to vector<256xf32>
    %432 = vector.shape_cast %431 : vector<256xf32> to vector<1x256xf32>
    %c4_232 = arith.constant 4 : index
    %c0_233 = arith.constant 0 : index
    %433 = vector.load %arg8[%c4_232, %c0_233] : memref<16x256xf32, #tpu.memory_space<vmem>>, vector<1x256xf32>
    tpu.vector_store %arg8[%c4_232, %c0_233], %432 {strides = array<i32>} : memref<16x256xf32, #tpu.memory_space<vmem>>, vector<1x256xf32>,
    %c0_234 = arith.constant 0 : index
    %c9_235 = arith.constant 9 : index
    %c0_236 = arith.constant 0 : index
    %434 = vector.load %arg3[%c0_234, %c9_235, %c0_236] : memref<1x16x256xf32, #tpu.memory_space<vmem>>, vector<1x1x256xf32>
    %435 = vector.shape_cast %434 : vector<1x1x256xf32> to vector<1x256xf32>
    %c0_237 = arith.constant 0 : index
    %c9_238 = arith.constant 9 : index
    %c0_239 = arith.constant 0 : index
    %436 = vector.load %arg4[%c0_237, %c9_238, %c0_239] : memref<1x16x256xf32, #tpu.memory_space<vmem>>, vector<1x1x256xf32>
    %437 = vector.shape_cast %436 : vector<1x1x256xf32> to vector<1x256xf32>
    %cst_240 = arith.constant 1.000000e+00 : f32
    %438 = vector.broadcast %cst_240 : f32 to vector<1x256xf32>
    %439 = arith.addf %435, %438 : vector<1x256xf32>
    %cst_241 = arith.constant 1.600000e+01 : f32
    %440 = vector.broadcast %cst_241 : f32 to vector<1x256xf32>
    %441 = arith.mulf %439, %440 : vector<1x256xf32>
    %cst_242 = arith.constant 1.000000e+00 : f32
    %442 = vector.broadcast %cst_242 : f32 to vector<1x256xf32>
    %443 = arith.subf %441, %442 : vector<1x256xf32>
    %cst_243 = arith.constant 5.000000e-01 : f32
    %444 = vector.broadcast %cst_243 : f32 to vector<1x256xf32>
    %445 = arith.mulf %443, %444 : vector<1x256xf32>
    %cst_244 = arith.constant 0.000000e+00 : f32
    %cst_245 = arith.constant 1.500000e+01 : f32
    %446 = vector.broadcast %cst_244 : f32 to vector<1x256xf32>
    %447 = arith.maximumf %446, %445 : vector<1x256xf32>
    %448 = vector.broadcast %cst_245 : f32 to vector<1x256xf32>
    %449 = arith.minimumf %448, %447 : vector<1x256xf32>
    %cst_246 = arith.constant 1.000000e+00 : f32
    %450 = vector.broadcast %cst_246 : f32 to vector<1x256xf32>
    %451 = arith.addf %437, %450 : vector<1x256xf32>
    %cst_247 = arith.constant 1.600000e+01 : f32
    %452 = vector.broadcast %cst_247 : f32 to vector<1x256xf32>
    %453 = arith.mulf %451, %452 : vector<1x256xf32>
    %cst_248 = arith.constant 1.000000e+00 : f32
    %454 = vector.broadcast %cst_248 : f32 to vector<1x256xf32>
    %455 = arith.subf %453, %454 : vector<1x256xf32>
    %cst_249 = arith.constant 5.000000e-01 : f32
    %456 = vector.broadcast %cst_249 : f32 to vector<1x256xf32>
    %457 = arith.mulf %455, %456 : vector<1x256xf32>
    %cst_250 = arith.constant 0.000000e+00 : f32
    %cst_251 = arith.constant 1.500000e+01 : f32
    %458 = vector.broadcast %cst_250 : f32 to vector<1x256xf32>
    %459 = arith.maximumf %458, %457 : vector<1x256xf32>
    %460 = vector.broadcast %cst_251 : f32 to vector<1x256xf32>
    %461 = arith.minimumf %460, %459 : vector<1x256xf32>
    %462 = vector.broadcast %449 : vector<1x256xf32> to vector<16x256xf32>
    %463 = arith.subf %3, %462 : vector<16x256xf32>
    %464 = math.absf %463 : vector<16x256xf32>
    %cst_252 = arith.constant 1.000000e+00 : f32
    %465 = vector.broadcast %cst_252 : f32 to vector<16x256xf32>
    %466 = arith.subf %465, %464 : vector<16x256xf32>
    %cst_253 = arith.constant 0.000000e+00 : f32
    %467 = vector.broadcast %cst_253 : f32 to vector<16x256xf32>
    %468 = arith.maximumf %466, %467 : vector<16x256xf32>
    %469 = vector.broadcast %461 : vector<1x256xf32> to vector<16x256xf32>
    %470 = arith.subf %3, %469 : vector<16x256xf32>
    %471 = math.absf %470 : vector<16x256xf32>
    %cst_254 = arith.constant 1.000000e+00 : f32
    %472 = vector.broadcast %cst_254 : f32 to vector<16x256xf32>
    %473 = arith.subf %472, %471 : vector<16x256xf32>
    %cst_255 = arith.constant 0.000000e+00 : f32
    %474 = vector.broadcast %cst_255 : f32 to vector<16x256xf32>
    %475 = arith.maximumf %473, %474 : vector<16x256xf32>
    %cst_256 = arith.constant dense<0.000000e+00> : vector<16x256xf32>
    %476 = tpu.matmul %1, %468, %cst_256 {dimension_numbers = #tpu.dot_dimension_numbers<[1], [0], [0], [1], [0, 0, 1, 1], [], []>} : vector<16x16xf32>, vector<16x256xf32>, vector<16x256xf32> -> vector<16x256xf32>
    %477 = arith.mulf %476, %475 : vector<16x256xf32>
    %cst_257 = arith.constant dense<0.000000e+00> : vector<256xf32>
    %478 = vector.multi_reduction <add>, %477, %cst_257 [0] : vector<16x256xf32> to vector<256xf32>
    %479 = vector.shape_cast %478 : vector<256xf32> to vector<1x256xf32>
    %c5_258 = arith.constant 5 : index
    %c0_259 = arith.constant 0 : index
    %480 = vector.load %arg8[%c5_258, %c0_259] : memref<16x256xf32, #tpu.memory_space<vmem>>, vector<1x256xf32>
    tpu.vector_store %arg8[%c5_258, %c0_259], %479 {strides = array<i32>} : memref<16x256xf32, #tpu.memory_space<vmem>>, vector<1x256xf32>,
    %c0_260 = arith.constant 0 : index
    %c10_261 = arith.constant 10 : index
    %c0_262 = arith.constant 0 : index
    %481 = vector.load %arg3[%c0_260, %c10_261, %c0_262] : memref<1x16x256xf32, #tpu.memory_space<vmem>>, vector<1x1x256xf32>
    %482 = vector.shape_cast %481 : vector<1x1x256xf32> to vector<1x256xf32>
    %c0_263 = arith.constant 0 : index
    %c10_264 = arith.constant 10 : index
    %c0_265 = arith.constant 0 : index
    %483 = vector.load %arg4[%c0_263, %c10_264, %c0_265] : memref<1x16x256xf32, #tpu.memory_space<vmem>>, vector<1x1x256xf32>
    %484 = vector.shape_cast %483 : vector<1x1x256xf32> to vector<1x256xf32>
    %cst_266 = arith.constant 1.000000e+00 : f32
    %485 = vector.broadcast %cst_266 : f32 to vector<1x256xf32>
    %486 = arith.addf %482, %485 : vector<1x256xf32>
    %cst_267 = arith.constant 1.600000e+01 : f32
    %487 = vector.broadcast %cst_267 : f32 to vector<1x256xf32>
    %488 = arith.mulf %486, %487 : vector<1x256xf32>
    %cst_268 = arith.constant 1.000000e+00 : f32
    %489 = vector.broadcast %cst_268 : f32 to vector<1x256xf32>
    %490 = arith.subf %488, %489 : vector<1x256xf32>
    %cst_269 = arith.constant 5.000000e-01 : f32
    %491 = vector.broadcast %cst_269 : f32 to vector<1x256xf32>
    %492 = arith.mulf %490, %491 : vector<1x256xf32>
    %cst_270 = arith.constant 0.000000e+00 : f32
    %cst_271 = arith.constant 1.500000e+01 : f32
    %493 = vector.broadcast %cst_270 : f32 to vector<1x256xf32>
    %494 = arith.maximumf %493, %492 : vector<1x256xf32>
    %495 = vector.broadcast %cst_271 : f32 to vector<1x256xf32>
    %496 = arith.minimumf %495, %494 : vector<1x256xf32>
    %cst_272 = arith.constant 1.000000e+00 : f32
    %497 = vector.broadcast %cst_272 : f32 to vector<1x256xf32>
    %498 = arith.addf %484, %497 : vector<1x256xf32>
    %cst_273 = arith.constant 1.600000e+01 : f32
    %499 = vector.broadcast %cst_273 : f32 to vector<1x256xf32>
    %500 = arith.mulf %498, %499 : vector<1x256xf32>
    %cst_274 = arith.constant 1.000000e+00 : f32
    %501 = vector.broadcast %cst_274 : f32 to vector<1x256xf32>
    %502 = arith.subf %500, %501 : vector<1x256xf32>
    %cst_275 = arith.constant 5.000000e-01 : f32
    %503 = vector.broadcast %cst_275 : f32 to vector<1x256xf32>
    %504 = arith.mulf %502, %503 : vector<1x256xf32>
    %cst_276 = arith.constant 0.000000e+00 : f32
    %cst_277 = arith.constant 1.500000e+01 : f32
    %505 = vector.broadcast %cst_276 : f32 to vector<1x256xf32>
    %506 = arith.maximumf %505, %504 : vector<1x256xf32>
    %507 = vector.broadcast %cst_277 : f32 to vector<1x256xf32>
    %508 = arith.minimumf %507, %506 : vector<1x256xf32>
    %509 = vector.broadcast %496 : vector<1x256xf32> to vector<16x256xf32>
    %510 = arith.subf %3, %509 : vector<16x256xf32>
    %511 = math.absf %510 : vector<16x256xf32>
    %cst_278 = arith.constant 1.000000e+00 : f32
    %512 = vector.broadcast %cst_278 : f32 to vector<16x256xf32>
    %513 = arith.subf %512, %511 : vector<16x256xf32>
    %cst_279 = arith.constant 0.000000e+00 : f32
    %514 = vector.broadcast %cst_279 : f32 to vector<16x256xf32>
    %515 = arith.maximumf %513, %514 : vector<16x256xf32>
    %516 = vector.broadcast %508 : vector<1x256xf32> to vector<16x256xf32>
    %517 = arith.subf %3, %516 : vector<16x256xf32>
    %518 = math.absf %517 : vector<16x256xf32>
    %cst_280 = arith.constant 1.000000e+00 : f32
    %519 = vector.broadcast %cst_280 : f32 to vector<16x256xf32>
    %520 = arith.subf %519, %518 : vector<16x256xf32>
    %cst_281 = arith.constant 0.000000e+00 : f32
    %521 = vector.broadcast %cst_281 : f32 to vector<16x256xf32>
    %522 = arith.maximumf %520, %521 : vector<16x256xf32>
    %cst_282 = arith.constant dense<0.000000e+00> : vector<16x256xf32>
    %523 = tpu.matmul %1, %515, %cst_282 {dimension_numbers = #tpu.dot_dimension_numbers<[1], [0], [0], [1], [0, 0, 1, 1], [], []>} : vector<16x16xf32>, vector<16x256xf32>, vector<16x256xf32> -> vector<16x256xf32>
    %524 = arith.mulf %523, %522 : vector<16x256xf32>
    %cst_283 = arith.constant dense<0.000000e+00> : vector<256xf32>
    %525 = vector.multi_reduction <add>, %524, %cst_283 [0] : vector<16x256xf32> to vector<256xf32>
    %526 = vector.shape_cast %525 : vector<256xf32> to vector<1x256xf32>
    %c6_284 = arith.constant 6 : index
    %c0_285 = arith.constant 0 : index
    %527 = vector.load %arg8[%c6_284, %c0_285] : memref<16x256xf32, #tpu.memory_space<vmem>>, vector<1x256xf32>
    tpu.vector_store %arg8[%c6_284, %c0_285], %526 {strides = array<i32>} : memref<16x256xf32, #tpu.memory_space<vmem>>, vector<1x256xf32>,
    %c0_286 = arith.constant 0 : index
    %c11_287 = arith.constant 11 : index
    %c0_288 = arith.constant 0 : index
    %528 = vector.load %arg3[%c0_286, %c11_287, %c0_288] : memref<1x16x256xf32, #tpu.memory_space<vmem>>, vector<1x1x256xf32>
    %529 = vector.shape_cast %528 : vector<1x1x256xf32> to vector<1x256xf32>
    %c0_289 = arith.constant 0 : index
    %c11_290 = arith.constant 11 : index
    %c0_291 = arith.constant 0 : index
    %530 = vector.load %arg4[%c0_289, %c11_290, %c0_291] : memref<1x16x256xf32, #tpu.memory_space<vmem>>, vector<1x1x256xf32>
    %531 = vector.shape_cast %530 : vector<1x1x256xf32> to vector<1x256xf32>
    %cst_292 = arith.constant 1.000000e+00 : f32
    %532 = vector.broadcast %cst_292 : f32 to vector<1x256xf32>
    %533 = arith.addf %529, %532 : vector<1x256xf32>
    %cst_293 = arith.constant 1.600000e+01 : f32
    %534 = vector.broadcast %cst_293 : f32 to vector<1x256xf32>
    %535 = arith.mulf %533, %534 : vector<1x256xf32>
    %cst_294 = arith.constant 1.000000e+00 : f32
    %536 = vector.broadcast %cst_294 : f32 to vector<1x256xf32>
    %537 = arith.subf %535, %536 : vector<1x256xf32>
    %cst_295 = arith.constant 5.000000e-01 : f32
    %538 = vector.broadcast %cst_295 : f32 to vector<1x256xf32>
    %539 = arith.mulf %537, %538 : vector<1x256xf32>
    %cst_296 = arith.constant 0.000000e+00 : f32
    %cst_297 = arith.constant 1.500000e+01 : f32
    %540 = vector.broadcast %cst_296 : f32 to vector<1x256xf32>
    %541 = arith.maximumf %540, %539 : vector<1x256xf32>
    %542 = vector.broadcast %cst_297 : f32 to vector<1x256xf32>
    %543 = arith.minimumf %542, %541 : vector<1x256xf32>
    %cst_298 = arith.constant 1.000000e+00 : f32
    %544 = vector.broadcast %cst_298 : f32 to vector<1x256xf32>
    %545 = arith.addf %531, %544 : vector<1x256xf32>
    %cst_299 = arith.constant 1.600000e+01 : f32
    %546 = vector.broadcast %cst_299 : f32 to vector<1x256xf32>
    %547 = arith.mulf %545, %546 : vector<1x256xf32>
    %cst_300 = arith.constant 1.000000e+00 : f32
    %548 = vector.broadcast %cst_300 : f32 to vector<1x256xf32>
    %549 = arith.subf %547, %548 : vector<1x256xf32>
    %cst_301 = arith.constant 5.000000e-01 : f32
    %550 = vector.broadcast %cst_301 : f32 to vector<1x256xf32>
    %551 = arith.mulf %549, %550 : vector<1x256xf32>
    %cst_302 = arith.constant 0.000000e+00 : f32
    %cst_303 = arith.constant 1.500000e+01 : f32
    %552 = vector.broadcast %cst_302 : f32 to vector<1x256xf32>
    %553 = arith.maximumf %552, %551 : vector<1x256xf32>
    %554 = vector.broadcast %cst_303 : f32 to vector<1x256xf32>
    %555 = arith.minimumf %554, %553 : vector<1x256xf32>
    %556 = vector.broadcast %543 : vector<1x256xf32> to vector<16x256xf32>
    %557 = arith.subf %3, %556 : vector<16x256xf32>
    %558 = math.absf %557 : vector<16x256xf32>
    %cst_304 = arith.constant 1.000000e+00 : f32
    %559 = vector.broadcast %cst_304 : f32 to vector<16x256xf32>
    %560 = arith.subf %559, %558 : vector<16x256xf32>
    %cst_305 = arith.constant 0.000000e+00 : f32
    %561 = vector.broadcast %cst_305 : f32 to vector<16x256xf32>
    %562 = arith.maximumf %560, %561 : vector<16x256xf32>
    %563 = vector.broadcast %555 : vector<1x256xf32> to vector<16x256xf32>
    %564 = arith.subf %3, %563 : vector<16x256xf32>
    %565 = math.absf %564 : vector<16x256xf32>
    %cst_306 = arith.constant 1.000000e+00 : f32
    %566 = vector.broadcast %cst_306 : f32 to vector<16x256xf32>
    %567 = arith.subf %566, %565 : vector<16x256xf32>
    %cst_307 = arith.constant 0.000000e+00 : f32
    %568 = vector.broadcast %cst_307 : f32 to vector<16x256xf32>
    %569 = arith.maximumf %567, %568 : vector<16x256xf32>
    %cst_308 = arith.constant dense<0.000000e+00> : vector<16x256xf32>
    %570 = tpu.matmul %1, %562, %cst_308 {dimension_numbers = #tpu.dot_dimension_numbers<[1], [0], [0], [1], [0, 0, 1, 1], [], []>} : vector<16x16xf32>, vector<16x256xf32>, vector<16x256xf32> -> vector<16x256xf32>
    %571 = arith.mulf %570, %569 : vector<16x256xf32>
    %cst_309 = arith.constant dense<0.000000e+00> : vector<256xf32>
    %572 = vector.multi_reduction <add>, %571, %cst_309 [0] : vector<16x256xf32> to vector<256xf32>
    %573 = vector.shape_cast %572 : vector<256xf32> to vector<1x256xf32>
    %c7_310 = arith.constant 7 : index
    %c0_311 = arith.constant 0 : index
    %574 = vector.load %arg8[%c7_310, %c0_311] : memref<16x256xf32, #tpu.memory_space<vmem>>, vector<1x256xf32>
    tpu.vector_store %arg8[%c7_310, %c0_311], %573 {strides = array<i32>} : memref<16x256xf32, #tpu.memory_space<vmem>>, vector<1x256xf32>,
    %c0_312 = arith.constant 0 : index
    %c12_313 = arith.constant 12 : index
    %c0_314 = arith.constant 0 : index
    %575 = vector.load %arg3[%c0_312, %c12_313, %c0_314] : memref<1x16x256xf32, #tpu.memory_space<vmem>>, vector<1x1x256xf32>
    %576 = vector.shape_cast %575 : vector<1x1x256xf32> to vector<1x256xf32>
    %c0_315 = arith.constant 0 : index
    %c12_316 = arith.constant 12 : index
    %c0_317 = arith.constant 0 : index
    %577 = vector.load %arg4[%c0_315, %c12_316, %c0_317] : memref<1x16x256xf32, #tpu.memory_space<vmem>>, vector<1x1x256xf32>
    %578 = vector.shape_cast %577 : vector<1x1x256xf32> to vector<1x256xf32>
    %cst_318 = arith.constant 1.000000e+00 : f32
    %579 = vector.broadcast %cst_318 : f32 to vector<1x256xf32>
    %580 = arith.addf %576, %579 : vector<1x256xf32>
    %cst_319 = arith.constant 1.600000e+01 : f32
    %581 = vector.broadcast %cst_319 : f32 to vector<1x256xf32>
    %582 = arith.mulf %580, %581 : vector<1x256xf32>
    %cst_320 = arith.constant 1.000000e+00 : f32
    %583 = vector.broadcast %cst_320 : f32 to vector<1x256xf32>
    %584 = arith.subf %582, %583 : vector<1x256xf32>
    %cst_321 = arith.constant 5.000000e-01 : f32
    %585 = vector.broadcast %cst_321 : f32 to vector<1x256xf32>
    %586 = arith.mulf %584, %585 : vector<1x256xf32>
    %cst_322 = arith.constant 0.000000e+00 : f32
    %cst_323 = arith.constant 1.500000e+01 : f32
    %587 = vector.broadcast %cst_322 : f32 to vector<1x256xf32>
    %588 = arith.maximumf %587, %586 : vector<1x256xf32>
    %589 = vector.broadcast %cst_323 : f32 to vector<1x256xf32>
    %590 = arith.minimumf %589, %588 : vector<1x256xf32>
    %cst_324 = arith.constant 1.000000e+00 : f32
    %591 = vector.broadcast %cst_324 : f32 to vector<1x256xf32>
    %592 = arith.addf %578, %591 : vector<1x256xf32>
    %cst_325 = arith.constant 1.600000e+01 : f32
    %593 = vector.broadcast %cst_325 : f32 to vector<1x256xf32>
    %594 = arith.mulf %592, %593 : vector<1x256xf32>
    %cst_326 = arith.constant 1.000000e+00 : f32
    %595 = vector.broadcast %cst_326 : f32 to vector<1x256xf32>
    %596 = arith.subf %594, %595 : vector<1x256xf32>
    %cst_327 = arith.constant 5.000000e-01 : f32
    %597 = vector.broadcast %cst_327 : f32 to vector<1x256xf32>
    %598 = arith.mulf %596, %597 : vector<1x256xf32>
    %cst_328 = arith.constant 0.000000e+00 : f32
    %cst_329 = arith.constant 1.500000e+01 : f32
    %599 = vector.broadcast %cst_328 : f32 to vector<1x256xf32>
    %600 = arith.maximumf %599, %598 : vector<1x256xf32>
    %601 = vector.broadcast %cst_329 : f32 to vector<1x256xf32>
    %602 = arith.minimumf %601, %600 : vector<1x256xf32>
    %603 = vector.broadcast %590 : vector<1x256xf32> to vector<16x256xf32>
    %604 = arith.subf %3, %603 : vector<16x256xf32>
    %605 = math.absf %604 : vector<16x256xf32>
    %cst_330 = arith.constant 1.000000e+00 : f32
    %606 = vector.broadcast %cst_330 : f32 to vector<16x256xf32>
    %607 = arith.subf %606, %605 : vector<16x256xf32>
    %cst_331 = arith.constant 0.000000e+00 : f32
    %608 = vector.broadcast %cst_331 : f32 to vector<16x256xf32>
    %609 = arith.maximumf %607, %608 : vector<16x256xf32>
    %610 = vector.broadcast %602 : vector<1x256xf32> to vector<16x256xf32>
    %611 = arith.subf %3, %610 : vector<16x256xf32>
    %612 = math.absf %611 : vector<16x256xf32>
    %cst_332 = arith.constant 1.000000e+00 : f32
    %613 = vector.broadcast %cst_332 : f32 to vector<16x256xf32>
    %614 = arith.subf %613, %612 : vector<16x256xf32>
    %cst_333 = arith.constant 0.000000e+00 : f32
    %615 = vector.broadcast %cst_333 : f32 to vector<16x256xf32>
    %616 = arith.maximumf %614, %615 : vector<16x256xf32>
    %cst_334 = arith.constant dense<0.000000e+00> : vector<16x256xf32>
    %617 = tpu.matmul %1, %609, %cst_334 {dimension_numbers = #tpu.dot_dimension_numbers<[1], [0], [0], [1], [0, 0, 1, 1], [], []>} : vector<16x16xf32>, vector<16x256xf32>, vector<16x256xf32> -> vector<16x256xf32>
    %618 = arith.mulf %617, %616 : vector<16x256xf32>
    %cst_335 = arith.constant dense<0.000000e+00> : vector<256xf32>
    %619 = vector.multi_reduction <add>, %618, %cst_335 [0] : vector<16x256xf32> to vector<256xf32>
    %620 = vector.shape_cast %619 : vector<256xf32> to vector<1x256xf32>
    %c8_336 = arith.constant 8 : index
    %c0_337 = arith.constant 0 : index
    %621 = vector.load %arg8[%c8_336, %c0_337] : memref<16x256xf32, #tpu.memory_space<vmem>>, vector<1x256xf32>
    tpu.vector_store %arg8[%c8_336, %c0_337], %620 {strides = array<i32>} : memref<16x256xf32, #tpu.memory_space<vmem>>, vector<1x256xf32>,
    %c0_338 = arith.constant 0 : index
    %c13 = arith.constant 13 : index
    %c0_339 = arith.constant 0 : index
    %622 = vector.load %arg3[%c0_338, %c13, %c0_339] : memref<1x16x256xf32, #tpu.memory_space<vmem>>, vector<1x1x256xf32>
    %623 = vector.shape_cast %622 : vector<1x1x256xf32> to vector<1x256xf32>
    %c0_340 = arith.constant 0 : index
    %c13_341 = arith.constant 13 : index
    %c0_342 = arith.constant 0 : index
    %624 = vector.load %arg4[%c0_340, %c13_341, %c0_342] : memref<1x16x256xf32, #tpu.memory_space<vmem>>, vector<1x1x256xf32>
    %625 = vector.shape_cast %624 : vector<1x1x256xf32> to vector<1x256xf32>
    %cst_343 = arith.constant 1.000000e+00 : f32
    %626 = vector.broadcast %cst_343 : f32 to vector<1x256xf32>
    %627 = arith.addf %623, %626 : vector<1x256xf32>
    %cst_344 = arith.constant 1.600000e+01 : f32
    %628 = vector.broadcast %cst_344 : f32 to vector<1x256xf32>
    %629 = arith.mulf %627, %628 : vector<1x256xf32>
    %cst_345 = arith.constant 1.000000e+00 : f32
    %630 = vector.broadcast %cst_345 : f32 to vector<1x256xf32>
    %631 = arith.subf %629, %630 : vector<1x256xf32>
    %cst_346 = arith.constant 5.000000e-01 : f32
    %632 = vector.broadcast %cst_346 : f32 to vector<1x256xf32>
    %633 = arith.mulf %631, %632 : vector<1x256xf32>
    %cst_347 = arith.constant 0.000000e+00 : f32
    %cst_348 = arith.constant 1.500000e+01 : f32
    %634 = vector.broadcast %cst_347 : f32 to vector<1x256xf32>
    %635 = arith.maximumf %634, %633 : vector<1x256xf32>
    %636 = vector.broadcast %cst_348 : f32 to vector<1x256xf32>
    %637 = arith.minimumf %636, %635 : vector<1x256xf32>
    %cst_349 = arith.constant 1.000000e+00 : f32
    %638 = vector.broadcast %cst_349 : f32 to vector<1x256xf32>
    %639 = arith.addf %625, %638 : vector<1x256xf32>
    %cst_350 = arith.constant 1.600000e+01 : f32
    %640 = vector.broadcast %cst_350 : f32 to vector<1x256xf32>
    %641 = arith.mulf %639, %640 : vector<1x256xf32>
    %cst_351 = arith.constant 1.000000e+00 : f32
    %642 = vector.broadcast %cst_351 : f32 to vector<1x256xf32>
    %643 = arith.subf %641, %642 : vector<1x256xf32>
    %cst_352 = arith.constant 5.000000e-01 : f32
    %644 = vector.broadcast %cst_352 : f32 to vector<1x256xf32>
    %645 = arith.mulf %643, %644 : vector<1x256xf32>
    %cst_353 = arith.constant 0.000000e+00 : f32
    %cst_354 = arith.constant 1.500000e+01 : f32
    %646 = vector.broadcast %cst_353 : f32 to vector<1x256xf32>
    %647 = arith.maximumf %646, %645 : vector<1x256xf32>
    %648 = vector.broadcast %cst_354 : f32 to vector<1x256xf32>
    %649 = arith.minimumf %648, %647 : vector<1x256xf32>
    %650 = vector.broadcast %637 : vector<1x256xf32> to vector<16x256xf32>
    %651 = arith.subf %3, %650 : vector<16x256xf32>
    %652 = math.absf %651 : vector<16x256xf32>
    %cst_355 = arith.constant 1.000000e+00 : f32
    %653 = vector.broadcast %cst_355 : f32 to vector<16x256xf32>
    %654 = arith.subf %653, %652 : vector<16x256xf32>
    %cst_356 = arith.constant 0.000000e+00 : f32
    %655 = vector.broadcast %cst_356 : f32 to vector<16x256xf32>
    %656 = arith.maximumf %654, %655 : vector<16x256xf32>
    %657 = vector.broadcast %649 : vector<1x256xf32> to vector<16x256xf32>
    %658 = arith.subf %3, %657 : vector<16x256xf32>
    %659 = math.absf %658 : vector<16x256xf32>
    %cst_357 = arith.constant 1.000000e+00 : f32
    %660 = vector.broadcast %cst_357 : f32 to vector<16x256xf32>
    %661 = arith.subf %660, %659 : vector<16x256xf32>
    %cst_358 = arith.constant 0.000000e+00 : f32
    %662 = vector.broadcast %cst_358 : f32 to vector<16x256xf32>
    %663 = arith.maximumf %661, %662 : vector<16x256xf32>
    %cst_359 = arith.constant dense<0.000000e+00> : vector<16x256xf32>
    %664 = tpu.matmul %1, %656, %cst_359 {dimension_numbers = #tpu.dot_dimension_numbers<[1], [0], [0], [1], [0, 0, 1, 1], [], []>} : vector<16x16xf32>, vector<16x256xf32>, vector<16x256xf32> -> vector<16x256xf32>
    %665 = arith.mulf %664, %663 : vector<16x256xf32>
    %cst_360 = arith.constant dense<0.000000e+00> : vector<256xf32>
    %666 = vector.multi_reduction <add>, %665, %cst_360 [0] : vector<16x256xf32> to vector<256xf32>
    %667 = vector.shape_cast %666 : vector<256xf32> to vector<1x256xf32>
    %c9_361 = arith.constant 9 : index
    %c0_362 = arith.constant 0 : index
    %668 = vector.load %arg8[%c9_361, %c0_362] : memref<16x256xf32, #tpu.memory_space<vmem>>, vector<1x256xf32>
    tpu.vector_store %arg8[%c9_361, %c0_362], %667 {strides = array<i32>} : memref<16x256xf32, #tpu.memory_space<vmem>>, vector<1x256xf32>,
    %c0_363 = arith.constant 0 : index
    %c14 = arith.constant 14 : index
    %c0_364 = arith.constant 0 : index
    %669 = vector.load %arg3[%c0_363, %c14, %c0_364] : memref<1x16x256xf32, #tpu.memory_space<vmem>>, vector<1x1x256xf32>
    %670 = vector.shape_cast %669 : vector<1x1x256xf32> to vector<1x256xf32>
    %c0_365 = arith.constant 0 : index
    %c14_366 = arith.constant 14 : index
    %c0_367 = arith.constant 0 : index
    %671 = vector.load %arg4[%c0_365, %c14_366, %c0_367] : memref<1x16x256xf32, #tpu.memory_space<vmem>>, vector<1x1x256xf32>
    %672 = vector.shape_cast %671 : vector<1x1x256xf32> to vector<1x256xf32>
    %cst_368 = arith.constant 1.000000e+00 : f32
    %673 = vector.broadcast %cst_368 : f32 to vector<1x256xf32>
    %674 = arith.addf %670, %673 : vector<1x256xf32>
    %cst_369 = arith.constant 1.600000e+01 : f32
    %675 = vector.broadcast %cst_369 : f32 to vector<1x256xf32>
    %676 = arith.mulf %674, %675 : vector<1x256xf32>
    %cst_370 = arith.constant 1.000000e+00 : f32
    %677 = vector.broadcast %cst_370 : f32 to vector<1x256xf32>
    %678 = arith.subf %676, %677 : vector<1x256xf32>
    %cst_371 = arith.constant 5.000000e-01 : f32
    %679 = vector.broadcast %cst_371 : f32 to vector<1x256xf32>
    %680 = arith.mulf %678, %679 : vector<1x256xf32>
    %cst_372 = arith.constant 0.000000e+00 : f32
    %cst_373 = arith.constant 1.500000e+01 : f32
    %681 = vector.broadcast %cst_372 : f32 to vector<1x256xf32>
    %682 = arith.maximumf %681, %680 : vector<1x256xf32>
    %683 = vector.broadcast %cst_373 : f32 to vector<1x256xf32>
    %684 = arith.minimumf %683, %682 : vector<1x256xf32>
    %cst_374 = arith.constant 1.000000e+00 : f32
    %685 = vector.broadcast %cst_374 : f32 to vector<1x256xf32>
    %686 = arith.addf %672, %685 : vector<1x256xf32>
    %cst_375 = arith.constant 1.600000e+01 : f32
    %687 = vector.broadcast %cst_375 : f32 to vector<1x256xf32>
    %688 = arith.mulf %686, %687 : vector<1x256xf32>
    %cst_376 = arith.constant 1.000000e+00 : f32
    %689 = vector.broadcast %cst_376 : f32 to vector<1x256xf32>
    %690 = arith.subf %688, %689 : vector<1x256xf32>
    %cst_377 = arith.constant 5.000000e-01 : f32
    %691 = vector.broadcast %cst_377 : f32 to vector<1x256xf32>
    %692 = arith.mulf %690, %691 : vector<1x256xf32>
    %cst_378 = arith.constant 0.000000e+00 : f32
    %cst_379 = arith.constant 1.500000e+01 : f32
    %693 = vector.broadcast %cst_378 : f32 to vector<1x256xf32>
    %694 = arith.maximumf %693, %692 : vector<1x256xf32>
    %695 = vector.broadcast %cst_379 : f32 to vector<1x256xf32>
    %696 = arith.minimumf %695, %694 : vector<1x256xf32>
    %697 = vector.broadcast %684 : vector<1x256xf32> to vector<16x256xf32>
    %698 = arith.subf %3, %697 : vector<16x256xf32>
    %699 = math.absf %698 : vector<16x256xf32>
    %cst_380 = arith.constant 1.000000e+00 : f32
    %700 = vector.broadcast %cst_380 : f32 to vector<16x256xf32>
    %701 = arith.subf %700, %699 : vector<16x256xf32>
    %cst_381 = arith.constant 0.000000e+00 : f32
    %702 = vector.broadcast %cst_381 : f32 to vector<16x256xf32>
    %703 = arith.maximumf %701, %702 : vector<16x256xf32>
    %704 = vector.broadcast %696 : vector<1x256xf32> to vector<16x256xf32>
    %705 = arith.subf %3, %704 : vector<16x256xf32>
    %706 = math.absf %705 : vector<16x256xf32>
    %cst_382 = arith.constant 1.000000e+00 : f32
    %707 = vector.broadcast %cst_382 : f32 to vector<16x256xf32>
    %708 = arith.subf %707, %706 : vector<16x256xf32>
    %cst_383 = arith.constant 0.000000e+00 : f32
    %709 = vector.broadcast %cst_383 : f32 to vector<16x256xf32>
    %710 = arith.maximumf %708, %709 : vector<16x256xf32>
    %cst_384 = arith.constant dense<0.000000e+00> : vector<16x256xf32>
    %711 = tpu.matmul %1, %703, %cst_384 {dimension_numbers = #tpu.dot_dimension_numbers<[1], [0], [0], [1], [0, 0, 1, 1], [], []>} : vector<16x16xf32>, vector<16x256xf32>, vector<16x256xf32> -> vector<16x256xf32>
    %712 = arith.mulf %711, %710 : vector<16x256xf32>
    %cst_385 = arith.constant dense<0.000000e+00> : vector<256xf32>
    %713 = vector.multi_reduction <add>, %712, %cst_385 [0] : vector<16x256xf32> to vector<256xf32>
    %714 = vector.shape_cast %713 : vector<256xf32> to vector<1x256xf32>
    %c10_386 = arith.constant 10 : index
    %c0_387 = arith.constant 0 : index
    %715 = vector.load %arg8[%c10_386, %c0_387] : memref<16x256xf32, #tpu.memory_space<vmem>>, vector<1x256xf32>
    tpu.vector_store %arg8[%c10_386, %c0_387], %714 {strides = array<i32>} : memref<16x256xf32, #tpu.memory_space<vmem>>, vector<1x256xf32>,
    %c0_388 = arith.constant 0 : index
    %c15 = arith.constant 15 : index
    %c0_389 = arith.constant 0 : index
    %716 = vector.load %arg3[%c0_388, %c15, %c0_389] : memref<1x16x256xf32, #tpu.memory_space<vmem>>, vector<1x1x256xf32>
    %717 = vector.shape_cast %716 : vector<1x1x256xf32> to vector<1x256xf32>
    %c0_390 = arith.constant 0 : index
    %c15_391 = arith.constant 15 : index
    %c0_392 = arith.constant 0 : index
    %718 = vector.load %arg4[%c0_390, %c15_391, %c0_392] : memref<1x16x256xf32, #tpu.memory_space<vmem>>, vector<1x1x256xf32>
    %719 = vector.shape_cast %718 : vector<1x1x256xf32> to vector<1x256xf32>
    %cst_393 = arith.constant 1.000000e+00 : f32
    %720 = vector.broadcast %cst_393 : f32 to vector<1x256xf32>
    %721 = arith.addf %717, %720 : vector<1x256xf32>
    %cst_394 = arith.constant 1.600000e+01 : f32
    %722 = vector.broadcast %cst_394 : f32 to vector<1x256xf32>
    %723 = arith.mulf %721, %722 : vector<1x256xf32>
    %cst_395 = arith.constant 1.000000e+00 : f32
    %724 = vector.broadcast %cst_395 : f32 to vector<1x256xf32>
    %725 = arith.subf %723, %724 : vector<1x256xf32>
    %cst_396 = arith.constant 5.000000e-01 : f32
    %726 = vector.broadcast %cst_396 : f32 to vector<1x256xf32>
    %727 = arith.mulf %725, %726 : vector<1x256xf32>
    %cst_397 = arith.constant 0.000000e+00 : f32
    %cst_398 = arith.constant 1.500000e+01 : f32
    %728 = vector.broadcast %cst_397 : f32 to vector<1x256xf32>
    %729 = arith.maximumf %728, %727 : vector<1x256xf32>
    %730 = vector.broadcast %cst_398 : f32 to vector<1x256xf32>
    %731 = arith.minimumf %730, %729 : vector<1x256xf32>
    %cst_399 = arith.constant 1.000000e+00 : f32
    %732 = vector.broadcast %cst_399 : f32 to vector<1x256xf32>
    %733 = arith.addf %719, %732 : vector<1x256xf32>
    %cst_400 = arith.constant 1.600000e+01 : f32
    %734 = vector.broadcast %cst_400 : f32 to vector<1x256xf32>
    %735 = arith.mulf %733, %734 : vector<1x256xf32>
    %cst_401 = arith.constant 1.000000e+00 : f32
    %736 = vector.broadcast %cst_401 : f32 to vector<1x256xf32>
    %737 = arith.subf %735, %736 : vector<1x256xf32>
    %cst_402 = arith.constant 5.000000e-01 : f32
    %738 = vector.broadcast %cst_402 : f32 to vector<1x256xf32>
    %739 = arith.mulf %737, %738 : vector<1x256xf32>
    %cst_403 = arith.constant 0.000000e+00 : f32
    %cst_404 = arith.constant 1.500000e+01 : f32
    %740 = vector.broadcast %cst_403 : f32 to vector<1x256xf32>
    %741 = arith.maximumf %740, %739 : vector<1x256xf32>
    %742 = vector.broadcast %cst_404 : f32 to vector<1x256xf32>
    %743 = arith.minimumf %742, %741 : vector<1x256xf32>
    %744 = vector.broadcast %731 : vector<1x256xf32> to vector<16x256xf32>
    %745 = arith.subf %3, %744 : vector<16x256xf32>
    %746 = math.absf %745 : vector<16x256xf32>
    %cst_405 = arith.constant 1.000000e+00 : f32
    %747 = vector.broadcast %cst_405 : f32 to vector<16x256xf32>
    %748 = arith.subf %747, %746 : vector<16x256xf32>
    %cst_406 = arith.constant 0.000000e+00 : f32
    %749 = vector.broadcast %cst_406 : f32 to vector<16x256xf32>
    %750 = arith.maximumf %748, %749 : vector<16x256xf32>
    %751 = vector.broadcast %743 : vector<1x256xf32> to vector<16x256xf32>
    %752 = arith.subf %3, %751 : vector<16x256xf32>
    %753 = math.absf %752 : vector<16x256xf32>
    %cst_407 = arith.constant 1.000000e+00 : f32
    %754 = vector.broadcast %cst_407 : f32 to vector<16x256xf32>
    %755 = arith.subf %754, %753 : vector<16x256xf32>
    %cst_408 = arith.constant 0.000000e+00 : f32
    %756 = vector.broadcast %cst_408 : f32 to vector<16x256xf32>
    %757 = arith.maximumf %755, %756 : vector<16x256xf32>
    %cst_409 = arith.constant dense<0.000000e+00> : vector<16x256xf32>
    %758 = tpu.matmul %1, %750, %cst_409 {dimension_numbers = #tpu.dot_dimension_numbers<[1], [0], [0], [1], [0, 0, 1, 1], [], []>} : vector<16x16xf32>, vector<16x256xf32>, vector<16x256xf32> -> vector<16x256xf32>
    %759 = arith.mulf %758, %757 : vector<16x256xf32>
    %cst_410 = arith.constant dense<0.000000e+00> : vector<256xf32>
    %760 = vector.multi_reduction <add>, %759, %cst_410 [0] : vector<16x256xf32> to vector<256xf32>
    %761 = vector.shape_cast %760 : vector<256xf32> to vector<1x256xf32>
    %c11_411 = arith.constant 11 : index
    %c0_412 = arith.constant 0 : index
    %762 = vector.load %arg8[%c11_411, %c0_412] : memref<16x256xf32, #tpu.memory_space<vmem>>, vector<1x256xf32>
    tpu.vector_store %arg8[%c11_411, %c0_412], %761 {strides = array<i32>} : memref<16x256xf32, #tpu.memory_space<vmem>>, vector<1x256xf32>,
    %c0_413 = arith.constant 0 : index
    %c0_414 = arith.constant 0 : index
    %763 = vector.load %arg7[%c0_413, %c0_414] : memref<16x256xf32, #tpu.memory_space<vmem>>, vector<16x256xf32>
    %c0_415 = arith.constant 0 : index
    %c0_416 = arith.constant 0 : index
    %764 = vector.load %arg8[%c0_415, %c0_416] : memref<16x256xf32, #tpu.memory_space<vmem>>, vector<16x256xf32>
    %cst_417 = arith.constant 3.40282347E+38 : f32
    %765 = vector.broadcast %cst_417 : f32 to vector<1x256xf32>
    %766 = arith.minimumf %763, %764 : vector<16x256xf32>
    %767 = arith.maximumf %763, %764 : vector<16x256xf32>
    %768 = vector.extract_strided_slice %766 {offsets = [1, 0], sizes = [15, 256], strides = [1, 1]} : vector<16x256xf32> to vector<15x256xf32>
    %769 = tpu.concatenate %768, %765 in 0 : vector<15x256xf32>, vector<1x256xf32> -> vector<16x256xf32>
    %770 = arith.minimumf %767, %769 : vector<16x256xf32>
    %771 = arith.maximumf %767, %769 : vector<16x256xf32>
    %772 = vector.extract_strided_slice %766 {offsets = [0, 0], sizes = [1, 256], strides = [1, 1]} : vector<16x256xf32> to vector<1x256xf32>
    %773 = vector.extract_strided_slice %771 {offsets = [0, 0], sizes = [15, 256], strides = [1, 1]} : vector<16x256xf32> to vector<15x256xf32>
    %774 = tpu.concatenate %772, %773 in 0 : vector<1x256xf32>, vector<15x256xf32> -> vector<16x256xf32>
    %775 = arith.minimumf %774, %770 : vector<16x256xf32>
    %776 = arith.maximumf %774, %770 : vector<16x256xf32>
    %777 = vector.extract_strided_slice %775 {offsets = [1, 0], sizes = [15, 256], strides = [1, 1]} : vector<16x256xf32> to vector<15x256xf32>
    %778 = tpu.concatenate %777, %765 in 0 : vector<15x256xf32>, vector<1x256xf32> -> vector<16x256xf32>
    %779 = arith.minimumf %776, %778 : vector<16x256xf32>
    %780 = arith.maximumf %776, %778 : vector<16x256xf32>
    %781 = vector.extract_strided_slice %775 {offsets = [0, 0], sizes = [1, 256], strides = [1, 1]} : vector<16x256xf32> to vector<1x256xf32>
    %782 = vector.extract_strided_slice %780 {offsets = [0, 0], sizes = [15, 256], strides = [1, 1]} : vector<16x256xf32> to vector<15x256xf32>
    %783 = tpu.concatenate %781, %782 in 0 : vector<1x256xf32>, vector<15x256xf32> -> vector<16x256xf32>
    %784 = arith.minimumf %783, %779 : vector<16x256xf32>
    %785 = arith.maximumf %783, %779 : vector<16x256xf32>
    %786 = vector.extract_strided_slice %784 {offsets = [1, 0], sizes = [15, 256], strides = [1, 1]} : vector<16x256xf32> to vector<15x256xf32>
    %787 = tpu.concatenate %786, %765 in 0 : vector<15x256xf32>, vector<1x256xf32> -> vector<16x256xf32>
    %788 = arith.minimumf %785, %787 : vector<16x256xf32>
    %789 = arith.maximumf %785, %787 : vector<16x256xf32>
    %790 = vector.extract_strided_slice %784 {offsets = [0, 0], sizes = [1, 256], strides = [1, 1]} : vector<16x256xf32> to vector<1x256xf32>
    %791 = vector.extract_strided_slice %789 {offsets = [0, 0], sizes = [15, 256], strides = [1, 1]} : vector<16x256xf32> to vector<15x256xf32>
    %792 = tpu.concatenate %790, %791 in 0 : vector<1x256xf32>, vector<15x256xf32> -> vector<16x256xf32>
    %793 = arith.minimumf %792, %788 : vector<16x256xf32>
    %794 = arith.maximumf %792, %788 : vector<16x256xf32>
    %795 = vector.extract_strided_slice %793 {offsets = [1, 0], sizes = [15, 256], strides = [1, 1]} : vector<16x256xf32> to vector<15x256xf32>
    %796 = tpu.concatenate %795, %765 in 0 : vector<15x256xf32>, vector<1x256xf32> -> vector<16x256xf32>
    %797 = arith.minimumf %794, %796 : vector<16x256xf32>
    %798 = arith.maximumf %794, %796 : vector<16x256xf32>
    %799 = vector.extract_strided_slice %793 {offsets = [0, 0], sizes = [1, 256], strides = [1, 1]} : vector<16x256xf32> to vector<1x256xf32>
    %800 = vector.extract_strided_slice %798 {offsets = [0, 0], sizes = [15, 256], strides = [1, 1]} : vector<16x256xf32> to vector<15x256xf32>
    %801 = tpu.concatenate %799, %800 in 0 : vector<1x256xf32>, vector<15x256xf32> -> vector<16x256xf32>
    %802 = arith.minimumf %801, %797 : vector<16x256xf32>
    %803 = arith.maximumf %801, %797 : vector<16x256xf32>
    %804 = vector.extract_strided_slice %802 {offsets = [1, 0], sizes = [15, 256], strides = [1, 1]} : vector<16x256xf32> to vector<15x256xf32>
    %805 = tpu.concatenate %804, %765 in 0 : vector<15x256xf32>, vector<1x256xf32> -> vector<16x256xf32>
    %806 = arith.minimumf %803, %805 : vector<16x256xf32>
    %807 = arith.maximumf %803, %805 : vector<16x256xf32>
    %808 = vector.extract_strided_slice %802 {offsets = [0, 0], sizes = [1, 256], strides = [1, 1]} : vector<16x256xf32> to vector<1x256xf32>
    %809 = vector.extract_strided_slice %807 {offsets = [0, 0], sizes = [15, 256], strides = [1, 1]} : vector<16x256xf32> to vector<15x256xf32>
    %810 = tpu.concatenate %808, %809 in 0 : vector<1x256xf32>, vector<15x256xf32> -> vector<16x256xf32>
    %811 = arith.minimumf %810, %806 : vector<16x256xf32>
    %812 = arith.maximumf %810, %806 : vector<16x256xf32>
    %813 = vector.extract_strided_slice %811 {offsets = [1, 0], sizes = [15, 256], strides = [1, 1]} : vector<16x256xf32> to vector<15x256xf32>
    %814 = tpu.concatenate %813, %765 in 0 : vector<15x256xf32>, vector<1x256xf32> -> vector<16x256xf32>
    %815 = arith.minimumf %812, %814 : vector<16x256xf32>
    %816 = arith.maximumf %812, %814 : vector<16x256xf32>
    %817 = vector.extract_strided_slice %811 {offsets = [0, 0], sizes = [1, 256], strides = [1, 1]} : vector<16x256xf32> to vector<1x256xf32>
    %818 = vector.extract_strided_slice %816 {offsets = [0, 0], sizes = [15, 256], strides = [1, 1]} : vector<16x256xf32> to vector<15x256xf32>
    %819 = tpu.concatenate %817, %818 in 0 : vector<1x256xf32>, vector<15x256xf32> -> vector<16x256xf32>
    %820 = arith.minimumf %819, %815 : vector<16x256xf32>
    %821 = arith.maximumf %819, %815 : vector<16x256xf32>
    %822 = vector.extract_strided_slice %820 {offsets = [1, 0], sizes = [15, 256], strides = [1, 1]} : vector<16x256xf32> to vector<15x256xf32>
    %823 = tpu.concatenate %822, %765 in 0 : vector<15x256xf32>, vector<1x256xf32> -> vector<16x256xf32>
    %824 = arith.minimumf %821, %823 : vector<16x256xf32>
    %825 = arith.maximumf %821, %823 : vector<16x256xf32>
    %826 = vector.extract_strided_slice %820 {offsets = [0, 0], sizes = [1, 256], strides = [1, 1]} : vector<16x256xf32> to vector<1x256xf32>
    %827 = vector.extract_strided_slice %825 {offsets = [0, 0], sizes = [15, 256], strides = [1, 1]} : vector<16x256xf32> to vector<15x256xf32>
    %828 = tpu.concatenate %826, %827 in 0 : vector<1x256xf32>, vector<15x256xf32> -> vector<16x256xf32>
    %829 = arith.minimumf %828, %824 : vector<16x256xf32>
    %830 = arith.maximumf %828, %824 : vector<16x256xf32>
    %831 = vector.extract_strided_slice %829 {offsets = [1, 0], sizes = [15, 256], strides = [1, 1]} : vector<16x256xf32> to vector<15x256xf32>
    %832 = tpu.concatenate %831, %765 in 0 : vector<15x256xf32>, vector<1x256xf32> -> vector<16x256xf32>
    %833 = arith.minimumf %830, %832 : vector<16x256xf32>
    %834 = arith.maximumf %830, %832 : vector<16x256xf32>
    %835 = vector.extract_strided_slice %829 {offsets = [0, 0], sizes = [1, 256], strides = [1, 1]} : vector<16x256xf32> to vector<1x256xf32>
    %836 = vector.extract_strided_slice %834 {offsets = [0, 0], sizes = [15, 256], strides = [1, 1]} : vector<16x256xf32> to vector<15x256xf32>
    %837 = tpu.concatenate %835, %836 in 0 : vector<1x256xf32>, vector<15x256xf32> -> vector<16x256xf32>
    %838 = arith.minimumf %837, %833 : vector<16x256xf32>
    %839 = arith.maximumf %837, %833 : vector<16x256xf32>
    %840 = vector.extract_strided_slice %838 {offsets = [1, 0], sizes = [15, 256], strides = [1, 1]} : vector<16x256xf32> to vector<15x256xf32>
    %841 = tpu.concatenate %840, %765 in 0 : vector<15x256xf32>, vector<1x256xf32> -> vector<16x256xf32>
    %842 = arith.minimumf %839, %841 : vector<16x256xf32>
    %843 = arith.maximumf %839, %841 : vector<16x256xf32>
    %844 = vector.extract_strided_slice %838 {offsets = [0, 0], sizes = [1, 256], strides = [1, 1]} : vector<16x256xf32> to vector<1x256xf32>
    %845 = vector.extract_strided_slice %843 {offsets = [0, 0], sizes = [15, 256], strides = [1, 1]} : vector<16x256xf32> to vector<15x256xf32>
    %846 = tpu.concatenate %844, %845 in 0 : vector<1x256xf32>, vector<15x256xf32> -> vector<16x256xf32>
    %847 = arith.minimumf %846, %842 : vector<16x256xf32>
    %848 = arith.maximumf %846, %842 : vector<16x256xf32>
    %849 = vector.extract_strided_slice %847 {offsets = [1, 0], sizes = [15, 256], strides = [1, 1]} : vector<16x256xf32> to vector<15x256xf32>
    %850 = tpu.concatenate %849, %765 in 0 : vector<15x256xf32>, vector<1x256xf32> -> vector<16x256xf32>
    %851 = arith.minimumf %848, %850 : vector<16x256xf32>
    %852 = arith.maximumf %848, %850 : vector<16x256xf32>
    %853 = vector.extract_strided_slice %847 {offsets = [0, 0], sizes = [1, 256], strides = [1, 1]} : vector<16x256xf32> to vector<1x256xf32>
    %854 = vector.extract_strided_slice %852 {offsets = [0, 0], sizes = [15, 256], strides = [1, 1]} : vector<16x256xf32> to vector<15x256xf32>
    %855 = tpu.concatenate %853, %854 in 0 : vector<1x256xf32>, vector<15x256xf32> -> vector<16x256xf32>
    %856 = arith.minimumf %855, %851 : vector<16x256xf32>
    %857 = arith.maximumf %855, %851 : vector<16x256xf32>
    %858 = vector.extract_strided_slice %856 {offsets = [1, 0], sizes = [15, 256], strides = [1, 1]} : vector<16x256xf32> to vector<15x256xf32>
    %859 = tpu.concatenate %858, %765 in 0 : vector<15x256xf32>, vector<1x256xf32> -> vector<16x256xf32>
    %860 = arith.minimumf %857, %859 : vector<16x256xf32>
    %861 = arith.maximumf %857, %859 : vector<16x256xf32>
    %862 = vector.extract_strided_slice %856 {offsets = [0, 0], sizes = [1, 256], strides = [1, 1]} : vector<16x256xf32> to vector<1x256xf32>
    %863 = vector.extract_strided_slice %861 {offsets = [0, 0], sizes = [15, 256], strides = [1, 1]} : vector<16x256xf32> to vector<15x256xf32>
    %864 = tpu.concatenate %862, %863 in 0 : vector<1x256xf32>, vector<15x256xf32> -> vector<16x256xf32>
    %865 = arith.minimumf %864, %860 : vector<16x256xf32>
    %866 = arith.maximumf %864, %860 : vector<16x256xf32>
    %867 = vector.extract_strided_slice %865 {offsets = [1, 0], sizes = [15, 256], strides = [1, 1]} : vector<16x256xf32> to vector<15x256xf32>
    %868 = tpu.concatenate %867, %765 in 0 : vector<15x256xf32>, vector<1x256xf32> -> vector<16x256xf32>
    %869 = arith.minimumf %866, %868 : vector<16x256xf32>
    %870 = arith.maximumf %866, %868 : vector<16x256xf32>
    %871 = vector.extract_strided_slice %865 {offsets = [0, 0], sizes = [1, 256], strides = [1, 1]} : vector<16x256xf32> to vector<1x256xf32>
    %872 = vector.extract_strided_slice %870 {offsets = [0, 0], sizes = [15, 256], strides = [1, 1]} : vector<16x256xf32> to vector<15x256xf32>
    %873 = tpu.concatenate %871, %872 in 0 : vector<1x256xf32>, vector<15x256xf32> -> vector<16x256xf32>
    %874 = vector.extract_strided_slice %873 {offsets = [0, 0], sizes = [12, 256], strides = [1, 1]} : vector<16x256xf32> to vector<12x256xf32>
    %875 = vector.shape_cast %874 : vector<12x256xf32> to vector<1x12x256xf32>
    %c0_418 = arith.constant 0 : index
    %c0_419 = arith.constant 0 : index
    %c0_420 = arith.constant 0 : index
    %876 = vector.load %arg5[%c0_418, %c0_419, %c0_420] : memref<1x12x256xf32, #tpu.memory_space<vmem>>, vector<1x12x256xf32>
    tpu.vector_store %arg5[%c0_418, %c0_419, %c0_420], %875 {strides = array<i32>} : memref<1x12x256xf32, #tpu.memory_space<vmem>>, vector<1x12x256xf32>,
    %877 = vector.extract_strided_slice %869 {offsets = [0, 0], sizes = [12, 256], strides = [1, 1]} : vector<16x256xf32> to vector<12x256xf32>
    %878 = vector.shape_cast %877 : vector<12x256xf32> to vector<1x12x256xf32>
    %c0_421 = arith.constant 0 : index
    %c0_422 = arith.constant 0 : index
    %c0_423 = arith.constant 0 : index
    %879 = vector.load %arg6[%c0_421, %c0_422, %c0_423] : memref<1x12x256xf32, #tpu.memory_space<vmem>>, vector<1x12x256xf32>
    tpu.vector_store %arg6[%c0_421, %c0_422, %c0_423], %878 {strides = array<i32>} : memref<1x12x256xf32, #tpu.memory_space<vmem>>, vector<1x12x256xf32>,
    return
  }
  func.func @transform_0(%arg0: i32) -> (i32, i32, i32) {
    %c0_i32 = arith.constant 0 : i32
    %c0_i32_0 = arith.constant 0 : i32
    %c0_i32_1 = arith.constant 0 : i32
    return %arg0, %c0_i32, %c0_i32_0 : i32, i32, i32
  }
  func.func @transform_1(%arg0: i32) -> (i32, i32, i32) {
    %c0_i32 = arith.constant 0 : i32
    %c0_i32_0 = arith.constant 0 : i32
    %c0_i32_1 = arith.constant 0 : i32
    return %arg0, %c0_i32, %c0_i32_0 : i32, i32, i32
  }
  func.func @transform_2(%arg0: i32) -> (i32, i32, i32) {
    %c0_i32 = arith.constant 0 : i32
    %c0_i32_0 = arith.constant 0 : i32
    %c0_i32_1 = arith.constant 0 : i32
    return %arg0, %c0_i32, %c0_i32_0 : i32, i32, i32
  }
  func.func @transform_3(%arg0: i32) -> (i32, i32, i32) {
    %c0_i32 = arith.constant 0 : i32
    %c0_i32_0 = arith.constant 0 : i32
    %c0_i32_1 = arith.constant 0 : i32
    return %arg0, %c0_i32, %c0_i32_0 : i32, i32, i32
  }
  func.func @transform_4(%arg0: i32) -> (i32, i32, i32) {
    %c0_i32 = arith.constant 0 : i32
    %c0_i32_0 = arith.constant 0 : i32
    %c0_i32_1 = arith.constant 0 : i32
    return %arg0, %c0_i32, %c0_i32_0 : i32, i32, i32
  }
  func.func @transform_5(%arg0: i32) -> (i32, i32, i32) {
    %c0_i32 = arith.constant 0 : i32
    %c0_i32_0 = arith.constant 0 : i32
    %c0_i32_1 = arith.constant 0 : i32
    return %arg0, %c0_i32, %c0_i32_0 : i32, i32, i32
  }
}

</mosaic_0001>

<bundles_post_ra>
// kernel: squeeze.5
= control target key start
LH: loop header
LB: loop body
LE: loop exit
PB: predicated region body
PF: predicated region fallthrough
CT: control target
= control target key end

     0   :  { %vm125_vm0 = vcmask 1043458   ;;  %s165_s6 = smov 3  ;;  %vm130_vm1 = vcmask 1045508   ;;  %vm135_vm2 = vcmask 1047558   ;;  %s168_s9 = smov 12  ;;  %vm4_vm3 = vcmask 1047556   ;;  %s3058_s0 = inlined_call_operand.vmem [shape: f32[2,256,16,1], index: 0, kind: input, shape index: {}]   ;;  %s3059_s1 = inlined_call_operand.vmem [shape: f32[2,16,256], index: 1, kind: output, shape index: {}]  }
   0x1   :  { %v1454_v0 = vld [vmem:[%s3058_s0 + $0xf] ss:$16 sm:%s165_s6]   ;;  %s173_s10 = smov 48  ;;  %s178_s15 = smov 192  ;;  %vm6_vm4 = vcmask 130048   ;;  %vm139_vm5 = vcmask 1048448  }
   0x2   :  { %v1455_v1 = vld [vmem:[%s3058_s0 + $0xf] ss:$16 sm:%s168_s9]   ;;  %s120_s16 = smov 3  ;;  %s123_s21 = smov 12  ;;  %vm322_vm6 = vcmask 917248   ;;  %vm505_vm7 = vcmask 786048  }
   0x3   :  { %v1456_v2 = vld [vmem:[%s3058_s0 + $0xf] ss:$16 sm:%s173_s10]   ;;  %v171_v3 = vsel %vm125_vm0, %v1455_v1, %v1454_v0  ;;  %v1445_v5 = vld [vmem:[%s3058_s0 + $0x7] ss:$16 sm:%s120_s16]   ;;  %s128_s22 = smov 48  ;;  %s133_s27 = smov 192 }
   0x4   :  { %v1457_v4 = vld [vmem:[%s3058_s0 + $0xf] ss:$16 sm:%s178_s15]   ;;  %v176_v6 = vsel %vm130_vm1, %v1456_v2, %v171_v3  ;;  %v1446_v7 = vld [vmem:[%s3058_s0 + $0x7] ss:$16 sm:%s123_s21]   ;;  %s188_s28 = smov 3  ;;  %s191_s4 = smov 12 }
   0x5   :  { %v1447_v8 = vld [vmem:[%s3058_s0 + $0x7] ss:$16 sm:%s128_s22]   ;;  %v181_v9 = vsel %vm135_vm2, %v1457_v4, %v176_v6  ;;  %v126_v10 = vsel %vm125_vm0, %v1446_v7, %v1445_v5  ;;  %v1459_v12 = vld [vmem:[%s3058_s0 + $0x10f] ss:$16 sm:%s188_s28]   ;;  %s196_s5 = smov 48  ;;  %s1725_s6 = smov 112  }
   0x6   :  { %v1448_v11 = vld [vmem:[%s3058_s0 + $0x7] ss:$16 sm:%s133_s27]   ;;  %182 = vrot.lane.b32.xlu1 %v181_v9, %s1725_s6  ;;  %v131_v13 = vsel %vm130_vm1, %v1447_v8, %v126_v10  ;;  %s201_s9 = smov 192  ;;  %s142_s10 = smov 3  ;;  %vm688_vm8 = vcmask 654848   ;;  %vm871_vm9 = vcmask 523648  }
   0x7   :  { %v1460_v14 = vld [vmem:[%s3058_s0 + $0x10f] ss:$16 sm:%s191_s4]   ;;  %v136_v15 = vsel %vm135_vm2, %v1448_v11, %v131_v13  ;;  %s145_s15 = smov 12  ;;  %s150_s16 = smov 48  ;;  %v1449_v20 = vld [vmem:[%s3058_s0 + $0x107] ss:$16 sm:%s142_s10]  }
   0x8   :  { %v194_v16 = vsel %vm125_vm0, %v1460_v14, %v1459_v12  ;;  %v1461_v17 = vld [vmem:[%s3058_s0 + $0x10f] ss:$16 sm:%s196_s5]   ;;  %137 = vrot.lane.b32.xlu0 %v136_v15, %s1725_s6  ;;  %s155_s19 = smov 192  ;;  %s234_s20 = smov 3  ;;  %vm1054_vm10 = vcmask 392448   ;;  %vm1237_vm11 = vcmask 261248  }
   0x9   :  { %v1462_v18 = vld [vmem:[%s3058_s0 + $0x10f] ss:$16 sm:%s201_s9]   ;;  %v199_v19 = vsel %vm130_vm1, %v1461_v17, %v194_v16  ;;  %v1450_v22 = vld [vmem:[%s3058_s0 + $0x107] ss:$16 sm:%s145_s15]   ;;  %s237_s25 = smov 12  ;;  %s242_s26 = smov 48 }
   0xa   :  { %v204_v21 = vsel %vm135_vm2, %v1462_v18, %v199_v19  ;;  %v1451_v23 = vld [vmem:[%s3058_s0 + $0x107] ss:$16 sm:%s150_s16]   ;;  %v148_v24 = vsel %vm125_vm0, %v1450_v22, %v1449_v20  ;;  %s247_s29 = smov 192  ;;  %s211_s30 = smov 3 }
   0xb   :  { %205 = vrot.lane.b32.xlu1 %v204_v21, %s1725_s6  ;;  %v1452_v25 = vld [vmem:[%s3058_s0 + $0x107] ss:$16 sm:%s155_s19]   ;;  %v153_v26 = vsel %vm130_vm1, %v1451_v23, %v148_v24  ;;  %s214_s7 = smov 12  ;;  %s219_s8 = smov 48 }
   0xc   :  { %v1469_v27 = vld [vmem:[%s3058_s0 + $0x187] ss:$16 sm:%s234_s20]   ;;  %v158_v29 = vsel %vm135_vm2, %v1452_v25, %v153_v26  ;;  %s224_s13 = smov 192  ;;  %s280_s16 = smov 3 }
   0xd   :  { %v1470_v28 = vld [vmem:[%s3058_s0 + $0x187] ss:$16 sm:%s237_s25]   ;;  %159 = vrot.lane.b32.xlu0 %v158_v29, %s1725_s6  ;;  %s283_s17 = smov 12  ;;  %s288_s22 = smov 48 }
   0xe   :  { %v240_v30 = vsel %vm125_vm0, %v1470_v28, %v1469_v27  ;;  %v1471_v31 = vld [vmem:[%s3058_s0 + $0x187] ss:$16 sm:%s242_s26]   ;;  %s293_s23 = smov 192  ;;  %s257_s26 = smov 3  ;;  %v1479_v41 = vld [vmem:[%s3058_s0 + $0x18f] ss:$16 sm:%s280_s16]  }
   0xf   :  { %v1472_v32 = vld [vmem:[%s3058_s0 + $0x187] ss:$16 sm:%s247_s29]   ;;  %v245_v33 = vsel %vm130_vm1, %v1471_v31, %v240_v30  ;;  %v1480_v42 = vld [vmem:[%s3058_s0 + $0x18f] ss:$16 sm:%s283_s17]   ;;  %s260_s2 = smov 12  ;;  %s265_s3 = smov 48 }
  0x10   :  { %v1464_v34 = vld [vmem:[%s3058_s0 + $0x87] ss:$16 sm:%s211_s30]   ;;  %v250_v35 = vsel %vm135_vm2, %v1472_v32, %v245_v33  ;;  %v286_v44 = vsel %vm125_vm0, %v1480_v42, %v1479_v41  ;;  %v1481_v45 = vld [vmem:[%s3058_s0 + $0x18f] ss:$16 sm:%s288_s22]   ;;  %s270_s9 = smov 192  ;;  %s325_s12 = smov 3 }
  0x11   :  { %v1465_v36 = vld [vmem:[%s3058_s0 + $0x87] ss:$16 sm:%s214_s7]   ;;  %251 = vrot.lane.b32.xlu1 %v250_v35, %s1725_s6  ;;  %v291_v47 = vsel %vm130_vm1, %v1481_v45, %v286_v44  ;;  %s333_s18 = smov 48  ;;  %s338_s19 = smov 192 }
  0x12   :  { %v1466_v37 = vld [vmem:[%s3058_s0 + $0x87] ss:$16 sm:%s219_s8]   ;;  %v217_v38 = vsel %vm125_vm0, %v1465_v36, %v1464_v34  ;;  %v1482_v46 = vld [vmem:[%s3058_s0 + $0x18f] ss:$16 sm:%s293_s23]   ;;  %s303_s22 = smov 3  ;;  %s306_s27 = smov 12 }
  0x13   :  { %v1467_v39 = vld [vmem:[%s3058_s0 + $0x87] ss:$16 sm:%s224_s13]   ;;  %v222_v40 = vsel %vm130_vm1, %v1466_v37, %v217_v38  ;;  %v1474_v48 = vld [vmem:[%s3058_s0 + $0x8f] ss:$16 sm:%s257_s26]   ;;  %s328_s13 = smov 12  ;;  %v296_v49 = vsel %vm135_vm2, %v1482_v46, %v291_v47  ;;  %s311_s28 = smov 48 }
  0x14   :  { %v227_v43 = vsel %vm135_vm2, %v1467_v39, %v222_v40  ;;  %v1475_v50 = vld [vmem:[%s3058_s0 + $0x8f] ss:$16 sm:%s260_s2]   ;;  %v1488_v55 = vld [vmem:[%s3058_s0 + $0x106] ss:$16 sm:%s325_s12]   ;;  %s316_s4 = smov 192  ;;  %s371_s7 = smov 3 }
  0x15   :  { %228 = vrot.lane.b32.xlu0 %v227_v43, %s1725_s6  ;;  %v1476_v51 = vld [vmem:[%s3058_s0 + $0x8f] ss:$16 sm:%s265_s3]   ;;  %297 = vrot.lane.b32.xlu1 %v296_v49, %s1725_s6  ;;  %v263_v52 = vsel %vm125_vm0, %v1475_v50, %v1474_v48  ;;  %s374_s8 = smov 12  ;;  %s384_s14 = smov 192 }
  0x16   :  { %v1477_v53 = vld [vmem:[%s3058_s0 + $0x8f] ss:$16 sm:%s270_s9]   ;;  %v268_v54 = vsel %vm130_vm1, %v1476_v51, %v263_v52  ;;  %v1489_v56 = vld [vmem:[%s3058_s0 + $0x106] ss:$16 sm:%s328_s13]   ;;  %s379_s13 = smov 48  ;;  %s1726_s15 = smov 96  }
  0x17   :  { %v273_v57 = vsel %vm135_vm2, %v1477_v53, %v268_v54  ;;  %v331_v58 = vsel %vm125_vm0, %v1489_v56, %v1488_v55  ;;  %v1490_v59 = vld [vmem:[%s3058_s0 + $0x106] ss:$16 sm:%s333_s18]   ;;  %s348_s18 = smov 3  ;;  %v1498_v5 = vld [vmem:[%s3058_s0 + $0x10e] ss:$16 sm:%s371_s7]   ;;  %s351_s23 = smov 12 }
  0x18   :  { %v1491_v60 = vld [vmem:[%s3058_s0 + $0x106] ss:$16 sm:%s338_s19]   ;;  %v336_v61 = vsel %vm130_vm1, %v1490_v59, %v331_v58  ;;  %v1499_v6 = vld [vmem:[%s3058_s0 + $0x10e] ss:$16 sm:%s374_s8]   ;;  %s356_s24 = smov 48  ;;  %s361_s29 = smov 192 }
  0x19   :  { %274 = vrot.lane.b32.xlu0 %v273_v57, %s1725_s6  ;;  %v1484_v62 = vld [vmem:[%s3058_s0 + $0x6] ss:$16 sm:%s303_s22]   ;;  %v341_v63 = vsel %vm135_vm2, %v1491_v60, %v336_v61  ;;  %v377_v8 = vsel %vm125_vm0, %v1499_v6, %v1498_v5  ;;  %s417_s3 = smov 3  ;;  %s425_s9 = smov 48 }
  0x1a   :  { %v1485_v0 = vld [vmem:[%s3058_s0 + $0x6] ss:$16 sm:%s306_s27]   ;;  %342 = vrot.lane.b32.xlu1 %v341_v63, %s1726_s15  ;;  %s430_s10 = smov 192  ;;  %s397_s19 = smov 12 }
  0x1b   :  { %v1486_v1 = vld [vmem:[%s3058_s0 + $0x6] ss:$16 sm:%s311_s28]   ;;  %v309_v2 = vsel %vm125_vm0, %v1485_v0, %v1484_v62  ;;  %v1500_v9 = vld [vmem:[%s3058_s0 + $0x10e] ss:$16 sm:%s379_s13]   ;;  %s394_s13 = smov 3  ;;  %s402_s20 = smov 48 }
  0x1c   :  { %v1487_v3 = vld [vmem:[%s3058_s0 + $0x6] ss:$16 sm:%s316_s4]   ;;  %v314_v4 = vsel %vm130_vm1, %v1486_v1, %v309_v2  ;;  %v1501_v10 = vld [vmem:[%s3058_s0 + $0x10e] ss:$16 sm:%s384_s14]   ;;  %v382_v11 = vsel %vm130_vm1, %v1500_v9, %v377_v8  ;;  %s420_s4 = smov 12  ;;  %s407_s25 = smov 192 }
  0x1d   :  { %v319_v7 = vsel %vm135_vm2, %v1487_v3, %v314_v4  ;;  %v1493_v12 = vld [vmem:[%s3058_s0 + $0xe] ss:$16 sm:%s348_s18]   ;;  %v387_v13 = vsel %vm135_vm2, %v1501_v10, %v382_v11  ;;  %v1508_v19 = vld [vmem:[%s3058_s0 + $0x186] ss:$16 sm:%s417_s3]   ;;  %s463_s28 = smov 3  ;;  %s471_s6 = smov 48 }
  0x1e   :  { %320 = vrot.lane.b32.xlu0 %v319_v7, %s1726_s15  ;;  %v1494_v14 = vld [vmem:[%s3058_s0 + $0xe] ss:$16 sm:%s351_s23]   ;;  %388 = vrot.lane.b32.xlu1 %v387_v13, %s1726_s15  ;;  %s476_s5 = smov 192  ;;  %s443_s14 = smov 12 }
  0x1f   :  { %v1495_v15 = vld [vmem:[%s3058_s0 + $0xe] ss:$16 sm:%s356_s24]   ;;  %v354_v16 = vsel %vm125_vm0, %v1494_v14, %v1493_v12  ;;  %v1509_v20 = vld [vmem:[%s3058_s0 + $0x186] ss:$16 sm:%s420_s4]   ;;  %s448_s16 = smov 48  ;;  %s453_s21 = smov 192 }
  0x20   :  { %v1496_v17 = vld [vmem:[%s3058_s0 + $0xe] ss:$16 sm:%s361_s29]   ;;  %v359_v18 = vsel %vm130_vm1, %v1495_v15, %v354_v16  ;;  %v423_v22 = vsel %vm125_vm0, %v1509_v20, %v1508_v19  ;;  %v1510_v23 = vld [vmem:[%s3058_s0 + $0x186] ss:$16 sm:%s425_s9]   ;;  %s466_s29 = smov 12  ;;  %s440_s9 = smov 3 }
  0x21   :  { %v364_v21 = vsel %vm135_vm2, %v1496_v17, %v359_v18  ;;  %v1511_v24 = vld [vmem:[%s3058_s0 + $0x186] ss:$16 sm:%s430_s10]   ;;  %v428_v25 = vsel %vm130_vm1, %v1510_v23, %v423_v22  ;;  %v1518_v33 = vld [vmem:[%s3058_s0 + $0x18e] ss:$16 sm:%s463_s28]   ;;  %s508_s24 = smov 3  ;;  %s516_s30 = smov 48 }
  0x22   :  { %365 = vrot.lane.b32.xlu0 %v364_v21, %s1726_s15  ;;  %v1503_v26 = vld [vmem:[%s3058_s0 + $0x86] ss:$16 sm:%s394_s13]   ;;  %v433_v27 = vsel %vm135_vm2, %v1511_v24, %v428_v25  ;;  %s521_s2 = smov 192  ;;  %s489_s10 = smov 12 }
  0x23   :  { %v1504_v28 = vld [vmem:[%s3058_s0 + $0x86] ss:$16 sm:%s397_s19]   ;;  %434 = vrot.lane.b32.xlu1 %v433_v27, %s1726_s15  ;;  %s494_s11 = smov 48  ;;  %s499_s17 = smov 192 }
  0x24   :  { %v1505_v29 = vld [vmem:[%s3058_s0 + $0x86] ss:$16 sm:%s402_s20]   ;;  %v400_v30 = vsel %vm125_vm0, %v1504_v28, %v1503_v26  ;;  %v1519_v34 = vld [vmem:[%s3058_s0 + $0x18e] ss:$16 sm:%s466_s29]   ;;  %s554_s19 = smov 3  ;;  %s557_s20 = smov 12 }
  0x25   :  { %v1506_v31 = vld [vmem:[%s3058_s0 + $0x86] ss:$16 sm:%s407_s25]   ;;  %v405_v32 = vsel %vm130_vm1, %v1505_v29, %v400_v30  ;;  %v469_v36 = vsel %vm125_vm0, %v1519_v34, %v1518_v33  ;;  %v1520_v37 = vld [vmem:[%s3058_s0 + $0x18e] ss:$16 sm:%s471_s6]   ;;  %s511_s25 = smov 12  ;;  %s486_s6 = smov 3 }
  0x26   :  { %v410_v35 = vsel %vm135_vm2, %v1506_v31, %v405_v32  ;;  %v1521_v38 = vld [vmem:[%s3058_s0 + $0x18e] ss:$16 sm:%s476_s5]   ;;  %v474_v39 = vsel %vm130_vm1, %v1520_v37, %v469_v36  ;;  %v1527_v47 = vld [vmem:[%s3058_s0 + $0x105] ss:$16 sm:%s508_s24]   ;;  %s567_s26 = smov 192  ;;  %s1727_s27 = smov 80  }
  0x27   :  { %411 = vrot.lane.b32.xlu0 %v410_v35, %s1726_s15  ;;  %v1513_v40 = vld [vmem:[%s3058_s0 + $0x8e] ss:$16 sm:%s440_s9]   ;;  %v479_v41 = vsel %vm135_vm2, %v1521_v38, %v474_v39  ;;  %s534_s5 = smov 12  ;;  %s539_s7 = smov 48 }
  0x28   :  { %v1514_v42 = vld [vmem:[%s3058_s0 + $0x8e] ss:$16 sm:%s443_s14]   ;;  %480 = vrot.lane.b32.xlu1 %v479_v41, %s1726_s15  ;;  %s544_s12 = smov 192  ;;  %s613_s22 = smov 192 }
  0x29   :  { %v1515_v43 = vld [vmem:[%s3058_s0 + $0x8e] ss:$16 sm:%s448_s16]   ;;  %v446_v44 = vsel %vm125_vm0, %v1514_v42, %v1513_v40  ;;  %v1528_v48 = vld [vmem:[%s3058_s0 + $0x105] ss:$16 sm:%s511_s25]   ;;  %s562_s25 = smov 48  ;;  %s600_s16 = smov 3 }
  0x2a   :  { %v1516_v45 = vld [vmem:[%s3058_s0 + $0x8e] ss:$16 sm:%s453_s21]   ;;  %v451_v46 = vsel %vm130_vm1, %v1515_v43, %v446_v44  ;;  %v514_v50 = vsel %vm125_vm0, %v1528_v48, %v1527_v47  ;;  %v1529_v51 = vld [vmem:[%s3058_s0 + $0x105] ss:$16 sm:%s516_s30]   ;;  %s531_s30 = smov 3  ;;  %s608_s21 = smov 48 }
  0x2b   :  { %v456_v49 = vsel %vm135_vm2, %v1516_v45, %v451_v46  ;;  %v1530_v52 = vld [vmem:[%s3058_s0 + $0x105] ss:$16 sm:%s521_s2]   ;;  %v519_v53 = vsel %vm130_vm1, %v1529_v51, %v514_v50  ;;  %v1537_v61 = vld [vmem:[%s3058_s0 + $0x10d] ss:$16 sm:%s554_s19]   ;;  %s580_s2 = smov 12  ;;  %s585_s3 = smov 48 }
  0x2c   :  { %457 = vrot.lane.b32.xlu0 %v456_v49, %s1726_s15  ;;  %v1523_v54 = vld [vmem:[%s3058_s0 + $0x5] ss:$16 sm:%s486_s6]   ;;  %v524_v55 = vsel %vm135_vm2, %v1530_v52, %v519_v53  ;;  %s590_s8 = smov 192  ;;  %s654_s15 = smov 48 }
  0x2d   :  { %v1524_v56 = vld [vmem:[%s3058_s0 + $0x5] ss:$16 sm:%s489_s10]   ;;  %525 = vrot.lane.b32.xlu1 %v524_v55, %s1727_s27  ;;  %s659_s18 = smov 192  ;;  %s631_s28 = smov 48 }
  0x2e   :  { %v1525_v57 = vld [vmem:[%s3058_s0 + $0x5] ss:$16 sm:%s494_s11]   ;;  %v492_v58 = vsel %vm125_vm0, %v1524_v56, %v1523_v54  ;;  %v1538_v62 = vld [vmem:[%s3058_s0 + $0x10d] ss:$16 sm:%s557_s20]   ;;  %s646_s11 = smov 3  ;;  %s636_s4 = smov 192 }
  0x2f   :  { %v1526_v59 = vld [vmem:[%s3058_s0 + $0x5] ss:$16 sm:%s499_s17]   ;;  %v497_v60 = vsel %vm130_vm1, %v1525_v57, %v492_v58  ;;  %v560_v0 = vsel %vm125_vm0, %v1538_v62, %v1537_v61  ;;  %v1539_v1 = vld [vmem:[%s3058_s0 + $0x10d] ss:$16 sm:%s562_s25]   ;;  %s603_s17 = smov 12  ;;  %s577_s25 = smov 3 }
  0x30   :  { %v502_v63 = vsel %vm135_vm2, %v1526_v59, %v497_v60  ;;  %v1540_v2 = vld [vmem:[%s3058_s0 + $0x10d] ss:$16 sm:%s567_s26]   ;;  %v565_v3 = vsel %vm130_vm1, %v1539_v1, %v560_v0  ;;  %v1547_v11 = vld [vmem:[%s3058_s0 + $0x185] ss:$16 sm:%s600_s16]   ;;  %s626_s26 = smov 12  ;;  %s699_s13 = smov 48 }
  0x31   :  { %503 = vrot.lane.b32.xlu0 %v502_v63, %s1727_s27  ;;  %v1532_v4 = vld [vmem:[%s3058_s0 + $0xd] ss:$16 sm:%s531_s30]   ;;  %v570_v5 = vsel %vm135_vm2, %v1540_v2, %v565_v3  ;;  %s704_s14 = smov 192  ;;  %s677_s23 = smov 48 }
  0x32   :  { %v1533_v6 = vld [vmem:[%s3058_s0 + $0xd] ss:$16 sm:%s534_s5]   ;;  %571 = vrot.lane.b32.xlu1 %v570_v5, %s1727_s27  ;;  %s682_s29 = smov 192  ;;  %s750_s9 = smov 192 }
  0x33   :  { %v1534_v7 = vld [vmem:[%s3058_s0 + $0xd] ss:$16 sm:%s539_s7]   ;;  %v537_v8 = vsel %vm125_vm0, %v1533_v6, %v1532_v4  ;;  %v1548_v12 = vld [vmem:[%s3058_s0 + $0x185] ss:$16 sm:%s603_s17]   ;;  %s691_s7 = smov 3  ;;  %s1728_s10 = smov 64  }
  0x34   :  { %v1535_v9 = vld [vmem:[%s3058_s0 + $0xd] ss:$16 sm:%s544_s12]   ;;  %v542_v10 = vsel %vm130_vm1, %v1534_v7, %v537_v8  ;;  %v606_v14 = vsel %vm125_vm0, %v1548_v12, %v1547_v11  ;;  %v1549_v15 = vld [vmem:[%s3058_s0 + $0x185] ss:$16 sm:%s608_s21]   ;;  %s649_s12 = smov 12  ;;  %s623_s21 = smov 3 }
  0x35   :  { %v547_v13 = vsel %vm135_vm2, %v1535_v9, %v542_v10  ;;  %v1550_v16 = vld [vmem:[%s3058_s0 + $0x185] ss:$16 sm:%s613_s22]   ;;  %v611_v17 = vsel %vm130_vm1, %v1549_v15, %v606_v14  ;;  %v1557_v25 = vld [vmem:[%s3058_s0 + $0x18d] ss:$16 sm:%s646_s11]   ;;  %s672_s22 = smov 12  ;;  %s722_s19 = smov 48 }
  0x36   :  { %548 = vrot.lane.b32.xlu0 %v547_v13, %s1727_s27  ;;  %v1542_v18 = vld [vmem:[%s3058_s0 + $0x85] ss:$16 sm:%s577_s25]   ;;  %v616_v19 = vsel %vm135_vm2, %v1550_v16, %v611_v17  ;;  %s727_s24 = smov 192  ;;  %s796_s6 = smov 192 }
  0x37   :  { %v1543_v20 = vld [vmem:[%s3058_s0 + $0x85] ss:$16 sm:%s580_s2]   ;;  %617 = vrot.lane.b32.xlu1 %v616_v19, %s1727_s27  ;;  %s737_s2 = smov 3  ;;  %s768_s16 = smov 48 }
  0x38   :  { %v1544_v21 = vld [vmem:[%s3058_s0 + $0x85] ss:$16 sm:%s585_s3]   ;;  %v583_v22 = vsel %vm125_vm0, %v1543_v20, %v1542_v18  ;;  %v1558_v26 = vld [vmem:[%s3058_s0 + $0x18d] ss:$16 sm:%s649_s12]   ;;  %s740_s3 = smov 12  ;;  %s773_s20 = smov 192 }
  0x39   :  { %v1545_v23 = vld [vmem:[%s3058_s0 + $0x85] ss:$16 sm:%s590_s8]   ;;  %v588_v24 = vsel %vm130_vm1, %v1544_v21, %v583_v22  ;;  %v652_v28 = vsel %vm125_vm0, %v1558_v26, %v1557_v25  ;;  %v1559_v29 = vld [vmem:[%s3058_s0 + $0x18d] ss:$16 sm:%s654_s15]   ;;  %s694_s8 = smov 12  ;;  %s669_s15 = smov 3 }
  0x3a   :  { %v593_v27 = vsel %vm135_vm2, %v1545_v23, %v588_v24  ;;  %v1560_v30 = vld [vmem:[%s3058_s0 + $0x18d] ss:$16 sm:%s659_s18]   ;;  %v657_v31 = vsel %vm130_vm1, %v1559_v29, %v652_v28  ;;  %v1566_v39 = vld [vmem:[%s3058_s0 + $0x104] ss:$16 sm:%s691_s7]   ;;  %s717_s18 = smov 12  ;;  %s842_s30 = smov 192 }
  0x3b   :  { %594 = vrot.lane.b32.xlu0 %v593_v27, %s1727_s27  ;;  %v1552_v32 = vld [vmem:[%s3058_s0 + $0x8d] ss:$16 sm:%s623_s21]   ;;  %v662_v33 = vsel %vm135_vm2, %v1560_v30, %v657_v31  ;;  %s814_s11 = smov 48  ;;  %s819_s17 = smov 192 }
  0x3c   :  { %v1553_v34 = vld [vmem:[%s3058_s0 + $0x8d] ss:$16 sm:%s626_s26]   ;;  %663 = vrot.lane.b32.xlu1 %v662_v33, %s1727_s27  ;;  %s882_s25 = smov 48  ;;  %s887_s26 = smov 192 }
  0x3d   :  { %v1554_v35 = vld [vmem:[%s3058_s0 + $0x8d] ss:$16 sm:%s631_s28]   ;;  %v629_v36 = vsel %vm125_vm0, %v1553_v34, %v1552_v32  ;;  %v1567_v40 = vld [vmem:[%s3058_s0 + $0x104] ss:$16 sm:%s694_s8]   ;;  %s745_s8 = smov 48  ;;  %s783_s28 = smov 3 }
  0x3e   :  { %v1555_v37 = vld [vmem:[%s3058_s0 + $0x8d] ss:$16 sm:%s636_s4]   ;;  %v634_v38 = vsel %vm130_vm1, %v1554_v35, %v629_v36  ;;  %v697_v42 = vsel %vm125_vm0, %v1567_v40, %v1566_v39  ;;  %v1568_v43 = vld [vmem:[%s3058_s0 + $0x104] ss:$16 sm:%s699_s13]   ;;  %s714_s13 = smov 3  ;;  %s791_s4 = smov 48 }
  0x3f   :  { %v639_v41 = vsel %vm135_vm2, %v1555_v37, %v634_v38  ;;  %v1569_v44 = vld [vmem:[%s3058_s0 + $0x104] ss:$16 sm:%s704_s14]   ;;  %v702_v45 = vsel %vm130_vm1, %v1568_v43, %v697_v42  ;;  %v1576_v53 = vld [vmem:[%s3058_s0 + $0x10c] ss:$16 sm:%s737_s2]   ;;  %s763_s14 = smov 12  ;;  %s860_s5 = smov 48 }
  0x40   :  { %640 = vrot.lane.b32.xlu0 %v639_v41, %s1727_s27  ;;  %v1562_v46 = vld [vmem:[%s3058_s0 + $0x4] ss:$16 sm:%s669_s15]   ;;  %v707_v47 = vsel %vm135_vm2, %v1569_v44, %v702_v45  ;;  %s837_s27 = smov 48  ;;  %s865_s12 = smov 192 }
  0x41   :  { %v1563_v48 = vld [vmem:[%s3058_s0 + $0x4] ss:$16 sm:%s672_s22]   ;;  %708 = vrot.lane.b32.xlu1 %v707_v47, %s1728_s10  ;;  %s933_s21 = smov 192  ;;  %s1729_s22 = smov 48  }
  0x42   :  { %v1564_v49 = vld [vmem:[%s3058_s0 + $0x4] ss:$16 sm:%s677_s23]   ;;  %v675_v50 = vsel %vm125_vm0, %v1563_v48, %v1562_v46  ;;  %v1577_v54 = vld [vmem:[%s3058_s0 + $0x10c] ss:$16 sm:%s740_s3]   ;;  %s829_s23 = smov 3  ;;  %s905_s2 = smov 48 }
  0x43   :  { %v1565_v51 = vld [vmem:[%s3058_s0 + $0x4] ss:$16 sm:%s682_s29]   ;;  %v680_v52 = vsel %vm130_vm1, %v1564_v49, %v675_v50  ;;  %v743_v56 = vsel %vm125_vm0, %v1577_v54, %v1576_v53  ;;  %v1578_v57 = vld [vmem:[%s3058_s0 + $0x10c] ss:$16 sm:%s745_s8]   ;;  %s786_s29 = smov 12  ;;  %s760_s8 = smov 3 }
  0x44   :  { %v685_v55 = vsel %vm135_vm2, %v1565_v51, %v680_v52  ;;  %v1579_v58 = vld [vmem:[%s3058_s0 + $0x10c] ss:$16 sm:%s750_s9]   ;;  %v748_v59 = vsel %vm130_vm1, %v1578_v57, %v743_v56  ;;  %v1586_v3 = vld [vmem:[%s3058_s0 + $0x184] ss:$16 sm:%s783_s28]   ;;  %s809_s9 = smov 12  ;;  %s910_s7 = smov 192 }
  0x45   :  { %686 = vrot.lane.b32.xlu0 %v685_v55, %s1728_s10  ;;  %v1571_v60 = vld [vmem:[%s3058_s0 + $0xc] ss:$16 sm:%s714_s13]   ;;  %v753_v61 = vsel %vm135_vm2, %v1579_v58, %v748_v59  ;;  %s979_s15 = smov 192  ;;  %s951_s28 = smov 48 }
  0x46   :  { %v1572_v62 = vld [vmem:[%s3058_s0 + $0xc] ss:$16 sm:%s717_s18]   ;;  %754 = vrot.lane.b32.xlu1 %v753_v61, %s1728_s10  ;;  %s956_s3 = smov 192  ;;  %s1025_s13 = smov 192 }
  0x47   :  { %v1573_v63 = vld [vmem:[%s3058_s0 + $0xc] ss:$16 sm:%s722_s19]   ;;  %v720_v0 = vsel %vm125_vm0, %v1572_v62, %v1571_v60  ;;  %v1587_v4 = vld [vmem:[%s3058_s0 + $0x184] ss:$16 sm:%s786_s29]   ;;  %s874_s19 = smov 3  ;;  %s1002_s29 = smov 192 }
  0x48   :  { %v1574_v1 = vld [vmem:[%s3058_s0 + $0xc] ss:$16 sm:%s727_s24]   ;;  %v725_v2 = vsel %vm130_vm1, %v1573_v63, %v720_v0  ;;  %v789_v6 = vsel %vm125_vm0, %v1587_v4, %v1586_v3  ;;  %v1588_v7 = vld [vmem:[%s3058_s0 + $0x184] ss:$16 sm:%s791_s4]   ;;  %s832_s24 = smov 12  ;;  %s806_s4 = smov 3 }
  0x49   :  { %v730_v5 = vsel %vm135_vm2, %v1574_v1, %v725_v2  ;;  %v1589_v8 = vld [vmem:[%s3058_s0 + $0x184] ss:$16 sm:%s796_s6]   ;;  %v794_v9 = vsel %vm130_vm1, %v1588_v7, %v789_v6  ;;  %v1596_v17 = vld [vmem:[%s3058_s0 + $0x18c] ss:$16 sm:%s829_s23]   ;;  %s855_s6 = smov 12  ;;  %s997_s23 = smov 48 }
  0x4a   :  { %731 = vrot.lane.b32.xlu0 %v730_v5, %s1728_s10  ;;  %v1581_v10 = vld [vmem:[%s3058_s0 + $0x84] ss:$16 sm:%s760_s8]   ;;  %v799_v11 = vsel %vm135_vm2, %v1589_v8, %v794_v9  ;;  %s1065_s8 = smov 48  ;;  %s1043_s18 = smov 48 }
  0x4b   :  { %v1582_v12 = vld [vmem:[%s3058_s0 + $0x84] ss:$16 sm:%s763_s14]   ;;  %800 = vrot.lane.b32.xlu1 %v799_v11, %s1728_s10  ;;  %s920_s14 = smov 3 }
  0x4c   :  { %v1583_v13 = vld [vmem:[%s3058_s0 + $0x84] ss:$16 sm:%s768_s16]   ;;  %v766_v14 = vsel %vm125_vm0, %v1582_v12, %v1581_v10  ;;  %v1597_v18 = vld [vmem:[%s3058_s0 + $0x18c] ss:$16 sm:%s832_s24]   ;;  %s923_s16 = smov 12  ;;  %s1048_s24 = smov 192 }
  0x4d   :  { %v1584_v15 = vld [vmem:[%s3058_s0 + $0x84] ss:$16 sm:%s773_s20]   ;;  %v771_v16 = vsel %vm130_vm1, %v1583_v13, %v766_v14  ;;  %v835_v20 = vsel %vm125_vm0, %v1597_v18, %v1596_v17  ;;  %v1598_v21 = vld [vmem:[%s3058_s0 + $0x18c] ss:$16 sm:%s837_s27]   ;;  %s877_s20 = smov 12  ;;  %s852_s27 = smov 3 }
  0x4e   :  { %v776_v19 = vsel %vm135_vm2, %v1584_v15, %v771_v16  ;;  %v1599_v22 = vld [vmem:[%s3058_s0 + $0x18c] ss:$16 sm:%s842_s30]   ;;  %v840_v23 = vsel %vm130_vm1, %v1598_v21, %v835_v20  ;;  %v1605_v31 = vld [vmem:[%s3058_s0 + $0x103] ss:$16 sm:%s874_s19]   ;;  %s900_s30 = smov 12  ;;  %s1093_s19 = smov 192 }
  0x4f   :  { %777 = vrot.lane.b32.xlu0 %v776_v19, %s1728_s10  ;;  %v1591_v24 = vld [vmem:[%s3058_s0 + $0x8c] ss:$16 sm:%s806_s4]   ;;  %v845_v25 = vsel %vm135_vm2, %v1599_v22, %v840_v23  ;;  %s1116_s4 = smov 192 }
  0x50   :  { %v1592_v26 = vld [vmem:[%s3058_s0 + $0x8c] ss:$16 sm:%s809_s9]   ;;  %846 = vrot.lane.b32.xlu1 %v845_v25, %s1728_s10  ;;  %s1070_s9 = smov 192 }
  0x51   :  { %v1593_v27 = vld [vmem:[%s3058_s0 + $0x8c] ss:$16 sm:%s814_s11]   ;;  %v812_v28 = vsel %vm125_vm0, %v1592_v26, %v1591_v24  ;;  %v1606_v32 = vld [vmem:[%s3058_s0 + $0x103] ss:$16 sm:%s877_s20]   ;;  %s928_s20 = smov 48  ;;  %s966_s11 = smov 3 }
  0x52   :  { %v1594_v29 = vld [vmem:[%s3058_s0 + $0x8c] ss:$16 sm:%s819_s17]   ;;  %v817_v30 = vsel %vm130_vm1, %v1593_v27, %v812_v28  ;;  %v880_v34 = vsel %vm125_vm0, %v1606_v32, %v1605_v31  ;;  %v1607_v35 = vld [vmem:[%s3058_s0 + $0x103] ss:$16 sm:%s882_s25]   ;;  %s897_s25 = smov 3  ;;  %s974_s17 = smov 48 }
  0x53   :  { %v822_v33 = vsel %vm135_vm2, %v1594_v29, %v817_v30  ;;  %v1608_v36 = vld [vmem:[%s3058_s0 + $0x103] ss:$16 sm:%s887_s26]   ;;  %v885_v37 = vsel %vm130_vm1, %v1607_v35, %v880_v34  ;;  %v1615_v45 = vld [vmem:[%s3058_s0 + $0x10b] ss:$16 sm:%s920_s14]   ;;  %s946_s26 = smov 12  ;;  %s1088_s14 = smov 48 }
  0x54   :  { %823 = vrot.lane.b32.xlu0 %v822_v33, %s1728_s10  ;;  %v1601_v38 = vld [vmem:[%s3058_s0 + $0x3] ss:$16 sm:%s852_s27]   ;;  %v890_v39 = vsel %vm135_vm2, %v1608_v36, %v885_v37  ;;  %s1020_s10 = smov 48  ;;  %s1162_s27 = smov 192 }
  0x55   :  { %v1602_v40 = vld [vmem:[%s3058_s0 + $0x3] ss:$16 sm:%s855_s6]   ;;  %891 = vrot.lane.b32.xlu1 %v890_v39, %s1729_s22  ;;  %s1730_s6 = smov 32  }
  0x56   :  { %v1603_v41 = vld [vmem:[%s3058_s0 + $0x3] ss:$16 sm:%s860_s5]   ;;  %v858_v42 = vsel %vm125_vm0, %v1602_v40, %v1601_v38  ;;  %v1616_v46 = vld [vmem:[%s3058_s0 + $0x10b] ss:$16 sm:%s923_s16]   ;;  %s1012_s5 = smov 3  ;;  %s1139_s16 = smov 192 }
  0x57   :  { %v1604_v43 = vld [vmem:[%s3058_s0 + $0x3] ss:$16 sm:%s865_s12]   ;;  %v863_v44 = vsel %vm130_vm1, %v1603_v41, %v858_v42  ;;  %v926_v48 = vsel %vm125_vm0, %v1616_v46, %v1615_v45  ;;  %v1617_v49 = vld [vmem:[%s3058_s0 + $0x10b] ss:$16 sm:%s928_s20]   ;;  %s969_s12 = smov 12  ;;  %s943_s20 = smov 3 }
  0x58   :  { %v868_v47 = vsel %vm135_vm2, %v1604_v43, %v863_v44  ;;  %v1618_v50 = vld [vmem:[%s3058_s0 + $0x10b] ss:$16 sm:%s933_s21]   ;;  %v931_v51 = vsel %vm130_vm1, %v1617_v49, %v926_v48  ;;  %v1625_v59 = vld [vmem:[%s3058_s0 + $0x183] ss:$16 sm:%s966_s11]   ;;  %s992_s21 = smov 12  ;;  %s1134_s11 = smov 48 }
  0x59   :  { %869 = vrot.lane.b32.xlu0 %v868_v47, %s1729_s22  ;;  %v1610_v52 = vld [vmem:[%s3058_s0 + $0xb] ss:$16 sm:%s897_s25]   ;;  %v936_v53 = vsel %vm135_vm2, %v1618_v50, %v931_v51  ;;  %s1208_s25 = smov 192 }
  0x5a   :  { %v1611_v54 = vld [vmem:[%s3058_s0 + $0xb] ss:$16 sm:%s900_s30]   ;;  %937 = vrot.lane.b32.xlu1 %v936_v53, %s1729_s22  ;;  %s1276_s30 = smov 192 }
  0x5b   :  { %v1612_v55 = vld [vmem:[%s3058_s0 + $0xb] ss:$16 sm:%s905_s2]   ;;  %v903_v56 = vsel %vm125_vm0, %v1611_v54, %v1610_v52  ;;  %v1626_v60 = vld [vmem:[%s3058_s0 + $0x183] ss:$16 sm:%s969_s12]   ;;  %s1057_s2 = smov 3 }
  0x5c   :  { %v1613_v57 = vld [vmem:[%s3058_s0 + $0xb] ss:$16 sm:%s910_s7]   ;;  %v908_v58 = vsel %vm130_vm1, %v1612_v55, %v903_v56  ;;  %v972_v62 = vsel %vm125_vm0, %v1626_v60, %v1625_v59  ;;  %v1627_v63 = vld [vmem:[%s3058_s0 + $0x183] ss:$16 sm:%s974_s17]   ;;  %s1015_s7 = smov 12  ;;  %s989_s17 = smov 3 }
  0x5d   :  { %v913_v61 = vsel %vm135_vm2, %v1613_v57, %v908_v58  ;;  %v1628_v0 = vld [vmem:[%s3058_s0 + $0x183] ss:$16 sm:%s979_s15]   ;;  %v977_v1 = vsel %vm130_vm1, %v1627_v63, %v972_v62  ;;  %v1635_v9 = vld [vmem:[%s3058_s0 + $0x18b] ss:$16 sm:%s1012_s5]   ;;  %s1038_s15 = smov 12 }
  0x5e   :  { %914 = vrot.lane.b32.xlu0 %v913_v61, %s1729_s22  ;;  %v1620_v2 = vld [vmem:[%s3058_s0 + $0x83] ss:$16 sm:%s943_s20]   ;;  %v982_v3 = vsel %vm135_vm2, %v1628_v0, %v977_v1  ;;  %s1203_s20 = smov 48  ;;  %v1421_v0 = vld [vmem:[%s3058_s0 + $0x100] ss:$8 sm:$0xf]  }
  0x5f   :  { %v1621_v4 = vld [vmem:[%s3058_s0 + $0x83] ss:$16 sm:%s946_s26]   ;;  %983 = vrot.lane.b32.xlu1 %v982_v3, %s1729_s22  ;;  %s1103_s26 = smov 3 }
  0x60   :  { %v1622_v5 = vld [vmem:[%s3058_s0 + $0x83] ss:$16 sm:%s951_s28]   ;;  %v949_v6 = vsel %vm125_vm0, %v1621_v4, %v1620_v2  ;;  %v1636_v10 = vld [vmem:[%s3058_s0 + $0x18b] ss:$16 sm:%s1015_s7]   ;;  %s1106_s28 = smov 12  ;;  %s1335_s7 = smov 12 }
  0x61   :  { %v1623_v7 = vld [vmem:[%s3058_s0 + $0x83] ss:$16 sm:%s956_s3]   ;;  %v954_v8 = vsel %vm130_vm1, %v1622_v5, %v949_v6  ;;  %v1018_v12 = vsel %vm125_vm0, %v1636_v10, %v1635_v9  ;;  %v1637_v13 = vld [vmem:[%s3058_s0 + $0x18b] ss:$16 sm:%s1020_s10]   ;;  %s1060_s3 = smov 12  ;;  %s1035_s10 = smov 3 }
  0x62   :  { %v959_v11 = vsel %vm135_vm2, %v1623_v7, %v954_v8  ;;  %v1638_v14 = vld [vmem:[%s3058_s0 + $0x18b] ss:$16 sm:%s1025_s13]   ;;  %v1023_v15 = vsel %vm130_vm1, %v1637_v13, %v1018_v12  ;;  %v1644_v23 = vld [vmem:[%s3058_s0 + $0x102] ss:$16 sm:%s1057_s2]   ;;  %s1083_s13 = smov 12  ;;  %s1294_s2 = smov 48 }
  0x63   :  { %960 = vrot.lane.b32.xlu0 %v959_v11, %s1729_s22  ;;  %v1630_v16 = vld [vmem:[%s3058_s0 + $0x8b] ss:$16 sm:%s989_s17]   ;;  %v1028_v17 = vsel %vm135_vm2, %v1638_v14, %v1023_v15  ;;  %s1195_s17 = smov 3  ;;  %v1422_v10 = vld [vmem:[%s3058_s0 + $0x100] ss:$8 sm:$0xf0]  }
  0x64   :  { %v1631_v18 = vld [vmem:[%s3058_s0 + $0x8b] ss:$16 sm:%s992_s21]   ;;  %1029 = vrot.lane.b32.xlu1 %v1028_v17, %s1729_s22  ;;  %v64_v14 = vsel %vm4_vm3, %v1422_v10, %v1421_v0  ;;  %s1231_s21 = smov 192 }
  0x65   :  { %v1632_v19 = vld [vmem:[%s3058_s0 + $0x8b] ss:$16 sm:%s997_s23]   ;;  %v995_v20 = vsel %vm125_vm0, %v1631_v18, %v1630_v16  ;;  %v1645_v24 = vld [vmem:[%s3058_s0 + $0x102] ss:$16 sm:%s1060_s3]   ;;  %s1111_s3 = smov 48  ;;  %s1149_s23 = smov 3 }
  0x66   :  { %v1633_v21 = vld [vmem:[%s3058_s0 + $0x8b] ss:$16 sm:%s1002_s29]   ;;  %v1000_v22 = vsel %vm130_vm1, %v1632_v19, %v995_v20  ;;  %v1063_v26 = vsel %vm125_vm0, %v1645_v24, %v1644_v23  ;;  %v1646_v27 = vld [vmem:[%s3058_s0 + $0x102] ss:$16 sm:%s1065_s8]   ;;  %s1080_s8 = smov 3  ;;  %s1157_s29 = smov 48 }
  0x67   :  { %v1005_v25 = vsel %vm135_vm2, %v1633_v21, %v1000_v22  ;;  %v1647_v28 = vld [vmem:[%s3058_s0 + $0x102] ss:$16 sm:%s1070_s9]   ;;  %v1068_v29 = vsel %vm130_vm1, %v1646_v27, %v1063_v26  ;;  %v1654_v37 = vld [vmem:[%s3058_s0 + $0x10a] ss:$16 sm:%s1103_s26]   ;;  %s1129_s9 = smov 12  ;;  %s1172_s26 = smov 3 }
  0x68   :  { %1006 = vrot.lane.b32.xlu0 %v1005_v25, %s1729_s22  ;;  %v1640_v30 = vld [vmem:[%s3058_s0 + $0x2] ss:$16 sm:%s1035_s10]   ;;  %v1073_v31 = vsel %vm135_vm2, %v1647_v28, %v1068_v29  ;;  %s1248_s22 = smov 48  ;;  %1423 = vst.msk [vmem:[%s3059_s1 + $0x20] ss:$8 sm:$0x3] %vm6_vm4, %v64_v14  }
  0x69   :  { %v1641_v32 = vld [vmem:[%s3058_s0 + $0x2] ss:$16 sm:%s1038_s15]   ;;  %1074 = vrot.lane.b32.xlu1 %v1073_v31, %s1730_s6  ;;  %s1243_s15 = smov 12  ;;  %1424 = vst.msk [vmem:[%s3059_s1 + $0x11] ss:$8 sm:$0xc] %vm6_vm4, %v64_v14  }
  0x6a   :  { %v1642_v33 = vld [vmem:[%s3058_s0 + $0x2] ss:$16 sm:%s1043_s18]   ;;  %v1041_v34 = vsel %vm125_vm0, %v1641_v32, %v1640_v30  ;;  %v1655_v38 = vld [vmem:[%s3058_s0 + $0x10a] ss:$16 sm:%s1106_s28]   ;;  %s1355_s28 = smov 3 }
  0x6b   :  { %v1643_v35 = vld [vmem:[%s3058_s0 + $0x2] ss:$16 sm:%s1048_s24]   ;;  %v1046_v36 = vsel %vm130_vm1, %v1642_v33, %v1041_v34  ;;  %v1109_v40 = vsel %vm125_vm0, %v1655_v38, %v1654_v37  ;;  %v1656_v41 = vld [vmem:[%s3058_s0 + $0x10a] ss:$16 sm:%s1111_s3]   ;;  %s1152_s24 = smov 12  ;;  %s1126_s3 = smov 3 }
  0x6c   :  { %v1051_v39 = vsel %vm135_vm2, %v1643_v35, %v1046_v36  ;;  %v1657_v42 = vld [vmem:[%s3058_s0 + $0x10a] ss:$16 sm:%s1116_s4]   ;;  %v1114_v43 = vsel %vm130_vm1, %v1656_v41, %v1109_v40  ;;  %v1664_v51 = vld [vmem:[%s3058_s0 + $0x182] ss:$16 sm:%s1149_s23]   ;;  %s1286_s23 = smov 3  ;;  %s1731_s4 = smov 16  }
  0x6d   :  { %1052 = vrot.lane.b32.xlu0 %v1051_v39, %s1730_s6  ;;  %v1649_v44 = vld [vmem:[%s3058_s0 + $0xa] ss:$16 sm:%s1080_s8]   ;;  %v1119_v45 = vsel %vm135_vm2, %v1657_v42, %v1114_v43  ;;  %s1180_s8 = smov 48  ;;  %1425 = vst.msk [vmem:[%s3059_s1 + $0x2] ss:$8 sm:$0x30] %vm6_vm4, %v64_v14  }
  0x6e   :  { %v1650_v46 = vld [vmem:[%s3058_s0 + $0xa] ss:$16 sm:%s1083_s13]   ;;  %1120 = vrot.lane.b32.xlu1 %v1119_v45, %s1730_s6  ;;  %1426 = vst.msk [vmem:[%s3059_s1 - $0xd] ss:$8 sm:$0xc0] %vm6_vm4, %v64_v14   ;;  %s1322_s13 = smov 192 }
  0x6f   :  { %v1651_v47 = vld [vmem:[%s3058_s0 + $0xa] ss:$16 sm:%s1088_s14]   ;;  %v1086_v48 = vsel %vm125_vm0, %v1650_v46, %v1649_v44  ;;  %v1665_v52 = vld [vmem:[%s3058_s0 + $0x182] ss:$16 sm:%s1152_s24]   ;;  %s1240_s14 = smov 3  ;;  %s1271_s24 = smov 48 }
  0x70   :  { %v1652_v49 = vld [vmem:[%s3058_s0 + $0xa] ss:$16 sm:%s1093_s19]   ;;  %v1091_v50 = vsel %vm130_vm1, %v1651_v47, %v1086_v48  ;;  %v1155_v54 = vsel %vm125_vm0, %v1665_v52, %v1664_v51  ;;  %v1666_v55 = vld [vmem:[%s3058_s0 + $0x182] ss:$16 sm:%s1157_s29]   ;;  %s1198_s19 = smov 12  ;;  %s1218_s29 = smov 3 }
  0x71   :  { %v1096_v53 = vsel %vm135_vm2, %v1652_v49, %v1091_v50  ;;  %v1667_v56 = vld [vmem:[%s3058_s0 + $0x182] ss:$16 sm:%s1162_s27]   ;;  %v1160_v57 = vsel %vm130_vm1, %v1666_v55, %v1155_v54  ;;  %s1175_s27 = smov 12  ;;  %v1674_v2 = vld [vmem:[%s3058_s0 + $0x18a] ss:$16 sm:%s1195_s17]   ;;  %s1226_s17 = smov 48 }
  0x72   :  { %1097 = vrot.lane.b32.xlu0 %v1096_v53, %s1730_s6  ;;  %v1659_v58 = vld [vmem:[%s3058_s0 + $0x82] ss:$16 sm:%s1126_s3]   ;;  %v1165_v59 = vsel %vm135_vm2, %v1667_v56, %v1160_v57  ;;  %v1427_v18 = vld [vmem:[%s3058_s0 + $0x140] ss:$8 sm:$0xf]   ;;  %s1299_s3 = smov 192 }
  0x73   :  { %v1660_v60 = vld [vmem:[%s3058_s0 + $0x82] ss:$16 sm:%s1129_s9]   ;;  %1166 = vrot.lane.b32.xlu1 %v1165_v59, %s1730_s6  ;;  %s1185_s9 = smov 192  ;;  %v1428_v29 = vld [vmem:[%s3058_s0 + $0x140] ss:$8 sm:$0xf0]  }
  0x74   :  { %v1661_v61 = vld [vmem:[%s3058_s0 + $0x82] ss:$16 sm:%s1134_s11]   ;;  %v1132_v62 = vsel %vm125_vm0, %v1660_v60, %v1659_v58  ;;  %v1675_v3 = vld [vmem:[%s3058_s0 + $0x18a] ss:$16 sm:%s1198_s19]   ;;  %v79_v34 = vsel %vm4_vm3, %v1428_v29, %v1427_v18 }
  0x75   :  { %v1662_v63 = vld [vmem:[%s3058_s0 + $0x82] ss:$16 sm:%s1139_s16]   ;;  %v1137_v1 = vsel %vm130_vm1, %v1661_v61, %v1132_v62  ;;  %v1201_v5 = vsel %vm125_vm0, %v1675_v3, %v1674_v2  ;;  %v1676_v6 = vld [vmem:[%s3058_s0 + $0x18a] ss:$16 sm:%s1203_s20]   ;;  %s1221_s16 = smov 12  ;;  %s1309_s20 = smov 3 }
  0x76   :  { %v1142_v4 = vsel %vm135_vm2, %v1662_v63, %v1137_v1  ;;  %v1677_v7 = vld [vmem:[%s3058_s0 + $0x18a] ss:$16 sm:%s1208_s25]   ;;  %v1206_v8 = vsel %vm130_vm1, %v1676_v6, %v1201_v5  ;;  %s1253_s25 = smov 192  ;;  %v1683_v20 = vld [vmem:[%s3058_s0 + $0x101] ss:$16 sm:%s1240_s14]   ;;  %s1378_s14 = smov 3 }
  0x77   :  { %1143 = vrot.lane.b32.xlu0 %v1142_v4, %s1730_s6  ;;  %v1669_v9 = vld [vmem:[%s3058_s0 + $0x8a] ss:$16 sm:%s1172_s26]   ;;  %v1211_v11 = vsel %vm135_vm2, %v1677_v7, %v1206_v8  ;;  %1429 = vst.msk [vmem:[%s3059_s1 + $0x24] ss:$8 sm:$0x3] %vm6_vm4, %v79_v34  }
  0x78   :  { %v1670_v12 = vld [vmem:[%s3058_s0 + $0x8a] ss:$16 sm:%s1175_s27]   ;;  %1212 = vrot.lane.b32.xlu1 %v1211_v11, %s1730_s6  ;;  %v2514_v17 = vpop.permute.xlu1 %182   ;;  %1430 = vst.msk [vmem:[%s3059_s1 + $0x15] ss:$8 sm:$0xc] %vm6_vm4, %v79_v34  }
  0x79   :  { %v1671_v13 = vld [vmem:[%s3058_s0 + $0x8a] ss:$16 sm:%s1180_s8]   ;;  %v1178_v15 = vsel %vm125_vm0, %v1670_v12, %v1669_v9  ;;  %v1684_v21 = vld [vmem:[%s3058_s0 + $0x101] ss:$16 sm:%s1243_s15]   ;;  %s1263_s8 = smov 3  ;;  %s1345_s15 = smov 192 }
  0x7a   :  { %v1672_v16 = vld [vmem:[%s3058_s0 + $0x8a] ss:$16 sm:%s1185_s9]   ;;  %v1183_v19 = vsel %vm130_vm1, %v1671_v13, %v1178_v15  ;;  %v1246_v23 = vsel %vm125_vm0, %v1684_v21, %v1683_v20  ;;  %v1685_v24 = vld [vmem:[%s3058_s0 + $0x101] ss:$16 sm:%s1248_s22]   ;;  %v2550_v26 = vpop.permute.xlu0 %137   ;;  %s1289_s22 = smov 12 }
  0x7b   :  { %v1188_v22 = vsel %vm135_vm2, %v1672_v16, %v1183_v19  ;;  %v1686_v25 = vld [vmem:[%s3058_s0 + $0x101] ss:$16 sm:%s1253_s25]   ;;  %v1251_v27 = vsel %vm130_vm1, %v1685_v24, %v1246_v23  ;;  %1431 = vst.msk [vmem:[%s3059_s1 + $0x6] ss:$8 sm:$0x30] %vm6_vm4, %v79_v34  }
  0x7c   :  { %1189 = vrot.lane.b32.xlu0 %v1188_v22, %s1730_s6  ;;  %v1679_v28 = vld [vmem:[%s3058_s0 + $0x1] ss:$16 sm:%s1218_s29]   ;;  %v1256_v30 = vsel %vm135_vm2, %v1686_v25, %v1251_v27  ;;  %1432 = vst.msk [vmem:[%s3059_s1 - $0x9] ss:$8 sm:$0xc0] %vm6_vm4, %v79_v34   ;;  %s1266_s6 = smov 12 }
  0x7d   :  { %v1680_v31 = vld [vmem:[%s3058_s0 + $0x1] ss:$16 sm:%s1221_s16]   ;;  %v206_v33 = vpop.permute.xlu1 %205   ;;  %1257 = vrot.lane.b32.xlu1 %v1256_v30, %s1731_s4  ;;  %v2_v37 = vld [vmem:[%s3058_s0] ss:$8 sm:$0xf]   ;;  %s1358_s16 = smov 12 }
  0x7e   :  { %v1681_v32 = vld [vmem:[%s3058_s0 + $0x1] ss:$16 sm:%s1226_s17]   ;;  %v1224_v35 = vsel %vm125_vm0, %v1680_v31, %v1679_v28  ;;  %v1693_v39 = vld [vmem:[%s3058_s0 + $0x109] ss:$16 sm:%s1286_s23]   ;;  %s1340_s17 = smov 48 }
  0x7f   :  { %v1682_v36 = vld [vmem:[%s3058_s0 + $0x1] ss:$16 sm:%s1231_s21]   ;;  %v1229_v38 = vsel %vm130_vm1, %v1681_v32, %v1224_v35  ;;  %v1694_v40 = vld [vmem:[%s3058_s0 + $0x109] ss:$16 sm:%s1289_s22]   ;;  %v160_v45 = vpop.permute.xlu0 %159   ;;  %s1391_s22 = smov 192 }
  0x80   :  { %1463 = vst.msk [vmem:[%s3059_s1 + $0x28] sm:$0xff] %vm139_vm5, %v206_v33   ;;  %v1234_v41 = vsel %vm135_vm2, %v1682_v36, %v1229_v38  ;;  %v1292_v42 = vsel %vm125_vm0, %v1694_v40, %v1693_v39  ;;  %v1695_v43 = vld [vmem:[%s3058_s0 + $0x109] ss:$16 sm:%s1294_s2]   ;;  %s1332_s2 = smov 3  ;;  %1453 = vst.msk [vmem:[%s3059_s1 + $0x20] sm:$0xff] %vm139_vm5, %v160_v45  }
  0x81   :  { %v1696_v44 = vld [vmem:[%s3058_s0 + $0x109] ss:$16 sm:%s1299_s3]   ;;  %1235 = vrot.lane.b32.xlu0 %v1234_v41, %s1731_s4  ;;  %v1297_v46 = vsel %vm130_vm1, %v1695_v43, %v1292_v42  ;;  %v3_v48 = vld [vmem:[%s3058_s0] ss:$8 sm:$0xf0]  }
  0x82   :  { %v1688_v47 = vld [vmem:[%s3058_s0 + $0x9] ss:$16 sm:%s1263_s8]   ;;  %v1302_v49 = vsel %vm135_vm2, %v1696_v44, %v1297_v46  ;;  %v5_v53 = vsel %vm4_vm3, %v3_v48, %v2_v37  ;;  %v1403_v56 = vld [vmem:[%s3058_s0 + $0x40] ss:$8 sm:$0xf]   ;;  %s1317_s8 = smov 48 }
  0x83   :  { %v1689_v50 = vld [vmem:[%s3058_s0 + $0x9] ss:$16 sm:%s1266_s6]   ;;  %v2630_v52 = vpop.permute.xlu1 %251   ;;  %1303 = vrot.lane.b32.xlu1 %v1302_v49, %s1731_s4  ;;  %7 = vst.msk [vmem:[%s3059_s1] ss:$8 sm:$0x3] %vm6_vm4, %v5_v53  }
  0x84   :  { %v1690_v51 = vld [vmem:[%s3058_s0 + $0x9] ss:$16 sm:%s1271_s24]   ;;  %v1269_v54 = vsel %vm125_vm0, %v1689_v50, %v1688_v47  ;;  %1400 = vst.msk [vmem:[%s3059_s1 - $0xf] ss:$8 sm:$0xc] %vm6_vm4, %v5_v53   ;;  %s1386_s24 = smov 48 }
  0x85   :  { %v1691_v55 = vld [vmem:[%s3058_s0 + $0x9] ss:$16 sm:%s1276_s30]   ;;  %1401 = vst.msk [vmem:[%s3059_s1 - $0x1e] ss:$8 sm:$0x30] %vm6_vm4, %v5_v53   ;;  %v1274_v57 = vsel %vm130_vm1, %v1690_v51, %v1269_v54 }
  0x86   :  { %1402 = vst.msk [vmem:[%s3059_s1 - $0x2d] ss:$8 sm:$0xc0] %vm6_vm4, %v5_v53   ;;  %v1703_v58 = vld [vmem:[%s3058_s0 + $0x181] ss:$16 sm:%s1332_s2]   ;;  %v1279_v60 = vsel %vm135_vm2, %v1691_v55, %v1274_v57 }
  0x87   :  { %v1704_v59 = vld [vmem:[%s3058_s0 + $0x181] ss:$16 sm:%s1335_s7]   ;;  %s1312_s7 = smov 12  ;;  %v2672_v0 = vpop.permute.xlu0 %228   ;;  %1280 = vrot.lane.b32.xlu0 %v1279_v60, %s1731_s4  ;;  %v1404_v3 = vld [vmem:[%s3058_s0 + $0x40] ss:$8 sm:$0xf0]   ;;  %v298_v7 = vpop.permute.xlu1 %297  }
  0x88   :  { %v1338_v61 = vsel %vm125_vm0, %v1704_v59, %v1703_v58  ;;  %v1705_v62 = vld [vmem:[%s3058_s0 + $0x181] ss:$16 sm:%s1340_s17]   ;;  %v19_v8 = vsel %vm4_vm3, %v1404_v3, %v1403_v56  ;;  %v1433_v11 = vld [vmem:[%s3058_s0 + $0x180] ss:$8 sm:$0xf]   ;;  %s1363_s17 = smov 48 }
  0x89   :  { %v1706_v63 = vld [vmem:[%s3058_s0 + $0x181] ss:$16 sm:%s1345_s15]   ;;  %v1343_v1 = vsel %vm130_vm1, %v1705_v62, %v1338_v61  ;;  %s1381_s15 = smov 12  ;;  %1405 = vst.msk [vmem:[%s3059_s1 + $0x4] ss:$8 sm:$0x3] %vm6_vm4, %v19_v8  }
  0x8a   :  { %v1698_v2 = vld [vmem:[%s3058_s0 + $0x81] ss:$16 sm:%s1309_s20]   ;;  %v1348_v4 = vsel %vm135_vm2, %v1706_v63, %v1343_v1  ;;  %1406 = vst.msk [vmem:[%s3059_s1 - $0xb] ss:$8 sm:$0xc] %vm6_vm4, %v19_v8  }
  0x8b   :  { %v1699_v5 = vld [vmem:[%s3058_s0 + $0x81] ss:$16 sm:%s1312_s7]   ;;  %1349 = vrot.lane.b32.xlu1 %v1348_v4, %s1731_s4  ;;  %1407 = vst.msk [vmem:[%s3059_s1 - $0x1a] ss:$8 sm:$0x30] %vm6_vm4, %v19_v8   ;;  %v275_v19 = vpop.permute.xlu0 %274  }
  0x8c   :  { %v1700_v6 = vld [vmem:[%s3058_s0 + $0x81] ss:$16 sm:%s1317_s8]   ;;  %v1315_v9 = vsel %vm125_vm0, %v1699_v5, %v1698_v2  ;;  %1408 = vst.msk [vmem:[%s3059_s1 - $0x29] ss:$8 sm:$0xc0] %vm6_vm4, %v19_v8  }
  0x8d   :  { %v1701_v10 = vld [vmem:[%s3058_s0 + $0x81] ss:$16 sm:%s1322_s13]   ;;  %v1320_v12 = vsel %vm130_vm1, %v1700_v6, %v1315_v9  ;;  %v1713_v13 = vld [vmem:[%s3058_s0 + $0x189] ss:$16 sm:%s1378_s14]  }
  0x8e   :  { %v1714_v14 = vld [vmem:[%s3058_s0 + $0x189] ss:$16 sm:%s1381_s15]   ;;  %140 = vst.msk [vmem:[%s3059_s1] sm:$0xff] %vm139_vm5, %v2550_v26   ;;  %1458 = vst.msk [vmem:[%s3059_s1 + $0x8] sm:$0xff] %vm139_vm5, %v2514_v17   ;;  %v1325_v15 = vsel %vm135_vm2, %v1701_v10, %v1320_v12  ;;  %v343_v26 = vpop.permute.xlu1 %342  }
  0x8f   :  { %v1384_v16 = vsel %vm125_vm0, %v1714_v14, %v1713_v13  ;;  %v1715_v17 = vld [vmem:[%s3058_s0 + $0x189] ss:$16 sm:%s1386_s24]   ;;  %1326 = vrot.lane.b32.xlu0 %v1325_v15, %s1731_s4  ;;  %v1434_v22 = vld [vmem:[%s3058_s0 + $0x180] ss:$8 sm:$0xf0]  }
  0x90   :  { %v1716_v18 = vld [vmem:[%s3058_s0 + $0x189] ss:$16 sm:%s1391_s22]   ;;  %s1368_s22 = smov 192  ;;  %v1389_v20 = vsel %vm130_vm1, %v1715_v17, %v1384_v16  ;;  %v94_v27 = vsel %vm4_vm3, %v1434_v22, %v1433_v11  ;;  %1492 = vst.msk [vmem:[%s3059_s1 + $0x20] sm:$0xff] %vm322_vm6, %v343_v26   ;;  %v321_v35 = vpop.permute.xlu0 %320  }
  0x91   :  { %v1708_v21 = vld [vmem:[%s3058_s0 + $0x89] ss:$16 sm:%s1355_s28]   ;;  %v1394_v23 = vsel %vm135_vm2, %v1716_v18, %v1389_v20  ;;  %1435 = vst.msk [vmem:[%s3059_s1 + $0x30] ss:$8 sm:$0x3] %vm6_vm4, %v94_v27  }
  0x92   :  { %v1709_v24 = vld [vmem:[%s3058_s0 + $0x89] ss:$16 sm:%s1358_s16]   ;;  %1395 = vrot.lane.b32.xlu1 %v1394_v23, %s1731_s4  ;;  %1436 = vst.msk [vmem:[%s3059_s1 + $0x21] ss:$8 sm:$0xc] %vm6_vm4, %v94_v27   ;;  %v389_v41 = vpop.permute.xlu1 %388  }
  0x93   :  { %v1710_v25 = vld [vmem:[%s3058_s0 + $0x89] ss:$16 sm:%s1363_s17]   ;;  %v1361_v28 = vsel %vm125_vm0, %v1709_v24, %v1708_v21  ;;  %1437 = vst.msk [vmem:[%s3059_s1 + $0x12] ss:$8 sm:$0x30] %vm6_vm4, %v94_v27  }
  0x94   :  { %v1711_v29 = vld [vmem:[%s3058_s0 + $0x89] ss:$16 sm:%s1368_s22]   ;;  %1438 = vst.msk [vmem:[%s3059_s1 + $0x3] ss:$8 sm:$0xc0] %vm6_vm4, %v94_v27   ;;  %v1366_v31 = vsel %vm130_vm1, %v1710_v25, %v1361_v28  ;;  %v366_v43 = vpop.permute.xlu0 %365  }
  0x95   :  { %v1439_v30 = vld [vmem:[%s3058_s0 + $0x1c0] ss:$8 sm:$0xf]   ;;  %v1371_v34 = vsel %vm135_vm2, %v1711_v29, %v1366_v31  ;;  %323 = vst.msk [vmem:[%s3059_s1] sm:$0xff] %vm322_vm6, %v321_v35   ;;  %1502 = vst.msk [vmem:[%s3059_s1 + $0x28] sm:$0xff] %vm322_vm6, %v389_v41  }
  0x96   :  { %v1440_v32 = vld [vmem:[%s3058_s0 + $0x1c0] ss:$8 sm:$0xf0]   ;;  %1372 = vrot.lane.b32.xlu0 %v1371_v34, %s1731_s4  ;;  %1497 = vst.msk [vmem:[%s3059_s1 + $0x8] sm:$0xff] %vm322_vm6, %v366_v43   ;;  %v435_v44 = vpop.permute.xlu1 %434  }
  0x97   :  { %v1409_v33 = vld [vmem:[%s3058_s0 + $0x80] ss:$8 sm:$0xf]   ;;  %v109_v36 = vsel %vm4_vm3, %v1440_v32, %v1439_v30 }
  0x98   :  { %v1410_v37 = vld [vmem:[%s3058_s0 + $0x80] ss:$8 sm:$0xf0]   ;;  %1441 = vst.msk [vmem:[%s3059_s1 + $0x34] ss:$8 sm:$0x3] %vm6_vm4, %v109_v36  }
  0x99   :  { %v1415_v38 = vld [vmem:[%s3058_s0 + $0xc0] ss:$8 sm:$0xf]   ;;  %1442 = vst.msk [vmem:[%s3059_s1 + $0x25] ss:$8 sm:$0xc] %vm6_vm4, %v109_v36   ;;  %v34_v39 = vsel %vm4_vm3, %v1410_v37, %v1409_v33  ;;  %v412_v45 = vpop.permute.xlu0 %411  }
  0x9a   :  { %1443 = vst.msk [vmem:[%s3059_s1 + $0x16] ss:$8 sm:$0x30] %vm6_vm4, %v109_v36   ;;  %1444 = vst.msk [vmem:[%s3059_s1 + $0x7] ss:$8 sm:$0xc0] %vm6_vm4, %v109_v36   ;;  %v481_v46 = vpop.permute.xlu1 %480  }
  0x9b   :  { %v1416_v40 = vld [vmem:[%s3058_s0 + $0xc0] ss:$8 sm:$0xf0]   ;;  %1473 = vst.msk [vmem:[%s3059_s1 + $0x30] sm:$0xff] %vm139_vm5, %v2630_v52   ;;  %1483 = vst.msk [vmem:[%s3059_s1 + $0x38] sm:$0xff] %vm139_vm5, %v298_v7  }
  0x9c   :  { %1411 = vst.msk [vmem:[%s3059_s1 + $0x10] ss:$8 sm:$0x3] %vm6_vm4, %v34_v39   ;;  %1412 = vst.msk [vmem:[%s3059_s1 + $0x1] ss:$8 sm:$0xc] %vm6_vm4, %v34_v39   ;;  %v49_v42 = vsel %vm4_vm3, %v1416_v40, %v1415_v38 }
  0x9d   :  { %1413 = vst.msk [vmem:[%s3059_s1 - $0xe] ss:$8 sm:$0x30] %vm6_vm4, %v34_v39   ;;  %1414 = vst.msk [vmem:[%s3059_s1 - $0x1d] ss:$8 sm:$0xc0] %vm6_vm4, %v34_v39  }
  0x9e   :  { %1417 = vst.msk [vmem:[%s3059_s1 + $0x14] ss:$8 sm:$0x3] %vm6_vm4, %v49_v42   ;;  %1418 = vst.msk [vmem:[%s3059_s1 + $0x5] ss:$8 sm:$0xc] %vm6_vm4, %v49_v42   ;;  %v458_v47 = vpop.permute.xlu0 %457  }
  0x9f   :  { %1419 = vst.msk [vmem:[%s3059_s1 - $0xa] ss:$8 sm:$0x30] %vm6_vm4, %v49_v42   ;;  %1420 = vst.msk [vmem:[%s3059_s1 - $0x19] ss:$8 sm:$0xc0] %vm6_vm4, %v49_v42   ;;  %v526_v48 = vpop.permute.xlu1 %525  }
  0xa0   :  { %1468 = vst.msk [vmem:[%s3059_s1 + $0x10] sm:$0xff] %vm139_vm5, %v2672_v0   ;;  %1478 = vst.msk [vmem:[%s3059_s1 + $0x18] sm:$0xff] %vm139_vm5, %v275_v19  }
  0xa1   :  { %1512 = vst.msk [vmem:[%s3059_s1 + $0x30] sm:$0xff] %vm322_vm6, %v435_v44   ;;  %1507 = vst.msk [vmem:[%s3059_s1 + $0x10] sm:$0xff] %vm322_vm6, %v412_v45  }
  0xa2   :  { %1522 = vst.msk [vmem:[%s3059_s1 + $0x38] sm:$0xff] %vm322_vm6, %v481_v46   ;;  %1517 = vst.msk [vmem:[%s3059_s1 + $0x18] sm:$0xff] %vm322_vm6, %v458_v47  }
  0xa3   :  { %1531 = vst.msk [vmem:[%s3059_s1 + $0x20] sm:$0xff] %vm505_vm7, %v526_v48   ;;  %v504_v49 = vpop.permute.xlu0 %503  }
  0xa4   :  { %506 = vst.msk [vmem:[%s3059_s1] sm:$0xff] %vm505_vm7, %v504_v49   ;;  %v572_v50 = vpop.permute.xlu1 %571  }
  0xa5   :  { %1541 = vst.msk [vmem:[%s3059_s1 + $0x28] sm:$0xff] %vm505_vm7, %v572_v50  }
  0xa8   :  { %v549_v51 = vpop.permute.xlu0 %548  }
  0xa9   :  { %1536 = vst.msk [vmem:[%s3059_s1 + $0x8] sm:$0xff] %vm505_vm7, %v549_v51   ;;  %v618_v52 = vpop.permute.xlu1 %617  }
  0xaa   :  { %1551 = vst.msk [vmem:[%s3059_s1 + $0x30] sm:$0xff] %vm505_vm7, %v618_v52  }
  0xad   :  { %v595_v53 = vpop.permute.xlu0 %594  }
  0xae   :  { %1546 = vst.msk [vmem:[%s3059_s1 + $0x10] sm:$0xff] %vm505_vm7, %v595_v53   ;;  %v664_v54 = vpop.permute.xlu1 %663  }
  0xaf   :  { %1561 = vst.msk [vmem:[%s3059_s1 + $0x38] sm:$0xff] %vm505_vm7, %v664_v54  }
  0xb2   :  { %v641_v55 = vpop.permute.xlu0 %640  }
  0xb3   :  { %1556 = vst.msk [vmem:[%s3059_s1 + $0x18] sm:$0xff] %vm505_vm7, %v641_v55   ;;  %v709_v56 = vpop.permute.xlu1 %708  }
  0xb4   :  { %1570 = vst.msk [vmem:[%s3059_s1 + $0x20] sm:$0xff] %vm688_vm8, %v709_v56  }
  0xb7   :  { %v687_v57 = vpop.permute.xlu0 %686  }
  0xb8   :  { %689 = vst.msk [vmem:[%s3059_s1] sm:$0xff] %vm688_vm8, %v687_v57   ;;  %v755_v58 = vpop.permute.xlu1 %754  }
  0xb9   :  { %1580 = vst.msk [vmem:[%s3059_s1 + $0x28] sm:$0xff] %vm688_vm8, %v755_v58  }
  0xbc   :  { %v732_v59 = vpop.permute.xlu0 %731  }
  0xbd   :  { %1575 = vst.msk [vmem:[%s3059_s1 + $0x8] sm:$0xff] %vm688_vm8, %v732_v59   ;;  %v801_v60 = vpop.permute.xlu1 %800  }
  0xbe   :  { %1590 = vst.msk [vmem:[%s3059_s1 + $0x30] sm:$0xff] %vm688_vm8, %v801_v60  }
  0xc1   :  { %v778_v61 = vpop.permute.xlu0 %777  }
  0xc2   :  { %1585 = vst.msk [vmem:[%s3059_s1 + $0x10] sm:$0xff] %vm688_vm8, %v778_v61   ;;  %v847_v62 = vpop.permute.xlu1 %846  }
  0xc3   :  { %1600 = vst.msk [vmem:[%s3059_s1 + $0x38] sm:$0xff] %vm688_vm8, %v847_v62  }
  0xc6   :  { %v824_v63 = vpop.permute.xlu0 %823  }
  0xc7   :  { %1595 = vst.msk [vmem:[%s3059_s1 + $0x18] sm:$0xff] %vm688_vm8, %v824_v63   ;;  %v892_v0 = vpop.permute.xlu1 %891  }
  0xc8   :  { %1609 = vst.msk [vmem:[%s3059_s1 + $0x20] sm:$0xff] %vm871_vm9, %v892_v0  }
  0xcb   :  { %v870_v1 = vpop.permute.xlu0 %869  }
  0xcc   :  { %872 = vst.msk [vmem:[%s3059_s1] sm:$0xff] %vm871_vm9, %v870_v1   ;;  %v938_v2 = vpop.permute.xlu1 %937  }
  0xcd   :  { %1619 = vst.msk [vmem:[%s3059_s1 + $0x28] sm:$0xff] %vm871_vm9, %v938_v2  }
  0xd0   :  { %v915_v3 = vpop.permute.xlu0 %914  }
  0xd1   :  { %1614 = vst.msk [vmem:[%s3059_s1 + $0x8] sm:$0xff] %vm871_vm9, %v915_v3   ;;  %v984_v4 = vpop.permute.xlu1 %983  }
  0xd2   :  { %1629 = vst.msk [vmem:[%s3059_s1 + $0x30] sm:$0xff] %vm871_vm9, %v984_v4  }
  0xd5   :  { %v961_v5 = vpop.permute.xlu0 %960  }
  0xd6   :  { %1624 = vst.msk [vmem:[%s3059_s1 + $0x10] sm:$0xff] %vm871_vm9, %v961_v5   ;;  %v1030_v6 = vpop.permute.xlu1 %1029  }
  0xd7   :  { %1639 = vst.msk [vmem:[%s3059_s1 + $0x38] sm:$0xff] %vm871_vm9, %v1030_v6  }
  0xda   :  { %v1007_v7 = vpop.permute.xlu0 %1006  }
  0xdb   :  { %1634 = vst.msk [vmem:[%s3059_s1 + $0x18] sm:$0xff] %vm871_vm9, %v1007_v7   ;;  %v1075_v8 = vpop.permute.xlu1 %1074  }
  0xdc   :  { %1648 = vst.msk [vmem:[%s3059_s1 + $0x20] sm:$0xff] %vm1054_vm10, %v1075_v8  }
  0xdf   :  { %v1053_v9 = vpop.permute.xlu0 %1052  }
  0xe0   :  { %1055 = vst.msk [vmem:[%s3059_s1] sm:$0xff] %vm1054_vm10, %v1053_v9   ;;  %v1121_v10 = vpop.permute.xlu1 %1120  }
  0xe1   :  { %1658 = vst.msk [vmem:[%s3059_s1 + $0x28] sm:$0xff] %vm1054_vm10, %v1121_v10  }
  0xe4   :  { %v1098_v11 = vpop.permute.xlu0 %1097  }
  0xe5   :  { %1653 = vst.msk [vmem:[%s3059_s1 + $0x8] sm:$0xff] %vm1054_vm10, %v1098_v11   ;;  %v1167_v12 = vpop.permute.xlu1 %1166  }
  0xe6   :  { %1668 = vst.msk [vmem:[%s3059_s1 + $0x30] sm:$0xff] %vm1054_vm10, %v1167_v12  }
  0xe9   :  { %v1144_v13 = vpop.permute.xlu0 %1143  }
  0xea   :  { %1663 = vst.msk [vmem:[%s3059_s1 + $0x10] sm:$0xff] %vm1054_vm10, %v1144_v13   ;;  %v1213_v14 = vpop.permute.xlu1 %1212  }
  0xeb   :  { %1678 = vst.msk [vmem:[%s3059_s1 + $0x38] sm:$0xff] %vm1054_vm10, %v1213_v14  }
  0xee   :  { %v1190_v15 = vpop.permute.xlu0 %1189  }
  0xef   :  { %1673 = vst.msk [vmem:[%s3059_s1 + $0x18] sm:$0xff] %vm1054_vm10, %v1190_v15   ;;  %v1258_v16 = vpop.permute.xlu1 %1257  }
  0xf0   :  { %1687 = vst.msk [vmem:[%s3059_s1 + $0x20] sm:$0xff] %vm1237_vm11, %v1258_v16  }
  0xf3   :  { %v1236_v17 = vpop.permute.xlu0 %1235  }
  0xf4   :  { %1238 = vst.msk [vmem:[%s3059_s1] sm:$0xff] %vm1237_vm11, %v1236_v17  }
  0xf5   :  { %v1304_v18 = vpop.permute.xlu1 %1303  }
  0xf6   :  { %1697 = vst.msk [vmem:[%s3059_s1 + $0x28] sm:$0xff] %vm1237_vm11, %v1304_v18  }
  0xf9   :  { %v1281_v19 = vpop.permute.xlu0 %1280  }
  0xfa   :  { %1692 = vst.msk [vmem:[%s3059_s1 + $0x8] sm:$0xff] %vm1237_vm11, %v1281_v19  }
  0xfd   :  { %v1350_v20 = vpop.permute.xlu1 %1349  }
  0xfe   :  { %1707 = vst.msk [vmem:[%s3059_s1 + $0x30] sm:$0xff] %vm1237_vm11, %v1350_v20  }
 0x101   :  { %v1327_v21 = vpop.permute.xlu0 %1326  }
 0x102   :  { %1702 = vst.msk [vmem:[%s3059_s1 + $0x10] sm:$0xff] %vm1237_vm11, %v1327_v21  }
 0x104   :  { %v1396_v22 = vpop.permute.xlu1 %1395  }
 0x105   :  { %1717 = vst.msk [vmem:[%s3059_s1 + $0x38] sm:$0xff] %vm1237_vm11, %v1396_v22  }
 0x108   :  { %v1373_v23 = vpop.permute.xlu0 %1372  }
 0x109   :  { %1712 = vst.msk [vmem:[%s3059_s1 + $0x18] sm:$0xff] %vm1237_vm11, %v1373_v23  }

// kernel: propagation_forward.1
= control target key start
LH: loop header
LB: loop body
LE: loop exit
PB: predicated region body
PF: predicated region fallthrough
CT: control target
= control target key end

     0   :  { %s4250_s18 = smov 0   ;;  %s5068_s0 = inlined_call_operand.vmem [shape: f32[2,8,256], index: 0, kind: input, shape index: {}]   ;;  %s5069_s1 = inlined_call_operand.vmem [shape: f32[2,16,16], index: 1, kind: input, shape index: {}]   ;;  %s5070_s2 = inlined_call_operand.vmem [shape: f32[2,16,256], index: 2, kind: input, shape index: {}]   ;;  %s5071_s3 = inlined_call_operand.vmem [shape: f32[2,16,256], index: 3, kind: input, shape index: {}]   ;;  %s5072_s4 = inlined_call_operand.vmem [shape: f32[2,12,256], index: 4, kind: output, shape index: {0}]   ;;  %s5073_s5 = inlined_call_operand.vmem [shape: f32[2,12,256], index: 5, kind: output, shape index: {1}]  }
   0x1 LB: > { %s4015_s19 = sadd.s32 4294967295, %s4215_s18   ;;  %p4019_p0 = scmp.ge.s32.totalorder %s4215_s18, 1  ;;  %s4215_s18 = sphi %s4250_s18, %s16_s18  }
   0x2   : > { %p220_p1 = scmp.lt.s32.totalorder %s4215_s18, 3 }
   0x4   : > { %p221_p2 = pnand %p4019_p0, %p220_p1 }
   0x6   : > { %224 = sbr.rel (%p221_p2) target bundleno = 506 (0x1fa), region = 36 }
   0xd   : > { %p268_p3 = scmp.lt.s32.totalorder %s4015_s19, 1  ;;  %v4217_v0 = vmov 0.0   ;;  %v5074_v1 = vlaneseq  ;;  %vm381_vm0 = vcmask 130048   ;;  %vm3317_vm2 = vcmask 1046528  }
   0xe   : > { %452 = vmatprep.mubr.f32.mxu0 %v4217_v0  ;;  %642 = vmatprep.mubr.f32.mxu1 %v4217_v0  ;;  %vm3342_vm3 = vcmask 1040384  }
   0xf   : > { %s5116_s19 = smov (!%p268_p3, %s4015_s19), 1  ;;  %v4280_v8 = vshrl.u32 %v5074_v1, 7 }
  0x10   : > { %s4263_s20 = sshll.u32 %s5116_s19, 5  ;;  %s4128_s24 = sshll.u32 %s5116_s19, 4 }
  0x11   : > { %s4269_s23 = scalar_lea.vmem %s5070_s2, %s4263_s20  ;;  %s272_s27 = scalar_lea.vmem %s5068_s0, %s4128_s24  ;;  %v302_v20 = vadd.s32 8, %v4280_v8  ;;  %v4287_v21 = vsub.s32 1, %v4280_v8  ;;  %v4291_v28 = vcvt.s32.f32 %v4280_v8  ;;  %v4294_v29 = vsub.s32 0, %v4280_v8 }
  0x12   : > { %v313_v2 = vld [vmem:[%s4269_s23] ss:$8 sm:$0x3]  ;;  %v4036_v3 = vld [vmem:[%s4269_s23 + $0x1] ss:$8 sm:$0x3]  ;;  %s4328_s30 = scalar_lea.vmem %s5069_s1, %s4128_s24  ;;  %s4527_s8 = scalar_lea.vmem %s5071_s3, %s4263_s20 }
  0x13   : > { %v315_v4 = vadd.f32 1.0, %v313_v2  ;;  %v512_v5 = vadd.f32 1.0, %v4036_v3  ;;  %v309_v6 = vld [vmem:[%s272_s27] sm:$0xff]  ;;  %v310_v7 = vld [vmem:[%s272_s27 + $0x8] sm:$0xff]  ;;  %v4297_v37 = vcvt.s32.f32 %v302_v20  ;;  %s297_s11 = scalar_lea.vmem %s5073_s5, %s4263_s20  ;;  %s292_s14 = scalar_lea.vmem %s5072_s4, %s4263_s20 }
  0x14   : > { %311 = vst [vmem:[#allocation2] sm:$0xff] %v309_v6  ;;  %312 = vst [vmem:[#allocation2 + $0x8] sm:$0xff] %v310_v7  ;;  %v4042_v9 = vld [vmem:[%s4269_s23 + $0x2] ss:$8 sm:$0x3] }
  0x15   : > { %v316_v10 = vmul.f32 16.0, %v315_v4  ;;  %v513_v11 = vmul.f32 16.0, %v512_v5  ;;  %v698_v12 = vadd.f32 1.0, %v4042_v9  ;;  %v4048_v13 = vld [vmem:[%s4269_s23 + $0x3] ss:$8 sm:$0x3] }
  0x16   : > { %v884_v14 = vadd.f32 1.0, %v4048_v13  ;;  %v4054_v15 = vld [vmem:[%s4269_s23 + $0x4] ss:$8 sm:$0x3] }
  0x17   : > { %v4032_v16 = vadd.f32 -1.0, %v316_v10  ;;  %v4038_v17 = vadd.f32 -1.0, %v513_v11  ;;  %v699_v18 = vmul.f32 16.0, %v698_v12  ;;  %v1070_v19 = vadd.f32 1.0, %v4054_v15 }
  0x18   : > { %v885_v22 = vmul.f32 16.0, %v884_v14  ;;  %v4060_v23 = vld [vmem:[%s4269_s23 + $0x5] ss:$8 sm:$0x3] }
  0x19   : > { %v318_v24 = vmul.f32 0.5, %v4032_v16  ;;  %v515_v25 = vmul.f32 0.5, %v4038_v17  ;;  %v4044_v26 = vadd.f32 -1.0, %v699_v18  ;;  %v1071_v27 = vmul.f32 16.0, %v1070_v19 }
  0x1a   : > { %v4050_v30 = vadd.f32 -1.0, %v885_v22  ;;  %v1255_v31 = vadd.f32 1.0, %v4060_v23  ;;  %v4066_v32 = vld [vmem:[%s4269_s23 + $0x6] ss:$8 sm:$0x3] }
  0x1b   : > { %v319_v33 = vmax.f32 %v318_v24, 0.0  ;;  %v516_v34 = vmax.f32 %v515_v25, 0.0  ;;  %v701_v35 = vmul.f32 0.5, %v4044_v26  ;;  %v4056_v36 = vadd.f32 -1.0, %v1071_v27 }
  0x1c   : > { %v887_v38 = vmul.f32 0.5, %v4050_v30  ;;  %v1256_v39 = vmul.f32 16.0, %v1255_v31  ;;  %v1441_v40 = vadd.f32 1.0, %v4066_v32  ;;  %v4072_v41 = vld [vmem:[%s4269_s23 + $0x7] ss:$8 sm:$0x3] }
  0x1d   : > { %v320_v42 = vmin.f32 %v319_v33, 15.0  ;;  %v517_v43 = vmin.f32 %v516_v34, 15.0  ;;  %v702_v44 = vmax.f32 %v701_v35, 0.0  ;;  %v4300_v45 = vmul.f32 0.5, %v4056_v36 }
  0x1e   : > { %v888_v46 = vmax.f32 %v887_v38, 0.0  ;;  %v4062_v47 = vadd.f32 -1.0, %v1256_v39  ;;  %v4302_v48 = vmul.f32 16.0, %v1441_v40  ;;  %v4304_v49 = vadd.f32 1.0, %v4072_v41 }
  0x1f   : > { %v335_v50 = vrot.slane %v320_v42, %v4287_v21  ;;  %v532_v51 = vrot.slane %v517_v43, %v4287_v21  ;;  %v331_v52 = vrot.slane %v320_v42, %v4294_v29  ;;  %v528_v53 = vrot.slane %v517_v43, %v4294_v29 }
  0x20   : > { %v703_v54 = vmin.f32 %v702_v44, 15.0  ;;  %v889_v55 = vmin.f32 %v888_v46, 15.0  ;;  %v1074_v56 = vmax.f32 %v4300_v45, 0.0  ;;  %v4311_v57 = vmul.f32 0.5, %v4062_v47  ;;  %v4336_v46 = vld [vmem:[%s4328_s30] sm:$0xff] }
  0x21   : > { %v339_v58 = vsub.f32 %v4291_v28, %v335_v50  ;;  %v341_v59 = vsub.f32 %v4297_v37, %v335_v50  ;;  %v536_v60 = vsub.f32 %v4291_v28, %v532_v51  ;;  %v538_v61 = vsub.f32 %v4297_v37, %v532_v51 }
  0x22   : > { %v338_v62 = vsub.f32 %v4291_v28, %v331_v52  ;;  %v340_v63 = vsub.f32 %v4297_v37, %v331_v52  ;;  %v535_v2 = vsub.f32 %v4291_v28, %v528_v53  ;;  %v537_v3 = vsub.f32 %v4297_v37, %v528_v53 }
  0x23   : > { %v343_v4 = vand.u32 2147483647, %v339_v58  ;;  %v345_v5 = vand.u32 2147483647, %v341_v59  ;;  %v540_v6 = vand.u32 2147483647, %v536_v60  ;;  %v718_v7 = vrot.slane %v703_v54, %v4287_v21 }
  0x24   : > { %v542_v9 = vand.u32 2147483647, %v538_v61  ;;  %v342_v10 = vand.u32 2147483647, %v338_v62  ;;  %v344_v11 = vand.u32 2147483647, %v340_v63  ;;  %v904_v12 = vrot.slane %v889_v55, %v4287_v21 }
  0x25   : > { %v347_v13 = vsub.f32 1.0, %v343_v4  ;;  %v349_v14 = vsub.f32 1.0, %v345_v5  ;;  %v544_v15 = vsub.f32 1.0, %v540_v6  ;;  %v539_v16 = vand.u32 2147483647, %v535_v2  ;;  %v4347_v6 = vld [vmem:[%s4328_s30 + $0x8] sm:$0xff] }
  0x26   : > { %v546_v17 = vsub.f32 1.0, %v542_v9  ;;  %v346_v18 = vsub.f32 1.0, %v342_v10  ;;  %v348_v19 = vsub.f32 1.0, %v344_v11  ;;  %v541_v20 = vand.u32 2147483647, %v537_v3 }
  0x27   : > { %v351_v22 = vmax.f32 %v347_v13, 0.0  ;;  %v353_v23 = vmax.f32 %v349_v14, 0.0  ;;  %v548_v24 = vmax.f32 %v544_v15, 0.0  ;;  %v543_v25 = vsub.f32 1.0, %v539_v16 }
  0x28   : > { %v550_v26 = vmax.f32 %v546_v17, 0.0  ;;  %v350_v27 = vmax.f32 %v346_v18, 0.0  ;;  %v352_v30 = vmax.f32 %v348_v19, 0.0  ;;  %v545_v31 = vsub.f32 1.0, %v541_v20 }
  0x29   : > { %v4134_v32 = vpack.c.bf16 %v353_v23, %v351_v22  ;;  %v547_v33 = vmax.f32 %v543_v25, 0.0  ;;  %v722_v34 = vsub.f32 %v4291_v28, %v718_v7  ;;  %v724_v35 = vsub.f32 %v4297_v37, %v718_v7 }
  0x2a   : > { %v4138_v36 = vpack.c.bf16 %v550_v26, %v548_v24  ;;  %v4136_v38 = vpack.c.bf16 %v352_v30, %v350_v27  ;;  %v549_v39 = vmax.f32 %v545_v31, 0.0  ;;  %v908_v40 = vsub.f32 %v4291_v28, %v904_v12 }
  0x2b   : > { %4135 = vmatprep.subr.bf16.mxu0 %v4134_v32  ;;  %v726_v41 = vand.u32 2147483647, %v722_v34  ;;  %v728_v42 = vand.u32 2147483647, %v724_v35  ;;  %v910_v43 = vsub.f32 %v4297_v37, %v904_v12  ;;  %v714_v44 = vrot.slane %v703_v54, %v4294_v29 }
  0x2c   : > { %4139 = vmatprep.subr.bf16.mxu1 %v4138_v36  ;;  %4137 = vmatpush1.bf16.msra.mxu0 %v4136_v38  ;;  %v4140_v45 = vpack.c.bf16 %v549_v39, %v547_v33  ;;  %v912_v47 = vand.u32 2147483647, %v908_v40  ;;  %v900_v50 = vrot.slane %v889_v55, %v4294_v29  ;;  %v1075_v51 = vmin.f32 %v1074_v56, 15.0 }
  0x2d   : > { %v730_v52 = vsub.f32 1.0, %v726_v41  ;;  %v732_v53 = vsub.f32 1.0, %v728_v42  ;;  %v914_v58 = vand.u32 2147483647, %v910_v43  ;;  %v721_v59 = vsub.f32 %v4291_v28, %v714_v44 }
  0x2e   : > { %4141 = vmatpush1.bf16.msra.mxu1 %v4140_v45  ;;  %v916_v60 = vsub.f32 1.0, %v912_v47  ;;  %v723_v61 = vsub.f32 %v4297_v37, %v714_v44  ;;  %v907_v54 = vsub.f32 %v4291_v28, %v900_v50  ;;  %v909_v62 = vsub.f32 %v4297_v37, %v900_v50 }
  0x2f   : > { %4034 = vmatmul.mubr.msk.f32.vlgmr.msra.gmra.mrb[0].mxu0 %vm381_vm0, %v4336_v46  ;;  %v734_v63 = vmax.f32 %v730_v52, 0.0  ;;  %v736_v55 = vmax.f32 %v732_v53, 0.0  ;;  %v918_v56 = vsub.f32 1.0, %v914_v58  ;;  %v725_v2 = vand.u32 2147483647, %v721_v59 }
  0x30   : > { %v920_v3 = vmax.f32 %v916_v60, 0.0  ;;  %v727_v4 = vand.u32 2147483647, %v723_v61  ;;  %v911_v5 = vand.u32 2147483647, %v907_v54  ;;  %458 = vmatprep.mubr.f32.mxu0 %v4217_v0  ;;  %v1090_v7 = vrot.slane %v1075_v51, %v4287_v21 }
  0x31   : > { %4040 = vmatmul.mubr.msk.f32.vlgmr.msra.gmra.mrb[0].mxu1 %vm381_vm0, %v4336_v46  ;;  %v4142_v9 = vpack.c.bf16 %v736_v55, %v734_v63  ;;  %v922_v10 = vmax.f32 %v918_v56, 0.0  ;;  %v729_v11 = vsub.f32 1.0, %v725_v2  ;;  %v913_v12 = vand.u32 2147483647, %v909_v62 }
  0x32   : > { %v731_v13 = vsub.f32 1.0, %v727_v4  ;;  %v915_v14 = vsub.f32 1.0, %v911_v5  ;;  %648 = vmatprep.mubr.f32.mxu1 %v4217_v0  ;;  %v1094_v15 = vsub.f32 %v4291_v28, %v1090_v7  ;;  %v1096_v16 = vsub.f32 %v4297_v37, %v1090_v7 }
  0x33   : > { %4143 = vmatprep.subr.bf16.mxu0 %v4142_v9  ;;  %v4146_v17 = vpack.c.bf16 %v922_v10, %v920_v3  ;;  %v733_v18 = vmax.f32 %v729_v11, 0.0  ;;  %v917_v19 = vsub.f32 1.0, %v913_v12  ;;  %4035 = vmatmul.mubr.msk.f32.gmra.mrb[2].mxu0 %vm381_vm0, %v4347_v6  ;;  %v1259_v20 = vmax.f32 %v4311_v57, 0.0 }
  0x34   : > { %v735_v22 = vmax.f32 %v731_v13, 0.0  ;;  %v919_v23 = vmax.f32 %v915_v14, 0.0  ;;  %828 = vmatprep.mubr.f32.mxu0 %v4217_v0  ;;  %v1098_v24 = vand.u32 2147483647, %v1094_v15  ;;  %v1100_v25 = vand.u32 2147483647, %v1096_v16 }
  0x35   : > { %4147 = vmatprep.subr.bf16.mxu1 %v4146_v17  ;;  %v921_v26 = vmax.f32 %v917_v19, 0.0  ;;  %4041 = vmatmul.mubr.msk.f32.gmra.mrb[2].mxu1 %vm381_vm0, %v4347_v6  ;;  %v1260_v27 = vmin.f32 %v1259_v20, 15.0  ;;  %v1086_v30 = vrot.slane %v1075_v51, %v4294_v29  ;;  %v4068_v31 = vadd.f32 -1.0, %v4302_v48  ;;  %v4078_v14 = vld [vmem:[%s4269_s23 + $0x10] ss:$8 sm:$0x3] }
  0x36   : > { %v4144_v32 = vpack.c.bf16 %v735_v22, %v733_v18  ;;  %1014 = vmatprep.mubr.f32.mxu1 %v4217_v0  ;;  %v1102_v57 = vsub.f32 1.0, %v1098_v24  ;;  %v1104_v33 = vsub.f32 1.0, %v1100_v25  ;;  %v1628_v34 = vmul.f32 16.0, %v4304_v49  ;;  %v4084_v19 = vld [vmem:[%s4269_s23 + $0x11] ss:$8 sm:$0x3] }
  0x37   : > { %v4148_v35 = vpack.c.bf16 %v921_v26, %v919_v23  ;;  %v1275_v36 = vrot.slane %v1260_v27, %v4287_v21  ;;  %v1093_v38 = vsub.f32 %v4291_v28, %v1086_v30  ;;  %v1095_v39 = vsub.f32 %v4297_v37, %v1086_v30  ;;  %v4090_v25 = vld [vmem:[%s4269_s23 + $0x12] ss:$8 sm:$0x3] }
  0x38   : > { %4145 = vmatpush1.bf16.msra.mxu0 %v4144_v32  ;;  %v1106_v40 = vmax.f32 %v1102_v57, 0.0  ;;  %v1108_v41 = vmax.f32 %v1104_v33, 0.0  ;;  %v1271_v42 = vrot.slane %v1260_v27, %v4294_v29  ;;  %v1444_v48 = vmul.f32 0.5, %v4068_v31 }
  0x39   : > { %4149 = vmatpush1.bf16.msra.mxu1 %v4148_v35  ;;  %v1279_v43 = vsub.f32 %v4291_v28, %v1275_v36  ;;  %v1281_v44 = vsub.f32 %v4297_v37, %v1275_v36  ;;  %v1097_v45 = vand.u32 2147483647, %v1093_v38  ;;  %v1099_v49 = vand.u32 2147483647, %v1095_v39 }
  0x3a   : > { %v4150_v47 = vpack.c.bf16 %v1108_v41, %v1106_v40  ;;  %v1278_v50 = vsub.f32 %v4291_v28, %v1271_v42  ;;  %v1280_v51 = vsub.f32 %v4297_v37, %v1271_v42  ;;  %v1445_v52 = vmax.f32 %v1444_v48, 0.0 }
  0x3b   : > { %4046 = vmatmul.mubr.msk.f32.vlgmr.msra.gmra.mrb[4].mxu0 %vm381_vm0, %v4336_v46  ;;  %v1283_v53 = vand.u32 2147483647, %v1279_v43  ;;  %v1285_v58 = vand.u32 2147483647, %v1281_v44  ;;  %v1101_v59 = vsub.f32 1.0, %v1097_v45  ;;  %v1103_v60 = vsub.f32 1.0, %v1099_v49 }
  0x3c   : > { %4052 = vmatmul.mubr.msk.f32.vlgmr.msra.gmra.mrb[4].mxu1 %vm381_vm0, %v4336_v46  ;;  %4151 = vmatprep.subr.bf16.mxu0 %v4150_v47  ;;  %v1282_v61 = vand.u32 2147483647, %v1278_v50  ;;  %v1284_v54 = vand.u32 2147483647, %v1280_v51  ;;  %v1446_v62 = vmin.f32 %v1445_v52, 15.0  ;;  %v4074_v63 = vadd.f32 -1.0, %v1628_v34 }
  0x3d   : > { %v1287_v55 = vsub.f32 1.0, %v1283_v53  ;;  %v1289_v56 = vsub.f32 1.0, %v1285_v58  ;;  %v1105_v2 = vmax.f32 %v1101_v59, 0.0  ;;  %v1107_v3 = vmax.f32 %v1103_v60, 0.0  ;;  %834 = vmatprep.mubr.f32.mxu0 %v4217_v0  ;;  %1020 = vmatprep.mubr.f32.mxu1 %v4217_v0 }
  0x3e   : > { %v1286_v4 = vsub.f32 1.0, %v1282_v61  ;;  %v1288_v5 = vsub.f32 1.0, %v1284_v54  ;;  %v1461_v7 = vrot.slane %v1446_v62, %v4287_v21  ;;  %v1630_v9 = vmul.f32 0.5, %v4074_v63  ;;  %v4096_v61 = vld [vmem:[%s4269_s23 + $0x13] ss:$8 sm:$0x3] }
  0x3f   : > { %v1291_v10 = vmax.f32 %v1287_v55, 0.0  ;;  %v1293_v11 = vmax.f32 %v1289_v56, 0.0  ;;  %v4152_v12 = vpack.c.bf16 %v1107_v3, %v1105_v2  ;;  %4047 = vmatmul.mubr.msk.f32.gmra.mrb[6].mxu0 %vm381_vm0, %v4347_v6  ;;  %v1457_v13 = vrot.slane %v1446_v62, %v4294_v29 }
  0x40   : > { %v1290_v15 = vmax.f32 %v1286_v4, 0.0  ;;  %v1292_v16 = vmax.f32 %v1288_v5, 0.0  ;;  %4053 = vmatmul.mubr.msk.f32.gmra.mrb[6].mxu1 %vm381_vm0, %v4347_v6  ;;  %1200 = vmatprep.mubr.f32.mxu0 %v4217_v0  ;;  %v1465_v17 = vsub.f32 %v4291_v28, %v1461_v7  ;;  %v1467_v18 = vsub.f32 %v4297_v37, %v1461_v7 }
  0x41   : > { %v4154_v20 = vpack.c.bf16 %v1293_v11, %v1291_v10  ;;  %4153 = vmatpush1.bf16.msra.mxu0 %v4152_v12  ;;  %1385 = vmatprep.mubr.f32.mxu1 %v4217_v0  ;;  %v1631_v22 = vmax.f32 %v1630_v9, 0.0  ;;  %v1464_v23 = vsub.f32 %v4291_v28, %v1457_v13  ;;  %v1466_v24 = vsub.f32 %v4297_v37, %v1457_v13 }
  0x42   : > { %v4156_v26 = vpack.c.bf16 %v1292_v16, %v1290_v15  ;;  %v1469_v27 = vand.u32 2147483647, %v1465_v17  ;;  %v1471_v30 = vand.u32 2147483647, %v1467_v18  ;;  %v1813_v31 = vadd.f32 1.0, %v4078_v14 }
  0x43   : > { %4155 = vmatprep.subr.bf16.mxu1 %v4154_v20  ;;  %v1632_v32 = vmin.f32 %v1631_v22, 15.0  ;;  %v1468_v57 = vand.u32 2147483647, %v1464_v23  ;;  %v1470_v33 = vand.u32 2147483647, %v1466_v24  ;;  %v1999_v34 = vadd.f32 1.0, %v4084_v19 }
  0x44   : > { %4157 = vmatpush1.bf16.msra.mxu1 %v4156_v26  ;;  %4058 = vmatmul.mubr.msk.f32.vlgmr.msra.gmra.mrb[8].mxu0 %vm381_vm0, %v4336_v46  ;;  %v1473_v35 = vsub.f32 1.0, %v1469_v27  ;;  %v1475_v36 = vsub.f32 1.0, %v1471_v30  ;;  %v1814_v38 = vmul.f32 16.0, %v1813_v31  ;;  %v2185_v39 = vadd.f32 1.0, %v4090_v25 }
  0x45   : > { %v1647_v40 = vrot.slane %v1632_v32, %v4287_v21  ;;  %v1472_v41 = vsub.f32 1.0, %v1468_v57  ;;  %v1474_v42 = vsub.f32 1.0, %v1470_v33  ;;  %v1643_v48 = vrot.slane %v1632_v32, %v4294_v29  ;;  %1206 = vmatprep.mubr.f32.mxu0 %v4217_v0 }
  0x46   : > { %v1477_v43 = vmax.f32 %v1473_v35, 0.0  ;;  %v1479_v44 = vmax.f32 %v1475_v36, 0.0  ;;  %v4080_v45 = vadd.f32 -1.0, %v1814_v38  ;;  %v2000_v49 = vmul.f32 16.0, %v1999_v34 }
  0x47   : > { %4064 = vmatmul.mubr.msk.f32.vlgmr.msra.gmra.mrb[8].mxu1 %vm381_vm0, %v4336_v46  ;;  %v1651_v47 = vsub.f32 %v4291_v28, %v1647_v40  ;;  %v1653_v50 = vsub.f32 %v4297_v37, %v1647_v40  ;;  %v1476_v51 = vmax.f32 %v1472_v41, 0.0  ;;  %v1478_v52 = vmax.f32 %v1474_v42, 0.0 }
  0x48   : > { %v4158_v53 = vpack.c.bf16 %v1479_v44, %v1477_v43  ;;  %v1650_v58 = vsub.f32 %v4291_v28, %v1643_v48  ;;  %v1652_v59 = vsub.f32 %v4297_v37, %v1643_v48  ;;  %1391 = vmatprep.mubr.f32.mxu1 %v4217_v0  ;;  %4059 = vmatmul.mubr.msk.f32.gmra.mrb[10].mxu0 %vm381_vm0, %v4347_v6  ;;  %v1816_v60 = vmul.f32 0.5, %v4080_v45 }
  0x49   : > { %v1655_v54 = vand.u32 2147483647, %v1651_v47  ;;  %v1657_v62 = vand.u32 2147483647, %v1653_v50  ;;  %v4160_v63 = vpack.c.bf16 %v1478_v52, %v1476_v51  ;;  %1571 = vmatprep.mubr.f32.mxu0 %v4217_v0  ;;  %v4086_v55 = vadd.f32 -1.0, %v2000_v49 }
  0x4a   : > { %4159 = vmatprep.subr.bf16.mxu0 %v4158_v53  ;;  %v1654_v56 = vand.u32 2147483647, %v1650_v58  ;;  %v1656_v2 = vand.u32 2147483647, %v1652_v59  ;;  %v1817_v3 = vmax.f32 %v1816_v60, 0.0  ;;  %v2186_v4 = vmul.f32 16.0, %v2185_v39 }
  0x4b   : > { %v1659_v5 = vsub.f32 1.0, %v1655_v54  ;;  %v1661_v7 = vsub.f32 1.0, %v1657_v62  ;;  %4161 = vmatpush1.bf16.msra.mxu0 %v4160_v63  ;;  %4065 = vmatmul.mubr.msk.f32.gmra.mrb[10].mxu1 %vm381_vm0, %v4347_v6  ;;  %v2002_v9 = vmul.f32 0.5, %v4086_v55  ;;  %v2371_v10 = vadd.f32 1.0, %v4096_v61 }
  0x4c   : > { %v1658_v11 = vsub.f32 1.0, %v1654_v56  ;;  %v1660_v12 = vsub.f32 1.0, %v1656_v2  ;;  %1757 = vmatprep.mubr.f32.mxu1 %v4217_v0  ;;  %v1818_v13 = vmin.f32 %v1817_v3, 15.0  ;;  %v4092_v14 = vadd.f32 -1.0, %v2186_v4 }
  0x4d   : > { %v1663_v15 = vmax.f32 %v1659_v5, 0.0  ;;  %v1665_v16 = vmax.f32 %v1661_v7, 0.0  ;;  %v2003_v17 = vmax.f32 %v2002_v9, 0.0  ;;  %v2372_v18 = vmul.f32 16.0, %v2371_v10 }
  0x4e   : > { %v1662_v19 = vmax.f32 %v1658_v11, 0.0  ;;  %v1664_v20 = vmax.f32 %v1660_v12, 0.0  ;;  %4070 = vmatmul.mubr.msk.f32.vlgmr.msra.gmra.mrb[12].mxu0 %vm381_vm0, %v4336_v46  ;;  %v1833_v22 = vrot.slane %v1818_v13, %v4287_v21  ;;  %v1829_v23 = vrot.slane %v1818_v13, %v4294_v29  ;;  %v4102_v5 = vld [vmem:[%s4269_s23 + $0x14] ss:$8 sm:$0x3] }
  0x4f   : > { %v4162_v24 = vpack.c.bf16 %v1665_v16, %v1663_v15  ;;  %v2004_v25 = vmin.f32 %v2003_v17, 15.0  ;;  %1577 = vmatprep.mubr.f32.mxu0 %v4217_v0  ;;  %v2188_v26 = vmul.f32 0.5, %v4092_v14  ;;  %v4098_v27 = vadd.f32 -1.0, %v2372_v18  ;;  %v4108_v12 = vld [vmem:[%s4269_s23 + $0x15] ss:$8 sm:$0x3] }
  0x50   : > { %v4164_v30 = vpack.c.bf16 %v1664_v20, %v1662_v19  ;;  %v1837_v31 = vsub.f32 %v4291_v28, %v1833_v22  ;;  %v1839_v32 = vsub.f32 %v4297_v37, %v1833_v22  ;;  %v1836_v57 = vsub.f32 %v4291_v28, %v1829_v23 }
  0x51   : > { %4163 = vmatprep.subr.bf16.mxu1 %v4162_v24  ;;  %v2019_v33 = vrot.slane %v2004_v25, %v4287_v21  ;;  %v1838_v34 = vsub.f32 %v4297_v37, %v1829_v23  ;;  %v2015_v35 = vrot.slane %v2004_v25, %v4294_v29  ;;  %v2189_v36 = vmax.f32 %v2188_v26, 0.0 }
  0x52   : > { %4165 = vmatpush1.bf16.msra.mxu1 %v4164_v30  ;;  %v1841_v38 = vand.u32 2147483647, %v1837_v31  ;;  %v1843_v39 = vand.u32 2147483647, %v1839_v32  ;;  %v1840_v40 = vand.u32 2147483647, %v1836_v57  ;;  %4071 = vmatmul.mubr.msk.f32.gmra.mrb[14].mxu0 %vm381_vm0, %v4347_v6 }
  0x53   : > { %v2023_v41 = vsub.f32 %v4291_v28, %v2019_v33  ;;  %v2025_v42 = vsub.f32 %v4297_v37, %v2019_v33  ;;  %v1842_v48 = vand.u32 2147483647, %v1838_v34  ;;  %v2022_v43 = vsub.f32 %v4291_v28, %v2015_v35  ;;  %1943 = vmatprep.mubr.f32.mxu0 %v4217_v0 }
  0x54   : > { %v1845_v44 = vsub.f32 1.0, %v1841_v38  ;;  %v1847_v45 = vsub.f32 1.0, %v1843_v39  ;;  %v1844_v49 = vsub.f32 1.0, %v1840_v40  ;;  %v2024_v47 = vsub.f32 %v4297_v37, %v2015_v35 }
  0x55   : > { %4076 = vmatmul.mubr.msk.f32.vlgmr.msra.gmra.mrb[12].mxu1 %vm381_vm0, %v4336_v46  ;;  %v2027_v50 = vand.u32 2147483647, %v2023_v41  ;;  %v2029_v51 = vand.u32 2147483647, %v2025_v42  ;;  %v1846_v52 = vsub.f32 1.0, %v1842_v48  ;;  %v2190_v53 = vmin.f32 %v2189_v36, 15.0 }
  0x56   : > { %v1849_v58 = vmax.f32 %v1845_v44, 0.0  ;;  %v1851_v59 = vmax.f32 %v1847_v45, 0.0  ;;  %v1848_v60 = vmax.f32 %v1844_v49, 0.0  ;;  %v2026_v61 = vand.u32 2147483647, %v2022_v43  ;;  %1763 = vmatprep.mubr.f32.mxu1 %v4217_v0 }
  0x57   : > { %v2031_v54 = vsub.f32 1.0, %v2027_v50  ;;  %v2033_v62 = vsub.f32 1.0, %v2029_v51  ;;  %v1850_v63 = vmax.f32 %v1846_v52, 0.0  ;;  %v2028_v55 = vand.u32 2147483647, %v2024_v47 }
  0x58   : > { %v4166_v56 = vpack.c.bf16 %v1851_v59, %v1849_v58  ;;  %v2030_v2 = vsub.f32 1.0, %v2026_v61  ;;  %v2205_v3 = vrot.slane %v2190_v53, %v4287_v21  ;;  %v2374_v4 = vmul.f32 0.5, %v4098_v27  ;;  %v4114_v47 = vld [vmem:[%s4269_s23 + $0x16] ss:$8 sm:$0x3] }
  0x59   : > { %v2035_v7 = vmax.f32 %v2031_v54, 0.0  ;;  %v2037_v9 = vmax.f32 %v2033_v62, 0.0  ;;  %v4168_v10 = vpack.c.bf16 %v1850_v63, %v1848_v60  ;;  %v2032_v11 = vsub.f32 1.0, %v2028_v55  ;;  %4077 = vmatmul.mubr.msk.f32.gmra.mrb[14].mxu1 %vm381_vm0, %v4347_v6  ;;  %v4120_v58 = vld [vmem:[%s4269_s23 + $0x17] ss:$8 sm:$0x3] }
  0x5a   : > { %4167 = vmatprep.subr.bf16.mxu0 %v4166_v56  ;;  %v2034_v13 = vmax.f32 %v2030_v2, 0.0  ;;  %2129 = vmatprep.mubr.f32.mxu1 %v4217_v0  ;;  %v2209_v14 = vsub.f32 %v4291_v28, %v2205_v3  ;;  %v2211_v15 = vsub.f32 %v4297_v37, %v2205_v3  ;;  %v2375_v16 = vmax.f32 %v2374_v4, 0.0 }
  0x5b   : > { %v4170_v17 = vpack.c.bf16 %v2037_v9, %v2035_v7  ;;  %4169 = vmatpush1.bf16.msra.mxu0 %v4168_v10  ;;  %v2036_v18 = vmax.f32 %v2032_v11, 0.0  ;;  %v2201_v19 = vrot.slane %v2190_v53, %v4294_v29  ;;  %v2557_v20 = vadd.f32 1.0, %v4102_v5 }
  0x5c   : > { %v2213_v22 = vand.u32 2147483647, %v2209_v14  ;;  %v2215_v23 = vand.u32 2147483647, %v2211_v15  ;;  %v2376_v24 = vmin.f32 %v2375_v16, 15.0  ;;  %v2743_v25 = vadd.f32 1.0, %v4108_v12 }
  0x5d   : > { %4171 = vmatprep.subr.bf16.mxu1 %v4170_v17  ;;  %v4172_v26 = vpack.c.bf16 %v2036_v18, %v2034_v13  ;;  %v2208_v27 = vsub.f32 %v4291_v28, %v2201_v19  ;;  %v2210_v30 = vsub.f32 %v4297_v37, %v2201_v19  ;;  %v2558_v31 = vmul.f32 16.0, %v2557_v20 }
  0x5e   : > { %4082 = vmatmul.mubr.msk.f32.vlgmr.msra.gmra.mrb[16].mxu0 %vm381_vm0, %v4336_v46  ;;  %v2217_v32 = vsub.f32 1.0, %v2213_v22  ;;  %v2219_v57 = vsub.f32 1.0, %v2215_v23  ;;  %v2391_v33 = vrot.slane %v2376_v24, %v4287_v21  ;;  %v2387_v34 = vrot.slane %v2376_v24, %v4294_v29 }
  0x5f   : > { %4173 = vmatpush1.bf16.msra.mxu1 %v4172_v26  ;;  %v2212_v35 = vand.u32 2147483647, %v2208_v27  ;;  %v2214_v36 = vand.u32 2147483647, %v2210_v30  ;;  %1949 = vmatprep.mubr.f32.mxu0 %v4217_v0  ;;  %v4104_v38 = vadd.f32 -1.0, %v2558_v31  ;;  %v2744_v39 = vmul.f32 16.0, %v2743_v25 }
  0x60   : > { %v2221_v40 = vmax.f32 %v2217_v32, 0.0  ;;  %v2223_v41 = vmax.f32 %v2219_v57, 0.0  ;;  %v2395_v42 = vsub.f32 %v4291_v28, %v2391_v33  ;;  %v2397_v48 = vsub.f32 %v4297_v37, %v2391_v33 }
  0x61   : > { %v2216_v43 = vsub.f32 1.0, %v2212_v35  ;;  %v2218_v44 = vsub.f32 1.0, %v2214_v36  ;;  %v2394_v45 = vsub.f32 %v4291_v28, %v2387_v34  ;;  %v2396_v49 = vsub.f32 %v4297_v37, %v2387_v34 }
  0x62   : > { %4088 = vmatmul.mubr.msk.f32.vlgmr.msra.gmra.mrb[16].mxu1 %vm381_vm0, %v4336_v46  ;;  %v4174_v50 = vpack.c.bf16 %v2223_v41, %v2221_v40  ;;  %v2399_v51 = vand.u32 2147483647, %v2395_v42  ;;  %v2401_v52 = vand.u32 2147483647, %v2397_v48  ;;  %4083 = vmatmul.mubr.msk.f32.gmra.mrb[18].mxu0 %vm381_vm0, %v4347_v6  ;;  %v2560_v53 = vmul.f32 0.5, %v4104_v38 }
  0x63   : > { %v2220_v59 = vmax.f32 %v2216_v43, 0.0  ;;  %v2222_v60 = vmax.f32 %v2218_v44, 0.0  ;;  %v2398_v61 = vand.u32 2147483647, %v2394_v45  ;;  %v2400_v54 = vand.u32 2147483647, %v2396_v49  ;;  %2135 = vmatprep.mubr.f32.mxu1 %v4217_v0  ;;  %2315 = vmatprep.mubr.f32.mxu0 %v4217_v0 }
  0x64   : > { %4175 = vmatprep.subr.bf16.mxu0 %v4174_v50  ;;  %v2403_v62 = vsub.f32 1.0, %v2399_v51  ;;  %v2405_v63 = vsub.f32 1.0, %v2401_v52  ;;  %v2561_v55 = vmax.f32 %v2560_v53, 0.0  ;;  %v4110_v56 = vadd.f32 -1.0, %v2744_v39 }
  0x65   : > { %v4176_v2 = vpack.c.bf16 %v2222_v60, %v2220_v59  ;;  %v2402_v3 = vsub.f32 1.0, %v2398_v61  ;;  %v2404_v4 = vsub.f32 1.0, %v2400_v54  ;;  %v2929_v5 = vadd.f32 1.0, %v4114_v47 }
  0x66   : > { %v2407_v7 = vmax.f32 %v2403_v62, 0.0  ;;  %v2409_v9 = vmax.f32 %v2405_v63, 0.0  ;;  %4089 = vmatmul.mubr.msk.f32.gmra.mrb[18].mxu1 %vm381_vm0, %v4347_v6  ;;  %v2562_v10 = vmin.f32 %v2561_v55, 15.0  ;;  %v2746_v11 = vmul.f32 0.5, %v4110_v56 }
  0x67   : > { %4177 = vmatpush1.bf16.msra.mxu0 %v4176_v2  ;;  %v2406_v12 = vmax.f32 %v2402_v3, 0.0  ;;  %v2408_v13 = vmax.f32 %v2404_v4, 0.0  ;;  %2501 = vmatprep.mubr.f32.mxu1 %v4217_v0  ;;  %v2930_v14 = vmul.f32 16.0, %v2929_v5  ;;  %v3115_v15 = vadd.f32 1.0, %v4120_v58 }
  0x68   : > { %v4178_v16 = vpack.c.bf16 %v2409_v9, %v2407_v7  ;;  %v2577_v17 = vrot.slane %v2562_v10, %v4287_v21  ;;  %v2747_v18 = vmax.f32 %v2746_v11, 0.0  ;;  %v2573_v19 = vrot.slane %v2562_v10, %v4294_v29 }
  0x69   : > { %v4180_v20 = vpack.c.bf16 %v2408_v13, %v2406_v12  ;;  %v4116_v22 = vadd.f32 -1.0, %v2930_v14  ;;  %v3116_v23 = vmul.f32 16.0, %v3115_v15 }
  0x6a   : > { %4179 = vmatprep.subr.bf16.mxu1 %v4178_v16  ;;  %4094 = vmatmul.mubr.msk.f32.vlgmr.msra.gmra.mrb[20].mxu0 %vm381_vm0, %v4336_v46  ;;  %v2581_v24 = vsub.f32 %v4291_v28, %v2577_v17  ;;  %v2583_v25 = vsub.f32 %v4297_v37, %v2577_v17  ;;  %v2748_v26 = vmin.f32 %v2747_v18, 15.0  ;;  %v2580_v27 = vsub.f32 %v4291_v28, %v2573_v19 }
  0x6b   : > { %4181 = vmatpush1.bf16.msra.mxu1 %v4180_v20  ;;  %v2582_v30 = vsub.f32 %v4297_v37, %v2573_v19  ;;  %2321 = vmatprep.mubr.f32.mxu0 %v4217_v0  ;;  %v2932_v31 = vmul.f32 0.5, %v4116_v22  ;;  %v4122_v32 = vadd.f32 -1.0, %v3116_v23 }
  0x6c   : > { %v2585_v57 = vand.u32 2147483647, %v2581_v24  ;;  %v2587_v33 = vand.u32 2147483647, %v2583_v25  ;;  %v2763_v34 = vrot.slane %v2748_v26, %v4287_v21  ;;  %v2584_v35 = vand.u32 2147483647, %v2580_v27 }
  0x6d   : > { %v2586_v36 = vand.u32 2147483647, %v2582_v30  ;;  %v2759_v38 = vrot.slane %v2748_v26, %v4294_v29  ;;  %v2933_v39 = vmax.f32 %v2932_v31, 0.0  ;;  %v3118_v40 = vmul.f32 0.5, %v4122_v32 }
  0x6e   : > { %4100 = vmatmul.mubr.msk.f32.vlgmr.msra.gmra.mrb[20].mxu1 %vm381_vm0, %v4336_v46  ;;  %v2589_v41 = vsub.f32 1.0, %v2585_v57  ;;  %v2591_v42 = vsub.f32 1.0, %v2587_v33  ;;  %v2767_v48 = vsub.f32 %v4291_v28, %v2763_v34  ;;  %v2769_v43 = vsub.f32 %v4297_v37, %v2763_v34  ;;  %4095 = vmatmul.mubr.msk.f32.gmra.mrb[22].mxu0 %vm381_vm0, %v4347_v6 }
  0x6f   : > { %v2588_v44 = vsub.f32 1.0, %v2584_v35  ;;  %v2590_v45 = vsub.f32 1.0, %v2586_v36  ;;  %v2766_v49 = vsub.f32 %v4291_v28, %v2759_v38  ;;  %v2768_v47 = vsub.f32 %v4297_v37, %v2759_v38  ;;  %2507 = vmatprep.mubr.f32.mxu1 %v4217_v0  ;;  %2687 = vmatprep.mubr.f32.mxu0 %v4217_v0 }
  0x70   : > { %v2593_v50 = vmax.f32 %v2589_v41, 0.0  ;;  %v2595_v51 = vmax.f32 %v2591_v42, 0.0  ;;  %v2771_v52 = vand.u32 2147483647, %v2767_v48  ;;  %v2773_v53 = vand.u32 2147483647, %v2769_v43 }
  0x71   : > { %v2592_v58 = vmax.f32 %v2588_v44, 0.0  ;;  %v2594_v59 = vmax.f32 %v2590_v45, 0.0  ;;  %v2770_v60 = vand.u32 2147483647, %v2766_v49  ;;  %v2772_v61 = vand.u32 2147483647, %v2768_v47 }
  0x72   : > { %v4182_v54 = vpack.c.bf16 %v2595_v51, %v2593_v50  ;;  %v2775_v62 = vsub.f32 1.0, %v2771_v52  ;;  %v2777_v63 = vsub.f32 1.0, %v2773_v53  ;;  %4101 = vmatmul.mubr.msk.f32.gmra.mrb[22].mxu1 %vm381_vm0, %v4347_v6  ;;  %v2934_v55 = vmin.f32 %v2933_v39, 15.0 }
  0x73   : > { %v4184_v56 = vpack.c.bf16 %v2594_v59, %v2592_v58  ;;  %v2774_v2 = vsub.f32 1.0, %v2770_v60  ;;  %v2776_v3 = vsub.f32 1.0, %v2772_v61  ;;  %2873 = vmatprep.mubr.f32.mxu1 %v4217_v0  ;;  %v3119_v4 = vmax.f32 %v3118_v40, 0.0 }
  0x74   : > { %4183 = vmatprep.subr.bf16.mxu0 %v4182_v54  ;;  %v2779_v5 = vmax.f32 %v2775_v62, 0.0  ;;  %v2781_v7 = vmax.f32 %v2777_v63, 0.0  ;;  %v2949_v9 = vrot.slane %v2934_v55, %v4287_v21  ;;  %v2945_v10 = vrot.slane %v2934_v55, %v4294_v29  ;;  %v314_v54 = vld [vmem:[%s4527_s8] ss:$8 sm:$0x3] }
  0x75   : > { %4185 = vmatpush1.bf16.msra.mxu0 %v4184_v56  ;;  %v2778_v11 = vmax.f32 %v2774_v2, 0.0  ;;  %v2780_v12 = vmax.f32 %v2776_v3, 0.0  ;;  %v3120_v13 = vmin.f32 %v3119_v4, 15.0  ;;  %v321_v62 = vadd.f32 1.0, %v314_v54 }
  0x76   : > { %v4186_v14 = vpack.c.bf16 %v2781_v7, %v2779_v5  ;;  %v2953_v15 = vsub.f32 %v4291_v28, %v2949_v9  ;;  %v2955_v16 = vsub.f32 %v4297_v37, %v2949_v9  ;;  %v2952_v17 = vsub.f32 %v4291_v28, %v2945_v10  ;;  %v4043_v4 = vld [vmem:[%s4527_s8 + $0x2] ss:$8 sm:$0x3] }
  0x77   : > { %v4188_v18 = vpack.c.bf16 %v2780_v12, %v2778_v11  ;;  %v3135_v19 = vrot.slane %v3120_v13, %v4287_v21  ;;  %v2954_v20 = vsub.f32 %v4297_v37, %v2945_v10  ;;  %v3131_v22 = vrot.slane %v3120_v13, %v4294_v29 }
  0x78   : > { %4187 = vmatprep.subr.bf16.mxu1 %v4186_v14  ;;  %4106 = vmatmul.mubr.msk.f32.vlgmr.msra.gmra.mrb[24].mxu0 %vm381_vm0, %v4336_v46  ;;  %v2957_v23 = vand.u32 2147483647, %v2953_v15  ;;  %v2959_v24 = vand.u32 2147483647, %v2955_v16  ;;  %v2956_v25 = vand.u32 2147483647, %v2952_v17 }
  0x79   : > { %4189 = vmatpush1.bf16.msra.mxu1 %v4188_v18  ;;  %v3139_v26 = vsub.f32 %v4291_v28, %v3135_v19  ;;  %v3141_v27 = vsub.f32 %v4297_v37, %v3135_v19  ;;  %v2958_v30 = vand.u32 2147483647, %v2954_v20  ;;  %v3138_v31 = vsub.f32 %v4291_v28, %v3131_v22  ;;  %2693 = vmatprep.mubr.f32.mxu0 %v4217_v0  ;;  %v4055_v20 = vld [vmem:[%s4527_s8 + $0x4] ss:$8 sm:$0x3] }
  0x7a   : > { %v2961_v32 = vsub.f32 1.0, %v2957_v23  ;;  %v2963_v57 = vsub.f32 1.0, %v2959_v24  ;;  %v2960_v33 = vsub.f32 1.0, %v2956_v25  ;;  %v3140_v34 = vsub.f32 %v4297_v37, %v3131_v22  ;;  %v4061_v22 = vld [vmem:[%s4527_s8 + $0x5] ss:$8 sm:$0x3] }
  0x7b   : > { %v3143_v35 = vand.u32 2147483647, %v3139_v26  ;;  %v3145_v36 = vand.u32 2147483647, %v3141_v27  ;;  %v2962_v38 = vsub.f32 1.0, %v2958_v30  ;;  %v322_v55 = vmul.f32 16.0, %v321_v62 }
  0x7c   : > { %4112 = vmatmul.mubr.msk.f32.vlgmr.msra.gmra.mrb[24].mxu1 %vm381_vm0, %v4336_v46  ;;  %v2965_v39 = vmax.f32 %v2961_v32, 0.0  ;;  %v2967_v40 = vmax.f32 %v2963_v57, 0.0  ;;  %v2964_v41 = vmax.f32 %v2960_v33, 0.0  ;;  %v3142_v42 = vand.u32 2147483647, %v3138_v31  ;;  %4107 = vmatmul.mubr.msk.f32.gmra.mrb[26].mxu0 %vm381_vm0, %v4347_v6 }
  0x7d   : > { %v3147_v48 = vsub.f32 1.0, %v3143_v35  ;;  %v3149_v43 = vsub.f32 1.0, %v3145_v36  ;;  %v2966_v44 = vmax.f32 %v2962_v38, 0.0  ;;  %v3144_v45 = vand.u32 2147483647, %v3140_v34  ;;  %2879 = vmatprep.mubr.f32.mxu1 %v4217_v0  ;;  %3059 = vmatprep.mubr.f32.mxu0 %v4217_v0 }
  0x7e   : > { %v4190_v49 = vpack.c.bf16 %v2967_v40, %v2965_v39  ;;  %v3146_v47 = vsub.f32 1.0, %v3142_v42  ;;  %v4033_v2 = vadd.f32 -1.0, %v322_v55  ;;  %v704_v7 = vadd.f32 1.0, %v4043_v4 }
  0x7f   : > { %v3151_v50 = vmax.f32 %v3147_v48, 0.0  ;;  %v3153_v51 = vmax.f32 %v3149_v43, 0.0  ;;  %v4192_v52 = vpack.c.bf16 %v2966_v44, %v2964_v41  ;;  %v3148_v53 = vsub.f32 1.0, %v3144_v45 }
  0x80   : > { %4191 = vmatprep.subr.bf16.mxu0 %v4190_v49  ;;  %v3150_v58 = vmax.f32 %v3146_v47, 0.0  ;;  %4113 = vmatmul.mubr.msk.f32.gmra.mrb[26].mxu1 %vm381_vm0, %v4347_v6  ;;  %v324_v3 = vmul.f32 0.5, %v4033_v2  ;;  %v4218_v11 = vmov 3.4028235e+38   ;;  %v705_v13 = vmul.f32 16.0, %v704_v7 }
  0x81   : > { %v4194_v59 = vpack.c.bf16 %v3153_v51, %v3151_v50  ;;  %4193 = vmatpush1.bf16.msra.mxu0 %v4192_v52  ;;  %v3152_v60 = vmax.f32 %v3148_v53, 0.0  ;;  %3245 = vmatprep.mubr.f32.mxu1 %v4217_v0  ;;  %305 = vst [vmem:[#allocation2 + $0x10] sm:$0xf0] %v4218_v11  ;;  %306 = vst [vmem:[#allocation2 + $0x18] sm:$0xf0] %v4218_v11  ;;  %v1076_v27 = vadd.f32 1.0, %v4055_v20 }
  0x82   : > { %v325_v9 = vmax.f32 %v324_v3, 0.0  ;;  %307 = vst [vmem:[#allocation3 + $0x10] sm:$0xf0] %v4218_v11  ;;  %308 = vst [vmem:[#allocation3 + $0x18] sm:$0xf0] %v4218_v11  ;;  %v4045_v17 = vadd.f32 -1.0, %v705_v13 }
  0x83   : > { %4195 = vmatprep.subr.bf16.mxu1 %v4194_v59  ;;  %v4196_v61 = vpack.c.bf16 %v3152_v60, %v3150_v58  ;;  %v1261_v30 = vadd.f32 1.0, %v4061_v22  ;;  %v1077_v38 = vmul.f32 16.0, %v1076_v27  ;;  %v4067_v60 = vld [vmem:[%s4527_s8 + $0x6] ss:$8 sm:$0x3] }
  0x84   : > { %4118 = vmatmul.mubr.msk.f32.vlgmr.msra.gmra.mrb[28].mxu0 %vm381_vm0, %v4336_v46  ;;  %v326_v14 = vmin.f32 %v325_v9, 15.0  ;;  %v707_v25 = vmul.f32 0.5, %v4045_v17  ;;  %v1447_v4 = vadd.f32 1.0, %v4067_v60 }
  0x85   : > { %4197 = vmatpush1.bf16.msra.mxu1 %v4196_v61  ;;  %3065 = vmatprep.mubr.f32.mxu0 %v4217_v0  ;;  %v1262_v39 = vmul.f32 16.0, %v1261_v30  ;;  %v4057_v49 = vadd.f32 -1.0, %v1077_v38  ;;  %v4073_v61 = vld [vmem:[%s4527_s8 + $0x7] ss:$8 sm:$0x3] }
  0x86   : > { %v358_v18 = vrot.slane %v326_v14, %v4294_v29  ;;  %v362_v24 = vrot.slane %v326_v14, %v4287_v21  ;;  %v708_v35 = vmax.f32 %v707_v25, 0.0  ;;  %v1448_v20 = vmul.f32 16.0, %v1447_v4 }
  0x87   : > { %v4063_v47 = vadd.f32 -1.0, %v1262_v39  ;;  %v4219_v30 = vmov 1966171168  }
  0x88   : > { %4124 = vmatmul.mubr.msk.f32.vlgmr.msra.gmra.mrb[28].mxu1 %vm381_vm0, %v4336_v46  ;;  %4119 = vmatmul.mubr.msk.f32.gmra.mrb[30].mxu0 %vm381_vm0, %v4347_v6  ;;  %v4037_v46 = vld [vmem:[%s4527_s8 + $0x1] ss:$8 sm:$0x3]  ;;  %v365_v26 = vsub.f32 %v4291_v28, %v358_v18  ;;  %v367_v32 = vsub.f32 %v4297_v37, %v358_v18  ;;  %v366_v34 = vsub.f32 %v4291_v28, %v362_v24  ;;  %v709_v44 = vmin.f32 %v708_v35, 15.0 }
  0x89   : > { %3251 = vmatprep.mubr.f32.mxu1 %v4217_v0  ;;  %v518_v63 = vadd.f32 1.0, %v4037_v46  ;;  %v368_v58 = vsub.f32 %v4297_v37, %v362_v24  ;;  %v1264_v2 = vmul.f32 0.5, %v4063_v47 }
  0x8a   : > { %v369_v36 = vand.u32 2147483647, %v365_v26  ;;  %v371_v41 = vand.u32 2147483647, %v367_v32  ;;  %v370_v43 = vand.u32 2147483647, %v366_v34  ;;  %v741_v46 = vrot.slane %v709_v44, %v4294_v29 }
  0x8b   : > { %v519_v56 = vmul.f32 16.0, %v518_v63  ;;  %v745_v55 = vrot.slane %v709_v44, %v4287_v21  ;;  %v372_v7 = vand.u32 2147483647, %v368_v58  ;;  %v1265_v17 = vmax.f32 %v1264_v2, 0.0 }
  0x8c   : > { %4125 = vmatmul.mubr.msk.f32.gmra.mrb[30].mxu1 %vm381_vm0, %v4347_v6  ;;  %v4049_v6 = vld [vmem:[%s4527_s8 + $0x3] ss:$8 sm:$0x3]  ;;  %v373_v45 = vsub.f32 1.0, %v369_v36  ;;  %v375_v51 = vsub.f32 1.0, %v371_v41  ;;  %v374_v62 = vsub.f32 1.0, %v370_v43  ;;  %v748_v13 = vsub.f32 %v4291_v28, %v741_v46 }
  0x8d   : > { %v4039_v0 = vadd.f32 -1.0, %v519_v56  ;;  %v890_v10 = vadd.f32 1.0, %v4049_v6  ;;  %v1079_v56 = vmul.f32 0.5, %v4057_v49  ;;  %v1633_v6 = vadd.f32 1.0, %v4073_v61 }
  0x8e   : > { %v4550_v63 = vmax.f32 %v373_v45, 0.0  ;;  %v376_v25 = vsub.f32 1.0, %v372_v7  ;;  %v752_v32 = vand.u32 2147483647, %v748_v13  ;;  %v1266_v36 = vmin.f32 %v1265_v17, 15.0 }
  0x8f   : > { %v521_v5 = vmul.f32 0.5, %v4039_v0  ;;  %v891_v15 = vmul.f32 16.0, %v890_v10  ;;  %v4553_v0 = vmax.f32 %v375_v51, 0.0  ;;  %v1634_v22 = vmul.f32 16.0, %v1633_v6 }
  0x90   : > { %v4069_v41 = vadd.f32 -1.0, %v1448_v20  ;;  %v751_v45 = vsub.f32 %v4297_v37, %v745_v55  ;;  %v756_v49 = vsub.f32 1.0, %v752_v32  ;;  %v1298_v58 = vrot.slane %v1266_v36, %v4294_v29 }
  0x91   : > { %v522_v12 = vmax.f32 %v521_v5, 0.0  ;;  %v4051_v19 = vadd.f32 -1.0, %v891_v15  ;;  %v749_v15 = vsub.f32 %v4291_v28, %v745_v55  ;;  %v1302_v2 = vrot.slane %v1266_v36, %v4287_v21 }
  0x92   : > { %v4586_v4 = vmax.f32 %v756_v49, 0.0  ;;  %v1305_v13 = vsub.f32 %v4291_v28, %v1298_v58  ;;  %v4097_v49 = vld [vmem:[%s4527_s8 + $0x13] ss:$8 sm:$0x3] }
  0x93   : > { %v523_v16 = vmin.f32 %v522_v12, 15.0  ;;  %v893_v57 = vmul.f32 0.5, %v4051_v19  ;;  %v4558_v12 = vmax.f32 %v374_v62, 0.0  ;;  %v750_v19 = vsub.f32 %v4297_v37, %v741_v46 }
  0x94   : > { %v753_v34 = vand.u32 2147483647, %v749_v15 }
  0x95   : > { %v555_v23 = vrot.slane %v523_v16, %v4294_v29  ;;  %v559_v31 = vrot.slane %v523_v16, %v4287_v21  ;;  %v894_v42 = vmax.f32 %v893_v57, 0.0  ;;  %v1080_v16 = vmax.f32 %v1079_v56, 0.0 }
  0x96   : > { %v755_v56 = vand.u32 2147483647, %v751_v45 }
  0x97   : > { %v562_v33 = vsub.f32 %v4291_v28, %v555_v23  ;;  %v563_v40 = vsub.f32 %v4291_v28, %v559_v31  ;;  %v564_v52 = vsub.f32 %v4297_v37, %v555_v23  ;;  %v895_v53 = vmin.f32 %v894_v42, 15.0  ;;  %v4079_v23 = vld [vmem:[%s4527_s8 + $0x10] ss:$8 sm:$0x3] }
  0x98   : > { %v565_v59 = vsub.f32 %v4297_v37, %v559_v31  ;;  %v4568_v31 = vunpack.c.l.s4 %v4219_v30  ;;  %v1081_v35 = vmin.f32 %v1080_v16, 15.0  ;;  %v1819_v38 = vadd.f32 1.0, %v4079_v23 }
  0x99   : > { %v566_v48 = vand.u32 2147483647, %v562_v33  ;;  %v567_v50 = vand.u32 2147483647, %v563_v40  ;;  %v568_v3 = vand.u32 2147483647, %v564_v52  ;;  %v927_v10 = vrot.slane %v895_v53, %v4294_v29 }
  0x9a   : > { %v569_v9 = vand.u32 2147483647, %v565_v59  ;;  %v931_v14 = vrot.slane %v895_v53, %v4287_v21  ;;  %v754_v40 = vand.u32 2147483647, %v750_v19  ;;  %v4075_v42 = vadd.f32 -1.0, %v1634_v22 }
  0x9b   : > { %v570_v54 = vsub.f32 1.0, %v566_v48  ;;  %v571_v5 = vsub.f32 1.0, %v567_v50  ;;  %v572_v18 = vsub.f32 1.0, %v568_v3  ;;  %v934_v27 = vsub.f32 %v4291_v28, %v927_v10  ;;  %v4085_v3 = vld [vmem:[%s4527_s8 + $0x11] ss:$8 sm:$0x3] }
  0x9c   : > { %v573_v26 = vsub.f32 1.0, %v569_v9  ;;  %v935_v57 = vsub.f32 %v4291_v28, %v931_v14  ;;  %v936_v33 = vsub.f32 %v4297_v37, %v927_v10  ;;  %v4574_v48 = vmax.f32 %v376_v25, 0.0 }
  0x9d   : > { %v4556_v11 = vmax.f32 %v570_v54, 0.0  ;;  %v4565_v24 = vmax.f32 %v571_v5, 0.0  ;;  %v4572_v39 = vmax.f32 %v572_v18, 0.0  ;;  %v938_v44 = vand.u32 2147483647, %v934_v27 }
  0x9e   : > { %v4576_v43 = vmax.f32 %v573_v26, 0.0  ;;  %v939_v47 = vand.u32 2147483647, %v935_v57  ;;  %v940_v50 = vand.u32 2147483647, %v936_v33  ;;  %v937_v51 = vsub.f32 %v4297_v37, %v931_v14 }
  0x9f   : > { %v757_v52 = vsub.f32 1.0, %v753_v34  ;;  %v1113_v53 = vrot.slane %v1081_v35, %v4294_v29  ;;  %v1820_v59 = vmul.f32 16.0, %v1819_v38  ;;  %v758_v60 = vsub.f32 1.0, %v754_v40 }
  0xa0   : > { %v1117_v61 = vrot.slane %v1081_v35, %v4287_v21  ;;  %v1450_v54 = vmul.f32 0.5, %v4069_v41  ;;  %v1636_v62 = vmul.f32 0.5, %v4075_v42  ;;  %v488_v46 = vunpack.c.0.s8 %v4568_v31  ;;  %v4091_v31 = vld [vmem:[%s4527_s8 + $0x12] ss:$8 sm:$0x3] }
  0xa1   : > { %v942_v55 = vsub.f32 1.0, %v938_v44  ;;  %v943_v6 = vsub.f32 1.0, %v939_v47  ;;  %v944_v5 = vsub.f32 1.0, %v940_v50  ;;  %v941_v7 = vand.u32 2147483647, %v937_v51 }
  0xa2   : > { %v4588_v9 = vmax.f32 %v757_v52, 0.0  ;;  %v1120_v10 = vsub.f32 %v4291_v28, %v1113_v53  ;;  %v4081_v14 = vadd.f32 -1.0, %v1820_v59  ;;  %v1121_v15 = vsub.f32 %v4291_v28, %v1117_v61 }
  0xa3   : > { %v1451_v16 = vmax.f32 %v1450_v54, 0.0  ;;  %v1637_v17 = vmax.f32 %v1636_v62, 0.0  ;;  %v2005_v18 = vadd.f32 1.0, %v4085_v3  ;;  %v4593_v19 = vmax.f32 %v942_v55, 0.0 }
  0xa4   : > { %v4595_v20 = vmax.f32 %v758_v60, 0.0  ;;  %v759_v22 = vsub.f32 1.0, %v755_v56  ;;  %v1306_v23 = vsub.f32 %v4291_v28, %v1302_v2  ;;  %v4598_v25 = vmax.f32 %v943_v6, 0.0 }
  0xa5   : > { %v945_v26 = vsub.f32 1.0, %v941_v7  ;;  %v1122_v27 = vsub.f32 %v4297_v37, %v1113_v53  ;;  %v1307_v30 = vsub.f32 %v4297_v37, %v1298_v58  ;;  %v4603_v32 = vmax.f32 %v944_v5, 0.0 }
  0xa6   : > { %v1124_v57 = vand.u32 2147483647, %v1120_v10  ;;  %v1309_v33 = vand.u32 2147483647, %v1305_v13  ;;  %v1822_v34 = vmul.f32 0.5, %v4081_v14  ;;  %v1452_v36 = vmin.f32 %v1451_v16, 15.0 }
  0xa7   : > { %v1125_v35 = vand.u32 2147483647, %v1121_v15  ;;  %v1638_v38 = vmin.f32 %v1637_v17, 15.0  ;;  %v2006_v40 = vmul.f32 16.0, %v2005_v18  ;;  %v4606_v41 = vsub.s32 %v488_v46, %v4280_v8 }
  0xa8   : > { %v4608_v42 = vmax.f32 %v759_v22, 0.0  ;;  %v1310_v44 = vand.u32 2147483647, %v1306_v23  ;;  %v1123_v45 = vsub.f32 %v4297_v37, %v1117_v61  ;;  %v4612_v47 = vmax.f32 %v945_v26, 0.0 }
  0xa9   : > { %v1126_v50 = vand.u32 2147483647, %v1122_v27  ;;  %v1311_v51 = vand.u32 2147483647, %v1307_v30  ;;  %v1308_v52 = vsub.f32 %v4297_v37, %v1302_v2  ;;  %v1128_v53 = vsub.f32 1.0, %v1124_v57 }
  0xaa   : > { %v1313_v58 = vsub.f32 1.0, %v1309_v33  ;;  %v1823_v59 = vmax.f32 %v1822_v34, 0.0  ;;  %v2191_v60 = vadd.f32 1.0, %v4091_v31  ;;  %v1129_v54 = vsub.f32 1.0, %v1125_v35 }
  0xab   : > { %v1484_v8 = vrot.slane %v1452_v36, %v4294_v29  ;;  %v1670_v62 = vrot.slane %v1638_v38, %v4294_v29  ;;  %v4087_v46 = vadd.f32 -1.0, %v2006_v40  ;;  %v1314_v55 = vsub.f32 1.0, %v1310_v44  ;;  %v4103_v31 = vld [vmem:[%s4527_s8 + $0x14] ss:$8 sm:$0x3] }
  0xac   : > { %v1127_v56 = vand.u32 2147483647, %v1123_v45  ;;  %v1488_v61 = vrot.slane %v1452_v36, %v4287_v21  ;;  %v2377_v3 = vadd.f32 1.0, %v4097_v49  ;;  %v1130_v6 = vsub.f32 1.0, %v1126_v50 }
  0xad   : > { %v1315_v5 = vsub.f32 1.0, %v1311_v51  ;;  %v1312_v7 = vand.u32 2147483647, %v1308_v52  ;;  %v1674_v2 = vrot.slane %v1638_v38, %v4287_v21  ;;  %v4619_v10 = vmax.f32 %v1128_v53, 0.0 }
  0xae   : > { %v4621_v13 = vmax.f32 %v1313_v58, 0.0  ;;  %v1824_v14 = vmin.f32 %v1823_v59, 15.0  ;;  %v2192_v15 = vmul.f32 16.0, %v2191_v60  ;;  %v4623_v16 = vmax.f32 %v1129_v54, 0.0 }
  0xaf   : > { %v1491_v17 = vsub.f32 %v4291_v28, %v1484_v8  ;;  %v1677_v18 = vsub.f32 %v4291_v28, %v1670_v62  ;;  %v2008_v22 = vmul.f32 0.5, %v4087_v46  ;;  %v4627_v23 = vmax.f32 %v1314_v55, 0.0 }
  0xb0   : > { %v1131_v26 = vsub.f32 1.0, %v1127_v56  ;;  %v1492_v27 = vsub.f32 %v4291_v28, %v1488_v61  ;;  %v2378_v30 = vmul.f32 16.0, %v2377_v3  ;;  %v4631_v57 = vmax.f32 %v1130_v6, 0.0  ;;  %v4109_v6 = vld [vmem:[%s4527_s8 + $0x15] ss:$8 sm:$0x3] }
  0xb1   : > { %v1316_v33 = vsub.f32 1.0, %v1312_v7  ;;  %v1678_v34 = vsub.f32 %v4291_v28, %v1674_v2  ;;  %v1493_v35 = vsub.f32 %v4297_v37, %v1484_v8  ;;  %v4635_v36 = vmax.f32 %v1315_v5, 0.0 }
  0xb2   : > { %v1679_v38 = vsub.f32 %v4297_v37, %v1670_v62  ;;  %v1856_v40 = vrot.slane %v1824_v14, %v4294_v29  ;;  %v4093_v44 = vadd.f32 -1.0, %v2192_v15  ;;  %v1495_v45 = vand.u32 2147483647, %v1491_v17 }
  0xb3   : > { %v1681_v49 = vand.u32 2147483647, %v1677_v18  ;;  %v2009_v50 = vmax.f32 %v2008_v22, 0.0  ;;  %v2563_v51 = vadd.f32 1.0, %v4103_v31  ;;  %v1496_v52 = vand.u32 2147483647, %v1492_v27 }
  0xb4   : > { %v1494_v53 = vsub.f32 %v4297_v37, %v1488_v61  ;;  %v1860_v58 = vrot.slane %v1824_v14, %v4287_v21  ;;  %v4099_v59 = vadd.f32 -1.0, %v2378_v30  ;;  %v4641_v60 = vmax.f32 %v1131_v26, 0.0 }
  0xb5   : > { %v4643_v54 = vmax.f32 %v1316_v33, 0.0  ;;  %v1682_v8 = vand.u32 2147483647, %v1678_v34  ;;  %v1497_v62 = vand.u32 2147483647, %v1493_v35  ;;  %v1680_v55 = vsub.f32 %v4297_v37, %v1674_v2 }
  0xb6   : > { %v1683_v46 = vand.u32 2147483647, %v1679_v38  ;;  %v1863_v56 = vsub.f32 %v4291_v28, %v1856_v40  ;;  %v2194_v3 = vmul.f32 0.5, %v4093_v44  ;;  %v1499_v5 = vsub.f32 1.0, %v1495_v45 }
  0xb7   : > { %v1685_v7 = vsub.f32 1.0, %v1681_v49  ;;  %v2010_v15 = vmin.f32 %v2009_v50, 15.0  ;;  %v2564_v61 = vmul.f32 16.0, %v2563_v51  ;;  %v1500_v17 = vsub.f32 1.0, %v1496_v52 }
  0xb8   : > { %v1498_v14 = vand.u32 2147483647, %v1494_v53  ;;  %v1864_v18 = vsub.f32 %v4291_v28, %v1860_v58  ;;  %v2380_v22 = vmul.f32 0.5, %v4099_v59  ;;  %v1686_v26 = vsub.f32 1.0, %v1682_v8 }
  0xb9   : > { %v1501_v27 = vsub.f32 1.0, %v1497_v62  ;;  %v1865_v30 = vsub.f32 %v4297_v37, %v1856_v40  ;;  %v1866_v31 = vsub.f32 %v4297_v37, %v1860_v58  ;;  %v1687_v2 = vsub.f32 1.0, %v1683_v46 }
  0xba   : > { %v1684_v33 = vand.u32 2147483647, %v1680_v55  ;;  %v1867_v34 = vand.u32 2147483647, %v1863_v56  ;;  %v2195_v35 = vmax.f32 %v2194_v3, 0.0  ;;  %v4651_v38 = vmax.f32 %v1499_v5, 0.0 }
  0xbb   : > { %v2042_v44 = vrot.slane %v2010_v15, %v4294_v29  ;;  %v4105_v45 = vadd.f32 -1.0, %v2564_v61  ;;  %v2749_v49 = vadd.f32 1.0, %v4109_v6  ;;  %v4654_v50 = vmax.f32 %v1685_v7, 0.0 }
  0xbc   : > { %v1868_v51 = vand.u32 2147483647, %v1864_v18  ;;  %v2046_v52 = vrot.slane %v2010_v15, %v4287_v21  ;;  %v2381_v53 = vmax.f32 %v2380_v22, 0.0  ;;  %v4657_v59 = vmax.f32 %v1500_v17, 0.0 }
  0xbd   : > { %5075 = vst [vmem:[#allocation4_spill] sm:$0xff] %v4654_v50  ;;  %v1502_v40 = vsub.f32 1.0, %v1498_v14  ;;  %v1869_v58 = vand.u32 2147483647, %v1865_v30  ;;  %v1870_v8 = vand.u32 2147483647, %v1866_v31  ;;  %v2049_v6 = vsub.f32 %v4291_v28, %v2042_v44 }
  0xbe   : > { %5076 = vst [vmem:[#allocation5_spill] sm:$0xff] %v4657_v59  ;;  %v4659_v62 = vmax.f32 %v1686_v26, 0.0  ;;  %v1688_v46 = vsub.f32 1.0, %v1684_v33  ;;  %v1871_v55 = vsub.f32 1.0, %v1867_v34  ;;  %v2196_v56 = vmin.f32 %v2195_v35, 15.0 }
  0xbf   : > { %v4661_v3 = vmax.f32 %v1501_v27, 0.0  ;;  %v2566_v5 = vmul.f32 0.5, %v4105_v45  ;;  %v2750_v7 = vmul.f32 16.0, %v2749_v49  ;;  %v4664_v15 = vmax.f32 %v1687_v2, 0.0 }
  0xc0   : > { %5077 = vst [vmem:[#allocation6_spill] sm:$0xff] %v4659_v62  ;;  %v1872_v61 = vsub.f32 1.0, %v1868_v51  ;;  %v2050_v17 = vsub.f32 %v4291_v28, %v2046_v52  ;;  %v2382_v14 = vmin.f32 %v2381_v53, 15.0  ;;  %v1873_v18 = vsub.f32 1.0, %v1869_v58 }
  0xc1   : > { %5078 = vst [vmem:[#allocation7_spill] sm:$0xff] %v4664_v15  ;;  %v2051_v22 = vsub.f32 %v4297_v37, %v2042_v44  ;;  %v1874_v26 = vsub.f32 1.0, %v1870_v8  ;;  %v2052_v30 = vsub.f32 %v4297_v37, %v2046_v52  ;;  %v4115_v31 = vld [vmem:[%s4527_s8 + $0x16] ss:$8 sm:$0x3]  ;;  %v4670_v27 = vmax.f32 %v1502_v40, 0.0 }
  0xc2   : > { %v4672_v33 = vmax.f32 %v1688_v46, 0.0  ;;  %v4674_v34 = vmax.f32 %v1871_v55, 0.0  ;;  %v2228_v2 = vrot.slane %v2196_v56, %v4294_v29  ;;  %v4121_v35 = vld [vmem:[%s4527_s8 + $0x17] ss:$8 sm:$0x3]  ;;  %v2232_v49 = vrot.slane %v2196_v56, %v4287_v21 }
  0xc3   : > { %5079 = vst [vmem:[#allocation8_spill] sm:$0xff] %v4670_v27  ;;  %v2053_v45 = vand.u32 2147483647, %v2049_v6  ;;  %v2567_v51 = vmax.f32 %v2566_v5, 0.0  ;;  %v4111_v53 = vadd.f32 -1.0, %v2750_v7  ;;  %v4679_v58 = vmax.f32 %v1872_v61, 0.0 }
  0xc4   : > { %5080 = vst [vmem:[#allocation9_spill] sm:$0xff] %v4672_v33  ;;  %5081 = vst [vmem:[#allocation10_spill] sm:$0xff] %v4674_v34  ;;  %v2054_v44 = vand.u32 2147483647, %v2050_v17  ;;  %v2414_v52 = vrot.slane %v2382_v14, %v4294_v29  ;;  %v2418_v40 = vrot.slane %v2382_v14, %v4287_v21  ;;  %v4683_v8 = vmax.f32 %v1873_v18, 0.0 }
  0xc5   : > { %5082 = vst [vmem:[#allocation11_spill] sm:$0xff] %v4679_v58  ;;  %v2055_v46 = vand.u32 2147483647, %v2051_v22  ;;  %v4685_v55 = vmax.f32 %v1874_v26, 0.0  ;;  %v2056_v1 = vand.u32 2147483647, %v2052_v30  ;;  %v2235_v34 = vsub.f32 %v4291_v28, %v2228_v2 }
  0xc6   : > { %5083 = vst [vmem:[#allocation12_spill] sm:$0xff] %v4683_v8  ;;  %v2237_v6 = vsub.f32 %v4297_v37, %v2228_v2  ;;  %v2935_v56 = vadd.f32 1.0, %v4115_v31  ;;  %v3121_v5 = vadd.f32 1.0, %v4121_v35  ;;  %v2236_v7 = vsub.f32 %v4291_v28, %v2232_v49 }
  0xc7   : > { %5084 = vst [vmem:[#allocation13_spill] sm:$0xff] %v4685_v55  ;;  %v2238_v61 = vsub.f32 %v4297_v37, %v2232_v49  ;;  %v2568_v17 = vmin.f32 %v2567_v51, 15.0  ;;  %v2752_v58 = vmul.f32 0.5, %v4111_v53  ;;  %v2057_v33 = vsub.f32 1.0, %v2053_v45 }
  0xc8   : > { %v2421_v14 = vsub.f32 %v4291_v28, %v2414_v52  ;;  %v2422_v18 = vsub.f32 %v4291_v28, %v2418_v40  ;;  %v2423_v22 = vsub.f32 %v4297_v37, %v2414_v52  ;;  %v2058_v26 = vsub.f32 1.0, %v2054_v44 }
  0xc9   : > { %v2059_v30 = vsub.f32 1.0, %v2055_v46  ;;  %v2060_v55 = vsub.f32 1.0, %v2056_v1  ;;  %v2424_v2 = vsub.f32 %v4297_v37, %v2418_v40  ;;  %v2239_v31 = vand.u32 2147483647, %v2235_v34 }
  0xca   : > { %v2241_v35 = vand.u32 2147483647, %v2237_v6  ;;  %v2936_v8 = vmul.f32 16.0, %v2935_v56  ;;  %v3122_v15 = vmul.f32 16.0, %v3121_v5  ;;  %v2240_v62 = vand.u32 2147483647, %v2236_v7 }
  0xcb   : > { %v2242_v49 = vand.u32 2147483647, %v2238_v61  ;;  %v2600_v51 = vrot.slane %v2568_v17, %v4294_v29  ;;  %v2753_v45 = vmax.f32 %v2752_v58, 0.0  ;;  %v2425_v53 = vand.u32 2147483647, %v2421_v14 }
  0xcc   : > { %v2426_v50 = vand.u32 2147483647, %v2422_v18  ;;  %v2427_v59 = vand.u32 2147483647, %v2423_v22  ;;  %v2604_v27 = vrot.slane %v2568_v17, %v4287_v21  ;;  %v4697_v52 = vmax.f32 %v2057_v33, 0.0 }
  0xcd   : > { %v4699_v44 = vmax.f32 %v2058_v26, 0.0  ;;  %v4701_v1 = vmax.f32 %v2059_v30, 0.0  ;;  %v2428_v34 = vand.u32 2147483647, %v2424_v2  ;;  %v2243_v40 = vsub.f32 1.0, %v2239_v31 }
  0xce   : > { %v2245_v46 = vsub.f32 1.0, %v2241_v35  ;;  %v4117_v6 = vadd.f32 -1.0, %v2936_v8  ;;  %v4123_v56 = vadd.f32 -1.0, %v3122_v15  ;;  %v2244_v5 = vsub.f32 1.0, %v2240_v62 }
  0xcf   : > { %v2246_v7 = vsub.f32 1.0, %v2242_v49  ;;  %v2607_v58 = vsub.f32 %v4291_v28, %v2600_v51  ;;  %v2754_v61 = vmin.f32 %v2753_v45, 15.0  ;;  %v2429_v14 = vsub.f32 1.0, %v2425_v53 }
  0xd0   : > { %v2430_v18 = vsub.f32 1.0, %v2426_v50  ;;  %v2431_v22 = vsub.f32 1.0, %v2427_v59  ;;  %v2608_v33 = vsub.f32 %v4291_v28, %v2604_v27  ;;  %v4705_v26 = vmax.f32 %v2060_v55, 0.0 }
  0xd1   : > { %v2432_v30 = vsub.f32 1.0, %v2428_v34  ;;  %v2609_v2 = vsub.f32 %v4297_v37, %v2600_v51  ;;  %v2610_v31 = vsub.f32 %v4297_v37, %v2604_v27  ;;  %v4709_v15 = vmax.f32 %v2243_v40, 0.0 }
  0xd2   : > { %v4711_v62 = vmax.f32 %v2245_v46, 0.0  ;;  %v4713_v35 = vmul.f32 0.5, %v4117_v6  ;;  %v4715_v49 = vmul.f32 0.5, %v4123_v56  ;;  %v4717_v59 = vmax.f32 %v2244_v5, 0.0 }
  0xd3   : > { %v4719_v45 = vmax.f32 %v2246_v7, 0.0  ;;  %v2611_v55 = vand.u32 2147483647, %v2607_v58  ;;  %v2786_v53 = vrot.slane %v2754_v61, %v4294_v29  ;;  %v4722_v34 = vmax.f32 %v2429_v14, 0.0 }
  0xd4   : > { %5085 = vst [vmem:[#allocation14_spill] sm:$0xff] %v4711_v62  ;;  %5086 = vst [vmem:[#allocation15_spill] sm:$0xff] %v4717_v59  ;;  %v4724_v27 = vmax.f32 %v2430_v18, 0.0  ;;  %v4726_v40 = vmax.f32 %v2431_v22, 0.0  ;;  %v2612_v46 = vand.u32 2147483647, %v2608_v33  ;;  %v2790_v56 = vrot.slane %v2754_v61, %v4287_v21 }
  0xd5   : > { %5087 = vst [vmem:[#allocation16_spill] sm:$0xff] %v4719_v45  ;;  %v4728_v62 = vmax.f32 %v2432_v30, 0.0  ;;  %v2613_v5 = vand.u32 2147483647, %v2609_v2  ;;  %v2614_v59 = vand.u32 2147483647, %v2610_v31 }
  0xd6   : > { %5088 = vst [vmem:[#allocation17_spill] sm:$0xff] %v4724_v27  ;;  %5089 = vst [vmem:[#allocation18_spill] sm:$0xff] %v4726_v40  ;;  %v2615_v30 = vsub.f32 1.0, %v2611_v55 }
  0xd7   : > { %5090 = vst [vmem:[#allocation19_spill] sm:$0xff] %v4728_v62  ;;  %v2793_v62 = vsub.f32 %v4291_v28, %v2786_v53 }
 0x102   : > { %v454_v17 = vpop.f32.mrb[0].mxu0 }
 0x103   : > { %v456_v8 = vpop.f32.mrb[1].mxu0  ;;  %v465_v7 = vmul.f32 %v454_v17, %v4550_v63 }
 0x104   : > { %v644_v50 = vpop.f32.mrb[0].mxu1  ;;  %v466_v22 = vmul.f32 %v456_v8, %v4558_v12  ;;  %v2794_v12 = vsub.f32 %v4291_v28, %v2790_v56 }
 0x105   : > { %v646_v51 = vpop.f32.mrb[1].mxu1  ;;  %v655_v61 = vmul.f32 %v644_v50, %v4556_v11  ;;  %v2618_v11 = vsub.f32 1.0, %v2614_v59  ;;  %v2796_v50 = vsub.f32 %v4297_v37, %v2790_v56 }
 0x106   : > { %v460_v6 = vpop.f32.mrb[2].mxu0  ;;  %v656_v31 = vmul.f32 %v646_v51, %v4565_v24  ;;  %v4747_v24 = vand.u32 2147483647, %v2793_v62 }
 0x107   : > { %v467_v58 = vmul.f32 %v460_v6, %v4553_v0  ;;  %v462_v45 = vpop.f32.mrb[3].mxu0  ;;  %v2616_v0 = vsub.f32 1.0, %v2612_v46  ;;  %v4745_v46 = vmax.f32 %v2615_v30, 0.0  ;;  %v4757_v62 = vmax.f32 %v2618_v11, 0.0 }
 0x108   : > { %v650_v40 = vpop.f32.mrb[2].mxu1  ;;  %v468_v33 = vmul.f32 %v462_v45, %v4574_v48  ;;  %v2617_v48 = vsub.f32 1.0, %v2613_v5  ;;  %v2795_v45 = vsub.f32 %v4297_v37, %v2786_v53 }
 0x109   : > { %v469_v2 = vadd.f32 %v467_v58, %v465_v7  ;;  %v657_v63 = vmul.f32 %v650_v40, %v4572_v39  ;;  %v652_v17 = vpop.f32.mrb[3].mxu1  ;;  %v4749_v58 = vmax.f32 %v2616_v0, 0.0  ;;  %5091 = vst [vmem:[#allocation20_spill] sm:$0xff] %v4757_v62 }
 0x10a   : > { %v476_v6 = vadd.f32 %v468_v33, %v466_v22  ;;  %v658_v18 = vmul.f32 %v652_v17, %v4576_v43  ;;  %v4751_v22 = vand.u32 2147483647, %v2794_v12  ;;  %v4753_v59 = vmax.f32 %v2617_v48, 0.0 }
 0x10b   : > { %v470_v8 = vrot.slane %v469_v2, 4  ;;  %v659_v14 = vadd.f32 %v657_v63, %v655_v61  ;;  %v4755_v56 = vand.u32 2147483647, %v2795_v45  ;;  %v4759_v63 = vand.u32 2147483647, %v2796_v50 }
 0x10c   : > { %v477_v55 = vrot.slane %v476_v6, 4  ;;  %v666_v27 = vadd.f32 %v658_v18, %v656_v31 }
 0x10d   : > { %v471_v39 = vadd.f32 %v470_v8, %v469_v2  ;;  %v660_v40 = vrot.slane %v659_v14, 4 }
 0x10e   : > { %v478_v51 = vadd.f32 %v477_v55, %v476_v6  ;;  %v667_v43 = vrot.slane %v666_v27, 4  ;;  %v830_v7 = vpop.f32.mrb[4].mxu0 }
 0x10f   : > { %v472_v5 = vrot.slane %v471_v39, 2  ;;  %v661_v53 = vadd.f32 %v660_v40, %v659_v14  ;;  %v1016_v33 = vpop.f32.mrb[4].mxu1  ;;  %v832_v18 = vpop.f32.mrb[5].mxu0  ;;  %v841_v31 = vmul.f32 %v830_v7, %v4586_v4  ;;  %v5092_v40 = vlaneseq }
 0x110   : > { %v479_v61 = vrot.slane %v478_v51, 2  ;;  %v668_v30 = vadd.f32 %v667_v43, %v666_v27  ;;  %v1018_v2 = vpop.f32.mrb[5].mxu1  ;;  %v1027_v8 = vmul.f32 %v1016_v33, %v4593_v19  ;;  %v842_v48 = vmul.f32 %v832_v18, %v4588_v9 }
 0x111   : > { %v473_v17 = vadd.f32 %v472_v5, %v471_v39  ;;  %v662_v0 = vrot.slane %v661_v53, 2  ;;  %vm4766_vm1 = vcmp.lt.s32.totalorder %v5092_v40, 256  ;;  %v1028_v50 = vmul.f32 %v1018_v2, %v4598_v25 }
 0x112   : > { %v480_v14 = vadd.f32 %v479_v61, %v478_v51  ;;  %v669_v12 = vrot.slane %v668_v30, 2  ;;  %v836_v45 = vpop.f32.mrb[6].mxu0 }
 0x113   : > { %v474_v55 = vrot.slane %v473_v17, 1  ;;  %v663_v27 = vadd.f32 %v662_v0, %v661_v53  ;;  %v843_v4 = vmul.f32 %v836_v45, %v4595_v20  ;;  %v1022_v39 = vpop.f32.mrb[6].mxu1  ;;  %v838_v43 = vpop.f32.mrb[7].mxu0 }
 0x114   : > { %v481_v51 = vrot.slane %v480_v14, 1  ;;  %v670_v7 = vadd.f32 %v669_v12, %v668_v30  ;;  %v1029_v19 = vmul.f32 %v1022_v39, %v4603_v32  ;;  %v844_v9 = vmul.f32 %v838_v43, %v4608_v42  ;;  %v1024_v5 = vpop.f32.mrb[7].mxu1 }
 0x115   : > { %v475_v33 = vadd.f32 %v474_v55, %v473_v17  ;;  %v664_v53 = vrot.slane %v663_v27, 1  ;;  %v845_v18 = vadd.f32 %v843_v4, %v841_v31  ;;  %v1030_v61 = vmul.f32 %v1024_v5, %v4612_v47 }
 0x116   : > { %v482_v0 = vadd.f32 %v481_v51, %v480_v14  ;;  %v671_v40 = vrot.slane %v670_v7, 1  ;;  %v1031_v6 = vadd.f32 %v1029_v19, %v1027_v8  ;;  %v852_v25 = vadd.f32 %v844_v9, %v842_v48 }
 0x117   : > { %v665_v2 = vadd.f32 %v664_v53, %v663_v27  ;;  %v846_v20 = vrot.slane %v845_v18, 4  ;;  %v1038_v45 = vadd.f32 %v1030_v61, %v1028_v50  ;;  %v1202_v62 = vpop.f32.mrb[8].mxu0  ;;  %v2802_v30 = vsub.f32 1.0, %v4751_v22 }
 0x118   : > { %v485_v12 = vcombine.low %v475_v33, %v482_v0  ;;  %v672_v32 = vadd.f32 %v671_v40, %v670_v7  ;;  %v1032_v39 = vrot.slane %v1031_v6, 4  ;;  %v853_v42 = vrot.slane %v852_v25, 4  ;;  %v1204_v43 = vpop.f32.mrb[9].mxu0 }
 0x119   : > { %v847_v17 = vadd.f32 %v846_v20, %v845_v18  ;;  %v1039_v55 = vrot.slane %v1038_v45, 4  ;;  %v1213_v31 = vmul.f32 %v1202_v62, %v4619_v10  ;;  %v5095_v47 = vmax.f32 %v4713_v35, 0.0 }
 0x11a   : > { %v492_v8 = vrot.slane %v485_v12, %v4606_v41  ;;  %v675_v48 = vcombine.low %v665_v2, %v672_v32  ;;  %v1033_v27 = vadd.f32 %v1032_v39, %v1031_v6  ;;  %v854_v50 = vadd.f32 %v853_v42, %v852_v25  ;;  %v1387_v4 = vpop.f32.mrb[8].mxu1 }
 0x11b   : > { %v4779_v14 = vmin.f32 %v5095_v47, 15.0  ;;  %v848_v51 = vrot.slane %v847_v17, 2  ;;  %v1040_v19 = vadd.f32 %v1039_v55, %v1038_v45  ;;  %v1398_v7 = vmul.f32 %v1387_v4, %v4621_v13  ;;  %v1389_v5 = vpop.f32.mrb[9].mxu1  ;;  %v1208_v33 = vpop.f32.mrb[10].mxu0 }
 0x11c   : > { %v1214_v9 = vmul.f32 %v1204_v43, %v4623_v16  ;;  %v499_v10 = vrot.slane %v492_v8, %v4606_v41  ;;  %v682_v35 = vrot.slane %v675_v48, %v4606_v41  ;;  %v1034_v62 = vrot.slane %v1033_v27, 2  ;;  %v1210_v18 = vpop.f32.mrb[11].mxu0 }
 0x11d   : > { %v855_v53 = vrot.slane %v854_v50, 2  ;;  %v849_v61 = vadd.f32 %v848_v51, %v847_v17  ;;  %v1041_v0 = vrot.slane %v1040_v19, 2  ;;  %v1399_v6 = vmul.f32 %v1389_v5, %v4627_v23 }
 0x11e   : > { %v1215_v40 = vmul.f32 %v1208_v33, %v4631_v57  ;;  %506 = vst.msk [vmem:[#allocation2 + $0x10] ss:$8 sm:$0x3] %vm4766_vm1, %v499_v10  ;;  %v689_v13 = vrot.slane %v682_v35, %v4606_v41  ;;  %v1035_v16 = vadd.f32 %v1034_v62, %v1033_v27  ;;  %v1393_v2 = vpop.f32.mrb[10].mxu1  ;;  %v1216_v20 = vmul.f32 %v1210_v18, %v4641_v60 }
 0x11f   : > { %v856_v25 = vadd.f32 %v855_v53, %v854_v50  ;;  %v850_v45 = vrot.slane %v849_v61, 1  ;;  %v1042_v12 = vadd.f32 %v1041_v0, %v1040_v19  ;;  %v1400_v39 = vmul.f32 %v1393_v2, %v4635_v36  ;;  %v1395_v42 = vpop.f32.mrb[11].mxu1 }
 0x120   : > { %v1217_v32 = vadd.f32 %v1215_v40, %v1213_v31  ;;  %692 = vst.msk [vmem:[#allocation2 + $0x11] ss:$8 sm:$0x3] %vm4766_vm1, %v689_v13  ;;  %v1036_v23 = vrot.slane %v1035_v16, 1  ;;  %v1224_v43 = vadd.f32 %v1216_v20, %v1214_v9  ;;  %v1401_v17 = vmul.f32 %v1395_v42, %v4643_v54 }
 0x121   : > { %v857_v57 = vrot.slane %v856_v25, 1  ;;  %v851_v55 = vadd.f32 %v850_v45, %v849_v61  ;;  %v1043_v47 = vrot.slane %v1042_v12, 1  ;;  %v1402_v48 = vadd.f32 %v1400_v39, %v1398_v7  ;;  %v1573_v27 = vpop.f32.mrb[12].mxu0  ;;  %v5097_v45 = vld [vmem:[#allocation8_spill] sm:$0xff] }
 0x122   : > { %v1218_v8 = vrot.slane %v1217_v32, 4  ;;  %v1037_v60 = vadd.f32 %v1036_v23, %v1035_v16  ;;  %v1225_v4 = vrot.slane %v1224_v43, 4  ;;  %v1409_v31 = vadd.f32 %v1401_v17, %v1399_v6  ;;  %v1575_v51 = vpop.f32.mrb[13].mxu0  ;;  %v5098_v17 = vld [vmem:[#allocation5_spill] sm:$0xff] }
 0x123   : > { %v858_v50 = vadd.f32 %v857_v57, %v856_v25  ;;  %v1044_v36 = vadd.f32 %v1043_v47, %v1042_v12  ;;  %v1403_v5 = vrot.slane %v1402_v48, 4  ;;  %v5096_v33 = vmax.f32 %v4715_v49, 0.0 }
 0x124   : > { %v1219_v19 = vadd.f32 %v1218_v8, %v1217_v32  ;;  %v1226_v35 = vadd.f32 %v1225_v4, %v1224_v43  ;;  %v1410_v54 = vrot.slane %v1409_v31, 4  ;;  %v2803_v62 = vsub.f32 1.0, %v4755_v56 }
 0x125   : > { %v4798_v10 = vmin.f32 %v5096_v33, 15.0  ;;  %v861_v9 = vcombine.low %v851_v55, %v858_v50  ;;  %v1047_v53 = vcombine.low %v1037_v60, %v1044_v36  ;;  %v1404_v18 = vadd.f32 %v1403_v5, %v1402_v48  ;;  %v1579_v0 = vpop.f32.mrb[14].mxu0  ;;  %v5100_v5 = vld [vmem:[#allocation4_spill] sm:$0xff] }
 0x126   : > { %v1220_v7 = vrot.slane %v1219_v19, 2  ;;  %v1584_v61 = vmul.f32 %v1573_v27, %v4651_v38  ;;  %v1227_v40 = vrot.slane %v1226_v35, 2  ;;  %v1411_v13 = vadd.f32 %v1410_v54, %v1409_v31  ;;  %v1581_v49 = vpop.f32.mrb[15].mxu0 }
 0x127   : > { %v868_v6 = vrot.slane %v861_v9, %v4606_v41  ;;  %v1586_v16 = vmul.f32 %v1579_v0, %v4661_v3  ;;  %v1054_v25 = vrot.slane %v1047_v53, %v4606_v41  ;;  %v1405_v20 = vrot.slane %v1404_v18, 2  ;;  %v5101_v53 = vld [vmem:[#allocation6_spill] sm:$0xff] }
 0x128   : > { %v1221_v2 = vadd.f32 %v1220_v7, %v1219_v19  ;;  %v1587_v12 = vmul.f32 %v1581_v49, %v5097_v45  ;;  %v1228_v32 = vadd.f32 %v1227_v40, %v1226_v35  ;;  %v1412_v39 = vrot.slane %v1411_v13, 2  ;;  %v1759_v42 = vpop.f32.mrb[12].mxu1 }
 0x129   : > { %v875_v56 = vrot.slane %v868_v6, %v4606_v41  ;;  %v1588_v38 = vadd.f32 %v1586_v16, %v1584_v61  ;;  %v1061_v23 = vrot.slane %v1054_v25, %v4606_v41  ;;  %v1406_v43 = vadd.f32 %v1405_v20, %v1404_v18  ;;  %v1761_v3 = vpop.f32.mrb[13].mxu1  ;;  %v5103_v16 = vld [vmem:[#allocation9_spill] sm:$0xff] }
 0x12a   : > { %v1222_v57 = vrot.slane %v1221_v2, 1  ;;  %v1585_v55 = vmul.f32 %v1575_v51, %v5098_v17  ;;  %v1229_v47 = vrot.slane %v1228_v32, 1  ;;  %v1413_v8 = vadd.f32 %v1412_v39, %v1411_v13 }
 0x12b   : > { %878 = vst.msk [vmem:[#allocation2 + $0x12] ss:$8 sm:$0x3] %vm4766_vm1, %v875_v56  ;;  %v1589_v48 = vrot.slane %v1588_v38, 4  ;;  %v2804_v27 = vsub.f32 1.0, %v4759_v63  ;;  %v1407_v50 = vrot.slane %v1406_v43, 1  ;;  %v1770_v33 = vmul.f32 %v1759_v42, %v5100_v5 }
 0x12c   : > { %1064 = vst.msk [vmem:[#allocation2 + $0x13] ss:$8 sm:$0x3] %vm4766_vm1, %v1061_v23  ;;  %v1223_v60 = vadd.f32 %v1222_v57, %v1221_v2  ;;  %v1595_v4 = vadd.f32 %v1587_v12, %v1585_v55  ;;  %v5099_v31 = vsub.f32 1.0, %v4747_v24  ;;  %v1230_v51 = vadd.f32 %v1229_v47, %v1228_v32  ;;  %v1765_v35 = vpop.f32.mrb[14].mxu1  ;;  %v5102_v63 = vld [vmem:[#allocation7_spill] sm:$0xff] }
 0x12d   : > { %v1414_v19 = vrot.slane %v1413_v8, 1  ;;  %v1590_v9 = vadd.f32 %v1589_v48, %v1588_v38  ;;  %v1408_v54 = vadd.f32 %v1407_v50, %v1406_v43  ;;  %v1771_v7 = vmul.f32 %v1761_v3, %v5101_v53  ;;  %v1767_v0 = vpop.f32.mrb[15].mxu1 }
 0x12e   : > { %v4816_v36 = vmax.f32 %v5099_v31, 0.0  ;;  %v1772_v18 = vmul.f32 %v1765_v35, %v5102_v63  ;;  %v1596_v61 = vrot.slane %v1595_v4, 4  ;;  %v1233_v6 = vcombine.low %v1223_v60, %v1230_v51 }
 0x12f   : > { %v1415_v40 = vadd.f32 %v1414_v19, %v1413_v8  ;;  %v1591_v13 = vrot.slane %v1590_v9, 2  ;;  %v1773_v24 = vmul.f32 %v1767_v0, %v5103_v16  ;;  %v4824_v2 = vmax.f32 %v2802_v30, 0.0  ;;  %v5107_v0 = vld [vmem:[#allocation13_spill] sm:$0xff] }
 0x130   : > { %v1774_v49 = vadd.f32 %v1772_v18, %v1770_v33  ;;  %v1597_v25 = vadd.f32 %v1596_v61, %v1595_v4  ;;  %v4828_v20 = vrot.slane %v4779_v14, %v4294_v29  ;;  %v1240_v45 = vrot.slane %v1233_v6, %v4606_v41  ;;  %v5104_v33 = vld [vmem:[#allocation10_spill] sm:$0xff]  ;;  %v5106_v18 = vld [vmem:[#allocation11_spill] sm:$0xff] }
 0x131   : > { %v1418_v12 = vcombine.low %v1408_v54, %v1415_v40  ;;  %v1592_v56 = vadd.f32 %v1591_v13, %v1590_v9  ;;  %v1781_v32 = vadd.f32 %v1773_v24, %v1771_v7  ;;  %v1945_v38 = vpop.f32.mrb[16].mxu0  ;;  %v4831_v23 = vmax.f32 %v2803_v62, 0.0  ;;  %v5105_v54 = vld [vmem:[#allocation12_spill] sm:$0xff] }
 0x132   : > { %v1775_v39 = vrot.slane %v1774_v49, 4  ;;  %v1598_v42 = vrot.slane %v1597_v25, 2  ;;  %v4835_v57 = vrot.slane %v4798_v10, %v4294_v29  ;;  %v1247_v22 = vrot.slane %v1240_v45, %v4606_v41  ;;  %v1947_v55 = vpop.f32.mrb[17].mxu0 }
 0x133   : > { %v1425_v30 = vrot.slane %v1418_v12, %v4606_v41  ;;  %v1593_v43 = vrot.slane %v1592_v56, 1  ;;  %v1782_v17 = vrot.slane %v1781_v32, 4  ;;  %v4839_v8 = vmax.f32 %v2804_v27, 0.0 }
 0x134   : > { %v1776_v3 = vadd.f32 %v1775_v39, %v1774_v49  ;;  %v1599_v47 = vadd.f32 %v1598_v42, %v1597_v25  ;;  %v4843_v48 = vrot.slane %v4779_v14, %v4287_v21  ;;  %1249 = vst.msk [vmem:[#allocation3] ss:$8 sm:$0x3] %vm4766_vm1, %v1247_v22  ;;  %v2979_v60 = vsub.f32 %v4291_v28, %v4828_v20 }
 0x135   : > { %v1432_v29 = vrot.slane %v1425_v30, %v4606_v41  ;;  %v1783_v62 = vadd.f32 %v1782_v17, %v1781_v32  ;;  %v4852_v50 = vrot.slane %v4798_v10, %v4287_v21  ;;  %v1594_v4 = vadd.f32 %v1593_v43, %v1592_v56  ;;  %v2131_v51 = vpop.f32.mrb[16].mxu1  ;;  %v1951_v19 = vpop.f32.mrb[18].mxu0 }
 0x136   : > { %v1777_v27 = vrot.slane %v1776_v3, 2  ;;  %v1600_v31 = vrot.slane %v1599_v47, 1  ;;  %v3165_v14 = vsub.f32 %v4291_v28, %v4835_v57  ;;  %v1956_v9 = vmul.f32 %v1945_v38, %v5104_v33  ;;  %v2133_v35 = vpop.f32.mrb[17].mxu1  ;;  %v1953_v7 = vpop.f32.mrb[19].mxu0 }
 0x137   : > { %1435 = vst.msk [vmem:[#allocation3 + $0x1] ss:$8 sm:$0x3] %vm4766_vm1, %v1432_v29  ;;  %v1784_v5 = vrot.slane %v1783_v62, 2  ;;  %v1958_v53 = vmul.f32 %v1951_v19, %v5105_v54  ;;  %v2981_v21 = vsub.f32 %v4297_v37, %v4828_v20  ;;  %v1957_v61 = vmul.f32 %v1947_v55, %v5106_v18 }
 0x138   : > { %v1778_v10 = vadd.f32 %v1777_v27, %v1776_v3  ;;  %v1601_v63 = vadd.f32 %v1600_v31, %v1599_v47  ;;  %v1959_v6 = vmul.f32 %v1953_v7, %v5107_v0  ;;  %v2980_v16 = vsub.f32 %v4291_v28, %v4843_v48 }
 0x139   : > { %v1785_v40 = vadd.f32 %v1784_v5, %v1783_v62  ;;  %v1960_v13 = vadd.f32 %v1958_v53, %v1956_v9  ;;  %v3167_v24 = vsub.f32 %v4297_v37, %v4835_v57  ;;  %v2142_v45 = vmul.f32 %v2131_v51, %v4697_v52  ;;  %v2137_v12 = vpop.f32.mrb[18].mxu1 }
 0x13a   : > { %v1779_v49 = vrot.slane %v1778_v10, 1  ;;  %v1604_v25 = vcombine.low %v1594_v4, %v1601_v63  ;;  %v1967_v20 = vadd.f32 %v1959_v6, %v1957_v61  ;;  %v2143_v32 = vmul.f32 %v2133_v35, %v4699_v44  ;;  %v2139_v38 = vpop.f32.mrb[19].mxu1 }
 0x13b   : > { %v1786_v56 = vrot.slane %v1785_v40, 1  ;;  %v1961_v39 = vrot.slane %v1960_v13, 4  ;;  %v2144_v42 = vmul.f32 %v2137_v12, %v4701_v1  ;;  %v2145_v17 = vmul.f32 %v2139_v38, %v4705_v26  ;;  %v5108_v12 = vld [vmem:[#allocation14_spill] sm:$0xff] }
 0x13c   : > { %v1780_v22 = vadd.f32 %v1779_v49, %v1778_v10  ;;  %v1611_v30 = vrot.slane %v1604_v25, %v4606_v41  ;;  %v1968_v43 = vrot.slane %v1967_v20, 4  ;;  %v3166_v52 = vsub.f32 %v4291_v28, %v4852_v50 }
 0x13d   : > { %v1787_v57 = vadd.f32 %v1786_v56, %v1785_v40  ;;  %v1962_v55 = vadd.f32 %v1961_v39, %v1960_v13  ;;  %v2146_v3 = vadd.f32 %v2144_v42, %v2142_v45  ;;  %v2153_v44 = vadd.f32 %v2145_v17, %v2143_v32  ;;  %v2317_v62 = vpop.f32.mrb[20].mxu0  ;;  %v5109_v32 = vld [vmem:[#allocation15_spill] sm:$0xff]  ;;  %v5110_v42 = vld [vmem:[#allocation16_spill] sm:$0xff] }
 0x13e   : > { %v1618_v47 = vrot.slane %v1611_v30, %v4606_v41  ;;  %v1969_v29 = vadd.f32 %v1968_v43, %v1967_v20  ;;  %v2982_v1 = vsub.f32 %v4297_v37, %v4843_v48  ;;  %v2319_v51 = vpop.f32.mrb[21].mxu0  ;;  %v3168_v26 = vsub.f32 %v4297_v37, %v4852_v50 }
 0x13f   : > { %v1790_v4 = vcombine.low %v1780_v22, %v1787_v57  ;;  %v1963_v27 = vrot.slane %v1962_v55, 2  ;;  %v2147_v31 = vrot.slane %v2146_v3, 4  ;;  %v2154_v28 = vrot.slane %v2153_v44, 4 }
 0x140   : > { %1621 = vst.msk [vmem:[#allocation3 + $0x2] ss:$8 sm:$0x3] %vm4766_vm1, %v1618_v47  ;;  %v1970_v19 = vrot.slane %v1969_v29, 2  ;;  %v4882_v5 = vand.u32 2147483647, %v2979_v60  ;;  %v2329_v39 = vmul.f32 %v2319_v51, %v5109_v32 }
 0x141   : > { %v4884_v33 = vand.u32 2147483647, %v3165_v14  ;;  %v1797_v9 = vrot.slane %v1790_v4, %v4606_v41  ;;  %v1964_v35 = vadd.f32 %v1963_v27, %v1962_v55  ;;  %v2148_v54 = vadd.f32 %v2147_v31, %v2146_v3  ;;  %v2503_v63 = vpop.f32.mrb[20].mxu1  ;;  %v2323_v18 = vpop.f32.mrb[22].mxu0  ;;  %v5111_v55 = vld [vmem:[#allocation17_spill] sm:$0xff]  ;;  %v5112_v3 = vld [vmem:[#allocation18_spill] sm:$0xff] }
 0x142   : > { %v4887_v53 = vand.u32 2147483647, %v2981_v21  ;;  %v1971_v7 = vadd.f32 %v1970_v19, %v1969_v29  ;;  %v2155_v10 = vadd.f32 %v2154_v28, %v2153_v44  ;;  %v4889_v61 = vand.u32 2147483647, %v2980_v16  ;;  %v2505_v14 = vpop.f32.mrb[21].mxu1  ;;  %v2325_v13 = vpop.f32.mrb[23].mxu0 }
 0x143   : > { %v4891_v0 = vand.u32 2147483647, %v3166_v52  ;;  %v1804_v6 = vrot.slane %v1797_v9, %v4606_v41  ;;  %v1965_v60 = vrot.slane %v1964_v35, 1  ;;  %v2149_v40 = vrot.slane %v2148_v54, 2  ;;  %v5113_v27 = vld [vmem:[#allocation19_spill] sm:$0xff] }
 0x144   : > { %v4894_v49 = vand.u32 2147483647, %v3167_v24  ;;  %v1972_v25 = vrot.slane %v1971_v7, 1  ;;  %v2156_v45 = vrot.slane %v2155_v10, 2  ;;  %v2328_v21 = vmul.f32 %v2317_v62, %v4709_v15 }
 0x145   : > { %v2330_v20 = vmul.f32 %v2323_v18, %v5108_v12  ;;  %1807 = vst.msk [vmem:[#allocation3 + $0x3] ss:$8 sm:$0x3] %vm4766_vm1, %v1804_v6  ;;  %v1966_v16 = vadd.f32 %v1965_v60, %v1964_v35  ;;  %v2150_v56 = vadd.f32 %v2149_v40, %v2148_v54  ;;  %v2331_v38 = vmul.f32 %v2325_v13, %v5110_v42  ;;  %v2509_v17 = vpop.f32.mrb[22].mxu1 }
 0x146   : > { %v1973_v22 = vadd.f32 %v1972_v25, %v1971_v7  ;;  %v2157_v30 = vadd.f32 %v2156_v45, %v2155_v10  ;;  %v2514_v24 = vmul.f32 %v2503_v63, %v4722_v34  ;;  %v2515_v15 = vmul.f32 %v2505_v14, %v5111_v55  ;;  %v2511_v29 = vpop.f32.mrb[23].mxu1 }
 0x147   : > { %v2332_v43 = vadd.f32 %v2330_v20, %v2328_v21  ;;  %v2151_v57 = vrot.slane %v2150_v56, 1  ;;  %v2516_v52 = vmul.f32 %v2509_v17, %v5112_v3  ;;  %v2339_v47 = vadd.f32 %v2331_v38, %v2329_v39 }
 0x148   : > { %v1976_v44 = vcombine.low %v1966_v16, %v1973_v22  ;;  %v2158_v62 = vrot.slane %v2157_v30, 1  ;;  %v2517_v31 = vmul.f32 %v2511_v29, %v5113_v27  ;;  %v2987_v9 = vsub.f32 1.0, %v4882_v5 }
 0x149   : > { %v2333_v4 = vrot.slane %v2332_v43, 4  ;;  %v2152_v51 = vadd.f32 %v2151_v57, %v2150_v56  ;;  %v2518_v19 = vadd.f32 %v2516_v52, %v2514_v24  ;;  %v2340_v28 = vrot.slane %v2339_v47, 4 }
 0x14a   : > { %v1983_v34 = vrot.slane %v1976_v44, %v4606_v41  ;;  %v2159_v35 = vadd.f32 %v2158_v62, %v2157_v30  ;;  %v2525_v7 = vadd.f32 %v2517_v31, %v2515_v15  ;;  %v3173_v18 = vsub.f32 1.0, %v4884_v33  ;;  %v5114_v15 = vld [vmem:[#allocation20_spill] sm:$0xff] }
 0x14b   : > { %v2334_v54 = vadd.f32 %v2333_v4, %v2332_v43  ;;  %v2519_v10 = vrot.slane %v2518_v19, 4  ;;  %v2341_v63 = vadd.f32 %v2340_v28, %v2339_v47  ;;  %v2989_v6 = vsub.f32 1.0, %v4887_v53  ;;  %v2689_v25 = vpop.f32.mrb[24].mxu0 }
 0x14c   : > { %v1990_v60 = vrot.slane %v1983_v34, %v4606_v41  ;;  %v2162_v40 = vcombine.low %v2152_v51, %v2159_v35  ;;  %v2526_v13 = vrot.slane %v2525_v7, 4  ;;  %v2691_v5 = vpop.f32.mrb[25].mxu0  ;;  %v2988_v12 = vsub.f32 1.0, %v4889_v61 }
 0x14d   : > { %v2335_v14 = vrot.slane %v2334_v54, 2  ;;  %v2520_v45 = vadd.f32 %v2519_v10, %v2518_v19  ;;  %v2342_v21 = vrot.slane %v2341_v63, 2  ;;  %v2986_v20 = vand.u32 2147483647, %v2982_v1 }
 0x14e   : > { %1993 = vst.msk [vmem:[#allocation3 + $0x4] ss:$8 sm:$0x3] %vm4766_vm1, %v1990_v60  ;;  %v2169_v33 = vrot.slane %v2162_v40, %v4606_v41  ;;  %v2527_v16 = vadd.f32 %v2526_v13, %v2525_v7  ;;  %v3174_v56 = vsub.f32 1.0, %v4891_v0  ;;  %v3175_v42 = vsub.f32 1.0, %v4894_v49 }
 0x14f   : > { %v2336_v53 = vadd.f32 %v2335_v14, %v2334_v54  ;;  %v2521_v32 = vrot.slane %v2520_v45, 2  ;;  %v2343_v39 = vadd.f32 %v2342_v21, %v2341_v63  ;;  %v4923_v61 = vand.u32 2147483647, %v3168_v26  ;;  %v2875_v22 = vpop.f32.mrb[24].mxu1  ;;  %v2695_v30 = vpop.f32.mrb[26].mxu0 }
 0x150   : > { %v2176_v48 = vrot.slane %v2169_v33, %v4606_v41  ;;  %v2528_v38 = vrot.slane %v2527_v16, 2  ;;  %v2991_v24 = vmax.f32 %v2987_v9, 0.0  ;;  %v2700_v0 = vmul.f32 %v2689_v25, %v4745_v46  ;;  %v2877_v57 = vpop.f32.mrb[25].mxu1  ;;  %v2697_v49 = vpop.f32.mrb[27].mxu0 }
 0x151   : > { %v2337_v1 = vrot.slane %v2336_v53, 1  ;;  %v2522_v43 = vadd.f32 %v2521_v32, %v2520_v45  ;;  %v2344_v17 = vrot.slane %v2343_v39, 1  ;;  %v2702_v55 = vmul.f32 %v2695_v30, %v4753_v59 }
 0x152   : > { %2179 = vst.msk [vmem:[#allocation3 + $0x5] ss:$8 sm:$0x3] %vm4766_vm1, %v2176_v48  ;;  %v2529_v50 = vadd.f32 %v2528_v38, %v2527_v16  ;;  %v2701_v26 = vmul.f32 %v2691_v5, %v4749_v58  ;;  %v2703_v3 = vmul.f32 %v2697_v49, %v5114_v15  ;;  %v3177_v44 = vmax.f32 %v3173_v18, 0.0 }
 0x153   : > { %v2338_v37 = vadd.f32 %v2337_v1, %v2336_v53  ;;  %v2523_v52 = vrot.slane %v2522_v43, 1  ;;  %v2345_v47 = vadd.f32 %v2344_v17, %v2343_v39  ;;  %v2704_v29 = vadd.f32 %v2702_v55, %v2700_v0  ;;  %v2881_v4 = vpop.f32.mrb[26].mxu1 }
 0x154   : > { %v2530_v62 = vrot.slane %v2529_v50, 1  ;;  %v2886_v46 = vmul.f32 %v2875_v22, %v4816_v36  ;;  %v2711_v27 = vadd.f32 %v2703_v3, %v2701_v26  ;;  %v2990_v59 = vsub.f32 1.0, %v2986_v20  ;;  %v2883_v9 = vpop.f32.mrb[27].mxu1 }
 0x155   : > { %v2524_v31 = vadd.f32 %v2523_v52, %v2522_v43  ;;  %v2348_v51 = vcombine.low %v2338_v37, %v2345_v47  ;;  %v2705_v19 = vrot.slane %v2704_v29, 4  ;;  %v2888_v28 = vmul.f32 %v2881_v4, %v4831_v23 }
 0x156   : > { %v2531_v34 = vadd.f32 %v2530_v62, %v2529_v50  ;;  %v2887_v58 = vmul.f32 %v2877_v57, %v4824_v2  ;;  %v2712_v35 = vrot.slane %v2711_v27, 4  ;;  %v2889_v54 = vmul.f32 %v2883_v9, %v4839_v8 }
 0x157   : > { %v2355_v7 = vrot.slane %v2348_v51, %v4606_v41  ;;  %v2706_v10 = vadd.f32 %v2705_v19, %v2704_v29  ;;  %v2890_v63 = vadd.f32 %v2888_v28, %v2886_v46  ;;  %v2993_v36 = vmax.f32 %v2989_v6, 0.0  ;;  %v3061_v14 = vpop.f32.mrb[28].mxu0 }
 0x158   : > { %v2534_v18 = vcombine.low %v2524_v31, %v2531_v34  ;;  %v2713_v60 = vadd.f32 %v2712_v35, %v2711_v27  ;;  %v2897_v40 = vadd.f32 %v2889_v54, %v2887_v58  ;;  %v3176_v13 = vsub.f32 1.0, %v4923_v61  ;;  %v3063_v2 = vpop.f32.mrb[29].mxu0 }
 0x159   : > { %v2362_v23 = vrot.slane %v2355_v7, %v4606_v41  ;;  %v2707_v25 = vrot.slane %v2706_v10, 2  ;;  %v2891_v45 = vrot.slane %v2890_v63, 4  ;;  %v2992_v21 = vmax.f32 %v2988_v12, 0.0 }
 0x15a   : > { %v2541_v5 = vrot.slane %v2534_v18, %v4606_v41  ;;  %v2714_v8 = vrot.slane %v2713_v60, 2  ;;  %v2898_v20 = vrot.slane %v2897_v40, 4  ;;  %v2994_v33 = vmax.f32 %v2990_v59, 0.0 }
 0x15b   : > { %2365 = vst.msk [vmem:[#allocation3 + $0x6] ss:$8 sm:$0x3] %vm4766_vm1, %v2362_v23  ;;  %v2708_v6 = vadd.f32 %v2707_v25, %v2706_v10  ;;  %v2892_v53 = vadd.f32 %v2891_v45, %v2890_v63  ;;  %v3178_v16 = vmax.f32 %v3174_v56, 0.0  ;;  %v3179_v32 = vmax.f32 %v3175_v42, 0.0  ;;  %v3247_v1 = vpop.f32.mrb[28].mxu1 }
 0x15c   : > { %v2548_v39 = vrot.slane %v2541_v5, %v4606_v41  ;;  %v2715_v61 = vadd.f32 %v2714_v8, %v2713_v60  ;;  %v2899_v48 = vadd.f32 %v2898_v20, %v2897_v40  ;;  %v3067_v38 = vpop.f32.mrb[30].mxu0  ;;  %v3180_v12 = vmax.f32 %v3176_v13, 0.0  ;;  %v3249_v17 = vpop.f32.mrb[29].mxu1 }
 0x15d   : > { %v2709_v22 = vrot.slane %v2708_v6, 1  ;;  %v2893_v30 = vrot.slane %v2892_v53, 2  ;;  %v3072_v43 = vmul.f32 %v3061_v14, %v2991_v24  ;;  %v3074_v0 = vmul.f32 %v3067_v38, %v2993_v36  ;;  %v3069_v57 = vpop.f32.mrb[31].mxu0 }
 0x15e   : > { %2551 = vst.msk [vmem:[#allocation3 + $0x7] ss:$8 sm:$0x3] %vm4766_vm1, %v2548_v39  ;;  %v2716_v55 = vrot.slane %v2715_v61, 1  ;;  %v2900_v49 = vrot.slane %v2899_v48, 2  ;;  %v3073_v56 = vmul.f32 %v3063_v2, %v2992_v21  ;;  %v3075_v42 = vmul.f32 %v3069_v57, %v2994_v33 }
 0x15f   : > { %v2710_v37 = vadd.f32 %v2709_v22, %v2708_v6  ;;  %v2894_v50 = vadd.f32 %v2893_v30, %v2892_v53  ;;  %v3076_v26 = vadd.f32 %v3074_v0, %v3072_v43  ;;  %v3258_v52 = vmul.f32 %v3247_v1, %v3177_v44  ;;  %v3253_v47 = vpop.f32.mrb[30].mxu1  ;;  %v3297_v43 = vld [vmem:[#allocation2] sm:$0xff] }
 0x160   : > { %v2717_v15 = vadd.f32 %v2716_v55, %v2715_v61  ;;  %v2901_v3 = vadd.f32 %v2900_v49, %v2899_v48  ;;  %v3083_v29 = vadd.f32 %v3075_v42, %v3073_v56  ;;  %v3259_v24 = vmul.f32 %v3249_v17, %v3178_v16  ;;  %v3255_v27 = vpop.f32.mrb[31].mxu1  ;;  %v3298_v17 = vld [vmem:[#allocation2 + $0x8] sm:$0xff]  ;;  %v3299_v55 = vld [vmem:[#allocation2 + $0x10] sm:$0xff]  ;;  %v3300_v42 = vld [vmem:[#allocation2 + $0x18] sm:$0xff] }
 0x161   : > { %v2895_v62 = vrot.slane %v2894_v50, 1  ;;  %v3077_v46 = vrot.slane %v3076_v26, 4  ;;  %v3260_v4 = vmul.f32 %v3253_v47, %v3179_v32  ;;  %v3261_v19 = vmul.f32 %v3255_v27, %v3180_v12 }
 0x162   : > { %v2720_v59 = vcombine.low %v2710_v37, %v2717_v15  ;;  %v2902_v31 = vrot.slane %v2901_v3, 1  ;;  %v3084_v51 = vrot.slane %v3083_v29, 4 }
 0x163   : > { %v2896_v28 = vadd.f32 %v2895_v62, %v2894_v50  ;;  %v3078_v9 = vadd.f32 %v3077_v46, %v3076_v26  ;;  %v3262_v34 = vadd.f32 %v3260_v4, %v3258_v52  ;;  %v3269_v7 = vadd.f32 %v3261_v19, %v3259_v24 }
 0x164   : > { %v2727_v58 = vrot.slane %v2720_v59, %v4606_v41  ;;  %v2903_v35 = vadd.f32 %v2902_v31, %v2901_v3  ;;  %v3085_v54 = vadd.f32 %v3084_v51, %v3083_v29 }
 0x165   : > { %v3079_v44 = vrot.slane %v3078_v9, 2  ;;  %v3263_v10 = vrot.slane %v3262_v34, 4  ;;  %v3270_v14 = vrot.slane %v3269_v7, 4  ;;  %v3301_v0 = vld [vmem:[#allocation3] sm:$0xff]  ;;  %v3302_v57 = vld [vmem:[#allocation3 + $0x8] sm:$0xff] }
 0x166   : > { %v2734_v63 = vrot.slane %v2727_v58, %v4606_v41  ;;  %v2906_v36 = vcombine.low %v2896_v28, %v2903_v35  ;;  %v3086_v40 = vrot.slane %v3085_v54, 2  ;;  %v3305_v49 = vmin.f32 %v3297_v43, %v3301_v0 }
 0x167   : > { %v3080_v18 = vadd.f32 %v3079_v44, %v3078_v9  ;;  %v3264_v60 = vadd.f32 %v3263_v10, %v3262_v34  ;;  %v3271_v21 = vadd.f32 %v3270_v14, %v3269_v7  ;;  %v3306_v56 = vmin.f32 %v3298_v17, %v3302_v57 }
 0x168   : > { %2737 = vst.msk [vmem:[#allocation3 + $0x10] ss:$8 sm:$0x3] %vm4766_vm1, %v2734_v63  ;;  %v2913_v13 = vrot.slane %v2906_v36, %v4606_v41  ;;  %v3087_v45 = vadd.f32 %v3086_v40, %v3085_v54  ;;  %v3318_v3 = vrot.slane %v3305_v49, 1  ;;  %v3309_v29 = vmax.f32 %v3297_v43, %v3301_v0 }
 0x169   : > { %v3081_v23 = vrot.slane %v3080_v18, 1  ;;  %v3265_v25 = vrot.slane %v3264_v60, 2  ;;  %v3272_v33 = vrot.slane %v3271_v21, 2  ;;  %v3321_v52 = vrot.slane %v3306_v56, 1 }
 0x16a   : > { %v2920_v2 = vrot.slane %v2913_v13, %v4606_v41  ;;  %v3088_v20 = vrot.slane %v3087_v45, 1  ;;  %v3310_v11 = vmax.f32 %v3298_v17, %v3302_v57 }
 0x16b   : > { %v3266_v5 = vadd.f32 %v3265_v25, %v3264_v60  ;;  %v3082_v8 = vadd.f32 %v3081_v23, %v3080_v18  ;;  %v3273_v16 = vadd.f32 %v3272_v33, %v3271_v21 }
 0x16c   : > { %2923 = vst.msk [vmem:[#allocation3 + $0x11] ss:$8 sm:$0x3] %vm4766_vm1, %v2920_v2  ;;  %v3089_v53 = vadd.f32 %v3088_v20, %v3087_v45 }
 0x16d   : > { %v3267_v6 = vrot.slane %v3266_v5, 1  ;;  %v3274_v61 = vrot.slane %v3273_v16, 1 }
 0x16e   : > { %v3092_v39 = vcombine.low %v3082_v8, %v3089_v53 }
 0x16f   : > { %v3268_v32 = vadd.f32 %v3267_v6, %v3266_v5  ;;  %v3275_v1 = vadd.f32 %v3274_v61, %v3273_v16 }
 0x170   : > { %v3099_v48 = vrot.slane %v3092_v39, %v4606_v41 }
 0x171   : > { %v3278_v12 = vcombine.low %v3268_v32, %v3275_v1 }
 0x172   : > { %v3106_v38 = vrot.slane %v3099_v48, %v4606_v41 }
 0x173   : > { %v3285_v22 = vrot.slane %v3278_v12, %v4606_v41 }
 0x174   : > { %3109 = vst.msk [vmem:[#allocation3 + $0x12] ss:$8 sm:$0x3] %vm4766_vm1, %v3106_v38 }
 0x175   : > { %v3292_v30 = vrot.slane %v3285_v22, %v4606_v41 }
 0x177   : > { %3295 = vst.msk [vmem:[#allocation3 + $0x13] ss:$8 sm:$0x3] %vm4766_vm1, %v3292_v30 }
 0x17e   : > { %v3303_v37 = vld [vmem:[#allocation3 + $0x10] sm:$0xff]  ;;  %v3304_v50 = vld [vmem:[#allocation3 + $0x18] sm:$0xff] }
 0x17f   : > { %v3307_v26 = vmin.f32 %v3299_v55, %v3303_v37  ;;  %v3308_v15 = vmin.f32 %v3300_v42, %v3304_v50  ;;  %v3311_v62 = vmax.f32 %v3299_v55, %v3303_v37  ;;  %v3312_v24 = vmax.f32 %v3300_v42, %v3304_v50 }
 0x181   : > { %v3319_v47 = vrot.slane %v3307_v26, 1  ;;  %v3322_v41 = vrot.slane %v3308_v15, 1 }
 0x183   : > { %v3320_v46 = vsel %vm3317_vm2, %v3318_v3, %v3319_v47  ;;  %v3323_v4 = vsel %vm3317_vm2, %v3321_v52, %v3322_v41  ;;  %v3328_v27 = vsel %vm3317_vm2, %v3319_v47, 3.4028235e+38  ;;  %v3329_v59 = vsel %vm3317_vm2, %v3322_v41, 3.4028235e+38 }
 0x184   : > { %v3334_v31 = vmax.f32 %v3309_v29, %v3320_v46  ;;  %v3335_v51 = vmax.f32 %v3310_v11, %v3323_v4  ;;  %v3336_v19 = vmax.f32 %v3311_v62, %v3328_v27  ;;  %v3337_v28 = vmax.f32 %v3312_v24, %v3329_v59 }
 0x185   : > { %v3330_v54 = vmin.f32 %v3309_v29, %v3320_v46  ;;  %v3331_v7 = vmin.f32 %v3310_v11, %v3323_v4  ;;  %v3332_v44 = vmin.f32 %v3311_v62, %v3328_v27  ;;  %v3333_v10 = vmin.f32 %v3312_v24, %v3329_v59 }
 0x186   : > { %v3343_v9 = vrot.slane %v3334_v31, 7  ;;  %v3344_v34 = vrot.slane %v3335_v51, 7  ;;  %v3345_v58 = vrot.slane %v3336_v19, 7  ;;  %v3347_v35 = vrot.slane %v3337_v28, 7 }
 0x188   : > { %v3346_v63 = vsel %vm3342_vm3, %v3343_v9, %v3345_v58  ;;  %v3348_v36 = vsel %vm3342_vm3, %v3344_v34, %v3347_v35  ;;  %v3353_v18 = vsel %vm3342_vm3, %v3305_v49, %v3343_v9  ;;  %v3354_v60 = vsel %vm3342_vm3, %v3306_v56, %v3344_v34 }
 0x189   : > { %v3355_v40 = vmin.f32 %v3353_v18, %v3330_v54  ;;  %v3356_v14 = vmin.f32 %v3354_v60, %v3331_v7  ;;  %v3357_v13 = vmin.f32 %v3346_v63, %v3332_v44  ;;  %v3358_v23 = vmin.f32 %v3348_v36, %v3333_v10 }
 0x18a   : > { %v3359_v5 = vmax.f32 %v3353_v18, %v3330_v54  ;;  %v3360_v8 = vmax.f32 %v3354_v60, %v3331_v7  ;;  %v3361_v20 = vmax.f32 %v3346_v63, %v3332_v44  ;;  %v3362_v33 = vmax.f32 %v3348_v36, %v3333_v10 }
 0x18b   : > { %v3367_v25 = vrot.slane %v3355_v40, 1  ;;  %v3368_v45 = vrot.slane %v3357_v13, 1  ;;  %v3370_v21 = vrot.slane %v3356_v14, 1  ;;  %v3371_v2 = vrot.slane %v3358_v23, 1 }
 0x18d   : > { %v3369_v6 = vsel %vm3317_vm2, %v3367_v25, %v3368_v45  ;;  %v3372_v53 = vsel %vm3317_vm2, %v3370_v21, %v3371_v2  ;;  %v3377_v16 = vsel %vm3317_vm2, %v3368_v45, 3.4028235e+38  ;;  %v3378_v32 = vsel %vm3317_vm2, %v3371_v2, 3.4028235e+38 }
 0x18e   : > { %v3383_v39 = vmax.f32 %v3359_v5, %v3369_v6  ;;  %v3384_v61 = vmax.f32 %v3360_v8, %v3372_v53  ;;  %v3385_v48 = vmax.f32 %v3361_v20, %v3377_v16  ;;  %v3386_v1 = vmax.f32 %v3362_v33, %v3378_v32 }
 0x18f   : > { %v3379_v43 = vmin.f32 %v3359_v5, %v3369_v6  ;;  %v3380_v17 = vmin.f32 %v3360_v8, %v3372_v53  ;;  %v3381_v0 = vmin.f32 %v3361_v20, %v3377_v16  ;;  %v3382_v57 = vmin.f32 %v3362_v33, %v3378_v32 }
 0x190   : > { %v3391_v38 = vrot.slane %v3383_v39, 7  ;;  %v3392_v12 = vrot.slane %v3384_v61, 7  ;;  %v3393_v22 = vrot.slane %v3385_v48, 7  ;;  %v3395_v30 = vrot.slane %v3386_v1, 7 }
 0x192   : > { %v3394_v55 = vsel %vm3342_vm3, %v3391_v38, %v3393_v22  ;;  %v3396_v49 = vsel %vm3342_vm3, %v3392_v12, %v3395_v30  ;;  %v3401_v56 = vsel %vm3342_vm3, %v3355_v40, %v3391_v38  ;;  %v3402_v42 = vsel %vm3342_vm3, %v3356_v14, %v3392_v12 }
 0x193   : > { %v3403_v37 = vmin.f32 %v3401_v56, %v3379_v43  ;;  %v3404_v50 = vmin.f32 %v3402_v42, %v3380_v17  ;;  %v3405_v26 = vmin.f32 %v3394_v55, %v3381_v0  ;;  %v3406_v15 = vmin.f32 %v3396_v49, %v3382_v57 }
 0x194   : > { %v3407_v29 = vmax.f32 %v3401_v56, %v3379_v43  ;;  %v3408_v11 = vmax.f32 %v3402_v42, %v3380_v17  ;;  %v3409_v62 = vmax.f32 %v3394_v55, %v3381_v0  ;;  %v3410_v24 = vmax.f32 %v3396_v49, %v3382_v57 }
 0x195   : > { %v3415_v3 = vrot.slane %v3403_v37, 1  ;;  %v3416_v52 = vrot.slane %v3405_v26, 1  ;;  %v3418_v47 = vrot.slane %v3404_v50, 1  ;;  %v3419_v41 = vrot.slane %v3406_v15, 1 }
 0x197   : > { %v3417_v46 = vsel %vm3317_vm2, %v3415_v3, %v3416_v52  ;;  %v3420_v4 = vsel %vm3317_vm2, %v3418_v47, %v3419_v41  ;;  %v3425_v27 = vsel %vm3317_vm2, %v3416_v52, 3.4028235e+38  ;;  %v3426_v59 = vsel %vm3317_vm2, %v3419_v41, 3.4028235e+38 }
 0x198   : > { %v3431_v31 = vmax.f32 %v3407_v29, %v3417_v46  ;;  %v3432_v51 = vmax.f32 %v3408_v11, %v3420_v4  ;;  %v3433_v19 = vmax.f32 %v3409_v62, %v3425_v27  ;;  %v3434_v28 = vmax.f32 %v3410_v24, %v3426_v59 }
 0x199   : > { %v3427_v54 = vmin.f32 %v3407_v29, %v3417_v46  ;;  %v3428_v7 = vmin.f32 %v3408_v11, %v3420_v4  ;;  %v3429_v44 = vmin.f32 %v3409_v62, %v3425_v27  ;;  %v3430_v10 = vmin.f32 %v3410_v24, %v3426_v59 }
 0x19a   : > { %v3439_v9 = vrot.slane %v3431_v31, 7  ;;  %v3440_v34 = vrot.slane %v3432_v51, 7  ;;  %v3441_v58 = vrot.slane %v3433_v19, 7  ;;  %v3443_v35 = vrot.slane %v3434_v28, 7 }
 0x19c   : > { %v3442_v63 = vsel %vm3342_vm3, %v3439_v9, %v3441_v58  ;;  %v3444_v36 = vsel %vm3342_vm3, %v3440_v34, %v3443_v35  ;;  %v3449_v18 = vsel %vm3342_vm3, %v3403_v37, %v3439_v9  ;;  %v3450_v60 = vsel %vm3342_vm3, %v3404_v50, %v3440_v34 }
 0x19d   : > { %v3451_v40 = vmin.f32 %v3449_v18, %v3427_v54  ;;  %v3452_v14 = vmin.f32 %v3450_v60, %v3428_v7  ;;  %v3453_v13 = vmin.f32 %v3442_v63, %v3429_v44  ;;  %v3454_v23 = vmin.f32 %v3444_v36, %v3430_v10 }
 0x19e   : > { %v3455_v5 = vmax.f32 %v3449_v18, %v3427_v54  ;;  %v3456_v8 = vmax.f32 %v3450_v60, %v3428_v7  ;;  %v3457_v20 = vmax.f32 %v3442_v63, %v3429_v44  ;;  %v3458_v33 = vmax.f32 %v3444_v36, %v3430_v10 }
 0x19f   : > { %v3463_v25 = vrot.slane %v3451_v40, 1  ;;  %v3464_v45 = vrot.slane %v3453_v13, 1  ;;  %v3466_v21 = vrot.slane %v3452_v14, 1  ;;  %v3467_v2 = vrot.slane %v3454_v23, 1 }
 0x1a1   : > { %v3465_v6 = vsel %vm3317_vm2, %v3463_v25, %v3464_v45  ;;  %v3468_v53 = vsel %vm3317_vm2, %v3466_v21, %v3467_v2  ;;  %v3473_v16 = vsel %vm3317_vm2, %v3464_v45, 3.4028235e+38  ;;  %v3474_v32 = vsel %vm3317_vm2, %v3467_v2, 3.4028235e+38 }
 0x1a2   : > { %v3479_v39 = vmax.f32 %v3455_v5, %v3465_v6  ;;  %v3480_v61 = vmax.f32 %v3456_v8, %v3468_v53  ;;  %v3481_v48 = vmax.f32 %v3457_v20, %v3473_v16  ;;  %v3482_v1 = vmax.f32 %v3458_v33, %v3474_v32 }
 0x1a3   : > { %v3475_v43 = vmin.f32 %v3455_v5, %v3465_v6  ;;  %v3476_v17 = vmin.f32 %v3456_v8, %v3468_v53  ;;  %v3477_v0 = vmin.f32 %v3457_v20, %v3473_v16  ;;  %v3478_v57 = vmin.f32 %v3458_v33, %v3474_v32 }
 0x1a4   : > { %v3487_v38 = vrot.slane %v3479_v39, 7  ;;  %v3488_v12 = vrot.slane %v3480_v61, 7  ;;  %v3489_v22 = vrot.slane %v3481_v48, 7  ;;  %v3491_v30 = vrot.slane %v3482_v1, 7 }
 0x1a6   : > { %v3490_v55 = vsel %vm3342_vm3, %v3487_v38, %v3489_v22  ;;  %v3492_v49 = vsel %vm3342_vm3, %v3488_v12, %v3491_v30  ;;  %v3497_v56 = vsel %vm3342_vm3, %v3451_v40, %v3487_v38  ;;  %v3498_v42 = vsel %vm3342_vm3, %v3452_v14, %v3488_v12 }
 0x1a7   : > { %v3499_v37 = vmin.f32 %v3497_v56, %v3475_v43  ;;  %v3500_v50 = vmin.f32 %v3498_v42, %v3476_v17  ;;  %v3501_v26 = vmin.f32 %v3490_v55, %v3477_v0  ;;  %v3502_v15 = vmin.f32 %v3492_v49, %v3478_v57 }
 0x1a8   : > { %v3503_v29 = vmax.f32 %v3497_v56, %v3475_v43  ;;  %v3504_v11 = vmax.f32 %v3498_v42, %v3476_v17  ;;  %v3505_v62 = vmax.f32 %v3490_v55, %v3477_v0  ;;  %v3506_v24 = vmax.f32 %v3492_v49, %v3478_v57 }
 0x1a9   : > { %v3511_v3 = vrot.slane %v3499_v37, 1  ;;  %v3512_v52 = vrot.slane %v3501_v26, 1  ;;  %v3514_v47 = vrot.slane %v3500_v50, 1  ;;  %v3515_v41 = vrot.slane %v3502_v15, 1 }
 0x1ab   : > { %v3513_v46 = vsel %vm3317_vm2, %v3511_v3, %v3512_v52  ;;  %v3516_v4 = vsel %vm3317_vm2, %v3514_v47, %v3515_v41  ;;  %v3521_v27 = vsel %vm3317_vm2, %v3512_v52, 3.4028235e+38  ;;  %v3522_v59 = vsel %vm3317_vm2, %v3515_v41, 3.4028235e+38 }
 0x1ac   : > { %v3527_v31 = vmax.f32 %v3503_v29, %v3513_v46  ;;  %v3528_v51 = vmax.f32 %v3504_v11, %v3516_v4  ;;  %v3529_v19 = vmax.f32 %v3505_v62, %v3521_v27  ;;  %v3530_v28 = vmax.f32 %v3506_v24, %v3522_v59 }
 0x1ad   : > { %v3523_v54 = vmin.f32 %v3503_v29, %v3513_v46  ;;  %v3524_v7 = vmin.f32 %v3504_v11, %v3516_v4  ;;  %v3525_v44 = vmin.f32 %v3505_v62, %v3521_v27  ;;  %v3526_v10 = vmin.f32 %v3506_v24, %v3522_v59 }
 0x1ae   : > { %v3535_v9 = vrot.slane %v3527_v31, 7  ;;  %v3536_v34 = vrot.slane %v3528_v51, 7  ;;  %v3537_v58 = vrot.slane %v3529_v19, 7  ;;  %v3539_v35 = vrot.slane %v3530_v28, 7 }
 0x1b0   : > { %v3538_v63 = vsel %vm3342_vm3, %v3535_v9, %v3537_v58  ;;  %v3540_v36 = vsel %vm3342_vm3, %v3536_v34, %v3539_v35  ;;  %v3545_v18 = vsel %vm3342_vm3, %v3499_v37, %v3535_v9  ;;  %v3546_v60 = vsel %vm3342_vm3, %v3500_v50, %v3536_v34 }
 0x1b1   : > { %v3547_v40 = vmin.f32 %v3545_v18, %v3523_v54  ;;  %v3548_v14 = vmin.f32 %v3546_v60, %v3524_v7  ;;  %v3549_v13 = vmin.f32 %v3538_v63, %v3525_v44  ;;  %v3550_v23 = vmin.f32 %v3540_v36, %v3526_v10 }
 0x1b2   : > { %v3551_v5 = vmax.f32 %v3545_v18, %v3523_v54  ;;  %v3552_v8 = vmax.f32 %v3546_v60, %v3524_v7  ;;  %v3553_v20 = vmax.f32 %v3538_v63, %v3525_v44  ;;  %v3554_v33 = vmax.f32 %v3540_v36, %v3526_v10 }
 0x1b3   : > { %v3559_v25 = vrot.slane %v3547_v40, 1  ;;  %v3560_v45 = vrot.slane %v3549_v13, 1  ;;  %v3562_v21 = vrot.slane %v3548_v14, 1  ;;  %v3563_v2 = vrot.slane %v3550_v23, 1 }
 0x1b5   : > { %v3561_v6 = vsel %vm3317_vm2, %v3559_v25, %v3560_v45  ;;  %v3564_v53 = vsel %vm3317_vm2, %v3562_v21, %v3563_v2  ;;  %v3569_v16 = vsel %vm3317_vm2, %v3560_v45, 3.4028235e+38  ;;  %v3570_v32 = vsel %vm3317_vm2, %v3563_v2, 3.4028235e+38 }
 0x1b6   : > { %v3575_v39 = vmax.f32 %v3551_v5, %v3561_v6  ;;  %v3576_v61 = vmax.f32 %v3552_v8, %v3564_v53  ;;  %v3577_v48 = vmax.f32 %v3553_v20, %v3569_v16  ;;  %v3578_v1 = vmax.f32 %v3554_v33, %v3570_v32 }
 0x1b7   : > { %v3571_v43 = vmin.f32 %v3551_v5, %v3561_v6  ;;  %v3572_v17 = vmin.f32 %v3552_v8, %v3564_v53  ;;  %v3573_v0 = vmin.f32 %v3553_v20, %v3569_v16  ;;  %v3574_v57 = vmin.f32 %v3554_v33, %v3570_v32 }
 0x1b8   : > { %v3583_v38 = vrot.slane %v3575_v39, 7  ;;  %v3584_v12 = vrot.slane %v3576_v61, 7  ;;  %v3585_v22 = vrot.slane %v3577_v48, 7  ;;  %v3587_v30 = vrot.slane %v3578_v1, 7 }
 0x1ba   : > { %v3586_v55 = vsel %vm3342_vm3, %v3583_v38, %v3585_v22  ;;  %v3588_v49 = vsel %vm3342_vm3, %v3584_v12, %v3587_v30  ;;  %v3593_v56 = vsel %vm3342_vm3, %v3547_v40, %v3583_v38  ;;  %v3594_v42 = vsel %vm3342_vm3, %v3548_v14, %v3584_v12 }
 0x1bb   : > { %v3595_v37 = vmin.f32 %v3593_v56, %v3571_v43  ;;  %v3596_v50 = vmin.f32 %v3594_v42, %v3572_v17  ;;  %v3597_v26 = vmin.f32 %v3586_v55, %v3573_v0  ;;  %v3598_v15 = vmin.f32 %v3588_v49, %v3574_v57 }
 0x1bc   : > { %v3599_v29 = vmax.f32 %v3593_v56, %v3571_v43  ;;  %v3600_v11 = vmax.f32 %v3594_v42, %v3572_v17  ;;  %v3601_v62 = vmax.f32 %v3586_v55, %v3573_v0  ;;  %v3602_v24 = vmax.f32 %v3588_v49, %v3574_v57 }
 0x1bd   : > { %v3607_v3 = vrot.slane %v3595_v37, 1  ;;  %v3608_v52 = vrot.slane %v3597_v26, 1  ;;  %v3610_v47 = vrot.slane %v3596_v50, 1  ;;  %v3611_v41 = vrot.slane %v3598_v15, 1 }
 0x1bf   : > { %v3609_v46 = vsel %vm3317_vm2, %v3607_v3, %v3608_v52  ;;  %v3612_v4 = vsel %vm3317_vm2, %v3610_v47, %v3611_v41  ;;  %v3617_v27 = vsel %vm3317_vm2, %v3608_v52, 3.4028235e+38  ;;  %v3618_v59 = vsel %vm3317_vm2, %v3611_v41, 3.4028235e+38 }
 0x1c0   : > { %v3623_v31 = vmax.f32 %v3599_v29, %v3609_v46  ;;  %v3624_v51 = vmax.f32 %v3600_v11, %v3612_v4  ;;  %v3625_v19 = vmax.f32 %v3601_v62, %v3617_v27  ;;  %v3626_v28 = vmax.f32 %v3602_v24, %v3618_v59 }
 0x1c1   : > { %v3619_v54 = vmin.f32 %v3599_v29, %v3609_v46  ;;  %v3620_v7 = vmin.f32 %v3600_v11, %v3612_v4  ;;  %v3621_v44 = vmin.f32 %v3601_v62, %v3617_v27  ;;  %v3622_v10 = vmin.f32 %v3602_v24, %v3618_v59 }
 0x1c2   : > { %v3631_v9 = vrot.slane %v3623_v31, 7  ;;  %v3632_v34 = vrot.slane %v3624_v51, 7  ;;  %v3633_v58 = vrot.slane %v3625_v19, 7  ;;  %v3635_v35 = vrot.slane %v3626_v28, 7 }
 0x1c4   : > { %v3634_v63 = vsel %vm3342_vm3, %v3631_v9, %v3633_v58  ;;  %v3636_v36 = vsel %vm3342_vm3, %v3632_v34, %v3635_v35  ;;  %v3641_v18 = vsel %vm3342_vm3, %v3595_v37, %v3631_v9  ;;  %v3642_v60 = vsel %vm3342_vm3, %v3596_v50, %v3632_v34 }
 0x1c5   : > { %v3643_v40 = vmin.f32 %v3641_v18, %v3619_v54  ;;  %v3644_v14 = vmin.f32 %v3642_v60, %v3620_v7  ;;  %v3645_v13 = vmin.f32 %v3634_v63, %v3621_v44  ;;  %v3646_v23 = vmin.f32 %v3636_v36, %v3622_v10 }
 0x1c6   : > { %v3647_v5 = vmax.f32 %v3641_v18, %v3619_v54  ;;  %v3648_v8 = vmax.f32 %v3642_v60, %v3620_v7  ;;  %v3649_v20 = vmax.f32 %v3634_v63, %v3621_v44  ;;  %v3650_v33 = vmax.f32 %v3636_v36, %v3622_v10 }
 0x1c7   : > { %v3655_v25 = vrot.slane %v3643_v40, 1  ;;  %v3656_v45 = vrot.slane %v3645_v13, 1  ;;  %v3658_v21 = vrot.slane %v3644_v14, 1  ;;  %v3659_v2 = vrot.slane %v3646_v23, 1 }
 0x1c9   : > { %v3657_v6 = vsel %vm3317_vm2, %v3655_v25, %v3656_v45  ;;  %v3660_v53 = vsel %vm3317_vm2, %v3658_v21, %v3659_v2  ;;  %v3665_v16 = vsel %vm3317_vm2, %v3656_v45, 3.4028235e+38  ;;  %v3666_v32 = vsel %vm3317_vm2, %v3659_v2, 3.4028235e+38 }
 0x1ca   : > { %v3671_v39 = vmax.f32 %v3647_v5, %v3657_v6  ;;  %v3672_v61 = vmax.f32 %v3648_v8, %v3660_v53  ;;  %v3673_v48 = vmax.f32 %v3649_v20, %v3665_v16  ;;  %v3674_v1 = vmax.f32 %v3650_v33, %v3666_v32 }
 0x1cb   : > { %v3667_v43 = vmin.f32 %v3647_v5, %v3657_v6  ;;  %v3668_v17 = vmin.f32 %v3648_v8, %v3660_v53  ;;  %v3669_v0 = vmin.f32 %v3649_v20, %v3665_v16  ;;  %v3670_v57 = vmin.f32 %v3650_v33, %v3666_v32 }
 0x1cc   : > { %v3679_v38 = vrot.slane %v3671_v39, 7  ;;  %v3680_v12 = vrot.slane %v3672_v61, 7  ;;  %v3681_v22 = vrot.slane %v3673_v48, 7  ;;  %v3683_v30 = vrot.slane %v3674_v1, 7 }
 0x1ce   : > { %v3682_v55 = vsel %vm3342_vm3, %v3679_v38, %v3681_v22  ;;  %v3684_v49 = vsel %vm3342_vm3, %v3680_v12, %v3683_v30  ;;  %v3689_v56 = vsel %vm3342_vm3, %v3643_v40, %v3679_v38  ;;  %v3690_v42 = vsel %vm3342_vm3, %v3644_v14, %v3680_v12 }
 0x1cf   : > { %v3691_v37 = vmin.f32 %v3689_v56, %v3667_v43  ;;  %v3692_v50 = vmin.f32 %v3690_v42, %v3668_v17  ;;  %v3693_v26 = vmin.f32 %v3682_v55, %v3669_v0  ;;  %v3694_v15 = vmin.f32 %v3684_v49, %v3670_v57 }
 0x1d0   : > { %v3695_v29 = vmax.f32 %v3689_v56, %v3667_v43  ;;  %v3696_v11 = vmax.f32 %v3690_v42, %v3668_v17  ;;  %v3697_v62 = vmax.f32 %v3682_v55, %v3669_v0  ;;  %v3698_v24 = vmax.f32 %v3684_v49, %v3670_v57 }
 0x1d1   : > { %v3703_v3 = vrot.slane %v3691_v37, 1  ;;  %v3704_v52 = vrot.slane %v3693_v26, 1  ;;  %v3706_v47 = vrot.slane %v3692_v50, 1  ;;  %v3707_v41 = vrot.slane %v3694_v15, 1 }
 0x1d3   : > { %v3705_v46 = vsel %vm3317_vm2, %v3703_v3, %v3704_v52  ;;  %v3708_v4 = vsel %vm3317_vm2, %v3706_v47, %v3707_v41  ;;  %v3713_v27 = vsel %vm3317_vm2, %v3704_v52, 3.4028235e+38  ;;  %v3714_v59 = vsel %vm3317_vm2, %v3707_v41, 3.4028235e+38 }
 0x1d4   : > { %v3719_v31 = vmax.f32 %v3695_v29, %v3705_v46  ;;  %v3720_v51 = vmax.f32 %v3696_v11, %v3708_v4  ;;  %v3721_v19 = vmax.f32 %v3697_v62, %v3713_v27  ;;  %v3722_v28 = vmax.f32 %v3698_v24, %v3714_v59 }
 0x1d5   : > { %v3715_v54 = vmin.f32 %v3695_v29, %v3705_v46  ;;  %v3716_v7 = vmin.f32 %v3696_v11, %v3708_v4  ;;  %v3717_v44 = vmin.f32 %v3697_v62, %v3713_v27  ;;  %v3718_v10 = vmin.f32 %v3698_v24, %v3714_v59 }
 0x1d6   : > { %v3727_v9 = vrot.slane %v3719_v31, 7  ;;  %v3728_v34 = vrot.slane %v3720_v51, 7  ;;  %v3729_v58 = vrot.slane %v3721_v19, 7  ;;  %v3731_v35 = vrot.slane %v3722_v28, 7 }
 0x1d8   : > { %v3730_v63 = vsel %vm3342_vm3, %v3727_v9, %v3729_v58  ;;  %v3732_v36 = vsel %vm3342_vm3, %v3728_v34, %v3731_v35  ;;  %v3737_v18 = vsel %vm3342_vm3, %v3691_v37, %v3727_v9  ;;  %v3738_v60 = vsel %vm3342_vm3, %v3692_v50, %v3728_v34 }
 0x1d9   : > { %v3739_v40 = vmin.f32 %v3737_v18, %v3715_v54  ;;  %v3740_v14 = vmin.f32 %v3738_v60, %v3716_v7  ;;  %v3741_v13 = vmin.f32 %v3730_v63, %v3717_v44  ;;  %v3742_v23 = vmin.f32 %v3732_v36, %v3718_v10 }
 0x1da   : > { %v3743_v5 = vmax.f32 %v3737_v18, %v3715_v54  ;;  %v3744_v8 = vmax.f32 %v3738_v60, %v3716_v7  ;;  %v3745_v20 = vmax.f32 %v3730_v63, %v3717_v44  ;;  %v3746_v33 = vmax.f32 %v3732_v36, %v3718_v10 }
 0x1db   : > { %v3751_v25 = vrot.slane %v3739_v40, 1  ;;  %v3752_v45 = vrot.slane %v3741_v13, 1  ;;  %v3754_v21 = vrot.slane %v3740_v14, 1  ;;  %v3755_v2 = vrot.slane %v3742_v23, 1 }
 0x1dd   : > { %v3753_v6 = vsel %vm3317_vm2, %v3751_v25, %v3752_v45  ;;  %v3756_v53 = vsel %vm3317_vm2, %v3754_v21, %v3755_v2  ;;  %v3761_v16 = vsel %vm3317_vm2, %v3752_v45, 3.4028235e+38  ;;  %v3762_v32 = vsel %vm3317_vm2, %v3755_v2, 3.4028235e+38 }
 0x1de   : > { %v3767_v39 = vmax.f32 %v3743_v5, %v3753_v6  ;;  %v3768_v61 = vmax.f32 %v3744_v8, %v3756_v53  ;;  %v3769_v48 = vmax.f32 %v3745_v20, %v3761_v16  ;;  %v3770_v1 = vmax.f32 %v3746_v33, %v3762_v32 }
 0x1df   : > { %v3763_v43 = vmin.f32 %v3743_v5, %v3753_v6  ;;  %v3764_v17 = vmin.f32 %v3744_v8, %v3756_v53  ;;  %v3765_v0 = vmin.f32 %v3745_v20, %v3761_v16  ;;  %v3766_v57 = vmin.f32 %v3746_v33, %v3762_v32 }
 0x1e0   : > { %v3775_v38 = vrot.slane %v3767_v39, 7  ;;  %v3776_v12 = vrot.slane %v3768_v61, 7  ;;  %v3777_v22 = vrot.slane %v3769_v48, 7  ;;  %v3779_v30 = vrot.slane %v3770_v1, 7 }
 0x1e2   : > { %v3778_v55 = vsel %vm3342_vm3, %v3775_v38, %v3777_v22  ;;  %v3780_v49 = vsel %vm3342_vm3, %v3776_v12, %v3779_v30  ;;  %v3785_v56 = vsel %vm3342_vm3, %v3739_v40, %v3775_v38  ;;  %v3786_v42 = vsel %vm3342_vm3, %v3740_v14, %v3776_v12 }
 0x1e3   : > { %v3787_v37 = vmin.f32 %v3785_v56, %v3763_v43  ;;  %v3788_v50 = vmin.f32 %v3786_v42, %v3764_v17  ;;  %v3789_v26 = vmin.f32 %v3778_v55, %v3765_v0  ;;  %v3790_v15 = vmin.f32 %v3780_v49, %v3766_v57 }
 0x1e4   : > { %v3791_v29 = vmax.f32 %v3785_v56, %v3763_v43  ;;  %v3792_v11 = vmax.f32 %v3786_v42, %v3764_v17  ;;  %v3793_v62 = vmax.f32 %v3778_v55, %v3765_v0  ;;  %v3794_v24 = vmax.f32 %v3780_v49, %v3766_v57 }
 0x1e5   : > { %v3799_v3 = vrot.slane %v3787_v37, 1  ;;  %v3800_v52 = vrot.slane %v3789_v26, 1  ;;  %v3802_v47 = vrot.slane %v3788_v50, 1  ;;  %v3803_v41 = vrot.slane %v3790_v15, 1 }
 0x1e7   : > { %v3801_v46 = vsel %vm3317_vm2, %v3799_v3, %v3800_v52  ;;  %v3804_v4 = vsel %vm3317_vm2, %v3802_v47, %v3803_v41  ;;  %v3809_v27 = vsel %vm3317_vm2, %v3800_v52, 3.4028235e+38  ;;  %v3810_v59 = vsel %vm3317_vm2, %v3803_v41, 3.4028235e+38 }
 0x1e8   : > { %v3815_v31 = vmax.f32 %v3791_v29, %v3801_v46  ;;  %v3816_v51 = vmax.f32 %v3792_v11, %v3804_v4  ;;  %v3817_v19 = vmax.f32 %v3793_v62, %v3809_v27  ;;  %v3818_v28 = vmax.f32 %v3794_v24, %v3810_v59 }
 0x1e9   : > { %v3811_v54 = vmin.f32 %v3791_v29, %v3801_v46  ;;  %v3812_v7 = vmin.f32 %v3792_v11, %v3804_v4  ;;  %v3813_v44 = vmin.f32 %v3793_v62, %v3809_v27  ;;  %v3814_v10 = vmin.f32 %v3794_v24, %v3810_v59 }
 0x1ea   : > { %v3823_v9 = vrot.slane %v3815_v31, 7  ;;  %v3824_v34 = vrot.slane %v3816_v51, 7  ;;  %v3825_v58 = vrot.slane %v3817_v19, 7  ;;  %v3827_v35 = vrot.slane %v3818_v28, 7 }
 0x1ec   : > { %v3826_v63 = vsel %vm3342_vm3, %v3823_v9, %v3825_v58  ;;  %v3828_v36 = vsel %vm3342_vm3, %v3824_v34, %v3827_v35  ;;  %v3833_v18 = vsel %vm3342_vm3, %v3787_v37, %v3823_v9  ;;  %v3834_v60 = vsel %vm3342_vm3, %v3788_v50, %v3824_v34 }
 0x1ed   : > { %v3835_v40 = vmin.f32 %v3833_v18, %v3811_v54  ;;  %v3836_v14 = vmin.f32 %v3834_v60, %v3812_v7  ;;  %v3837_v13 = vmin.f32 %v3826_v63, %v3813_v44  ;;  %v3838_v23 = vmin.f32 %v3828_v36, %v3814_v10 }
 0x1ee   : > { %v3839_v5 = vmax.f32 %v3833_v18, %v3811_v54  ;;  %v3840_v8 = vmax.f32 %v3834_v60, %v3812_v7  ;;  %v3841_v20 = vmax.f32 %v3826_v63, %v3813_v44  ;;  %v3842_v33 = vmax.f32 %v3828_v36, %v3814_v10 }
 0x1ef   : > { %v3847_v25 = vrot.slane %v3835_v40, 1  ;;  %v3848_v45 = vrot.slane %v3837_v13, 1  ;;  %v3850_v21 = vrot.slane %v3836_v14, 1  ;;  %v3851_v2 = vrot.slane %v3838_v23, 1 }
 0x1f1   : > { %v3849_v6 = vsel %vm3317_vm2, %v3847_v25, %v3848_v45  ;;  %v3852_v53 = vsel %vm3317_vm2, %v3850_v21, %v3851_v2  ;;  %v3857_v16 = vsel %vm3317_vm2, %v3848_v45, 3.4028235e+38  ;;  %v3858_v32 = vsel %vm3317_vm2, %v3851_v2, 3.4028235e+38 }
 0x1f2   : > { %v3859_v39 = vmin.f32 %v3839_v5, %v3849_v6  ;;  %v3860_v61 = vmin.f32 %v3840_v8, %v3852_v53  ;;  %v3861_v48 = vmin.f32 %v3841_v20, %v3857_v16  ;;  %v3862_v1 = vmin.f32 %v3842_v33, %v3858_v32 }
 0x1f3   : > { %v3863_v38 = vmax.f32 %v3839_v5, %v3849_v6  ;;  %v3864_v12 = vmax.f32 %v3840_v8, %v3852_v53  ;;  %v3865_v22 = vmax.f32 %v3841_v20, %v3857_v16  ;;  %v3866_v30 = vmax.f32 %v3842_v33, %v3858_v32 }
 0x1f4   : > { %3887 = vst [vmem:[%s297_s11] sm:$0xff] %v3859_v39  ;;  %3888 = vst [vmem:[%s297_s11 + $0x8] sm:$0xff] %v3860_v61 }
 0x1f5   : > { %3889 = vst [vmem:[%s297_s11 + $0x10] sm:$0xf] %v3861_v48  ;;  %3890 = vst [vmem:[%s297_s11 + $0x18] sm:$0xf] %v3862_v1  ;;  %v3871_v43 = vrot.slane %v3863_v38, 7  ;;  %v3872_v17 = vrot.slane %v3864_v12, 7 }
 0x1f6   : > { %v3873_v0 = vrot.slane %v3865_v22, 7  ;;  %v3875_v57 = vrot.slane %v3866_v30, 7 }
 0x1f7   : > { %v3881_v56 = vsel %vm3342_vm3, %v3835_v40, %v3871_v43  ;;  %v3882_v42 = vsel %vm3342_vm3, %v3836_v14, %v3872_v17 }
 0x1f8   : > { %v3874_v55 = vsel %vm3342_vm3, %v3871_v43, %v3873_v0  ;;  %v3876_v49 = vsel %vm3342_vm3, %v3872_v17, %v3875_v57  ;;  %3883 = vst [vmem:[%s292_s14] sm:$0xff] %v3881_v56  ;;  %3884 = vst [vmem:[%s292_s14 + $0x8] sm:$0xff] %v3882_v42 }
 0x1f9   : > { %3885 = vst [vmem:[%s292_s14 + $0x10] sm:$0xf] %v3874_v55  ;;  %3886 = vst [vmem:[%s292_s14 + $0x18] sm:$0xf] %v3876_v49 }
 0x1fa PF: > { %s16_s18 = sadd.s32 1, %s4215_s18  }
 0x1fb   : > { %p13_p4 = scmp.ge.s32.totalorder %s16_s18, 4  }
 0x1fd   :  { %15 = sbr.rel (!%p13_p4) target bundleno = 1 (0x1), region = 132 }

</bundles_post_ra>
